<compile_context>
chip_gen: v7x
topology: tpu7x:2x2x1
jax: 0.10.0
libtpu: 0.0.40
codegen_flags: <defaults>
</compile_context>

<pallas_src>
import functools

import jax
import jax.numpy as jnp
from jax.experimental import pallas as pl
from jax.experimental.pallas import tpu as pltpu


# ---------------------------------------------------------------------------
# Kernel
# ---------------------------------------------------------------------------
def _sar_classify_head_kernel(feat_ref, scale_ref, w_ref, b_ref, out_ref,
                              acc_ref, *, inv_hw):
    """Fused: global-avg-pool (over HW) -> dropout scale -> fc.

    grid = (batch tiles, HW chunks); axis 1 is the spatial reduction axis.

    feat_ref  : VMEM (TB, C, THW)  feature chunk, native NC(HW) layout (bf16/f32)
    scale_ref : VMEM (TB, C) f32   dropout scale per element (0.0 or 1/(1-p))
    w_ref     : VMEM (C, Npad) f32 fc weight, transposed + lane-padded
    b_ref     : VMEM (1, Npad) f32 fc bias, lane-padded
    out_ref   : VMEM (TB, Npad) f32 logits (padded lanes are zero)
    acc_ref   : VMEM (TB, C) f32   running spatial-sum accumulator (scratch)
    """
    k = pl.program_id(1)

    @pl.when(k == 0)
    def _():
        acc_ref[...] = jnp.zeros_like(acc_ref)

    # Partial spatial sum for this HW chunk; accumulate in f32.
    acc_ref[...] += jnp.sum(feat_ref[...].astype(jnp.float32), axis=-1)

    @pl.when(k == pl.num_programs(1) - 1)
    def _():
        pooled = acc_ref[...] * inv_hw                 # AdaptiveAvgPool2d(1)+view
        dropped = pooled * scale_ref[...]              # Dropout(p=0.5), train mode
        logits = jnp.dot(dropped, w_ref[...],
                         preferred_element_type=jnp.float32) + b_ref[...]
        out_ref[...] = logits.astype(out_ref.dtype)


# ---------------------------------------------------------------------------
# Tiling helpers (trace-time, static shapes)
# ---------------------------------------------------------------------------
def _pick_hw_tile(hw, max_tile=512):
    """HW block must equal HW or be a multiple of 128 that divides HW."""
    if hw <= max_tile:
        return hw
    for t in range(max_tile, 127, -128):
        if hw % t == 0:
            return t
    # TODO(synk): HW has no 128-multiple divisor <= max_tile; fall back to a
    # single (possibly large) HW block.
    return hw


def _pick_batch_tile(b, c, thw, itemsize, per_buf_budget=4 << 20):
    """Batch tile: full batch if small, else a multiple of 8 sized for VMEM."""
    if b <= 8:
        return b                        # block dim == full array dim: always legal
    rows = max(8, ((per_buf_budget // (c * thw * itemsize)) // 8) * 8)
    return int(min(rows, 64, (b // 8) * 8))


# ---------------------------------------------------------------------------
# Wrapper
# ---------------------------------------------------------------------------
@functools.partial(jax.jit, static_argnames=("train",))
def multi_decoder_sar_classify(feature_nchw, fc_weight, fc_bias, rng_key,
                               train=True):
    """forward(type='classify') head of MultiDecoderSAR.

    feature_nchw : (B, 512, H, W)       encoder feature map (f32 or bf16)
    fc_weight    : (decoder_num, 512)   PyTorch Linear layout
    fc_bias      : (decoder_num,)
    rng_key      : jax PRNGKey for the dropout mask
    returns      : (B, decoder_num) f32 logits
    """
    B, C, H, W = feature_nchw.shape
    N, C_w = fc_weight.shape
    assert C_w == C
    HW = H * W

    # Native layout; bf16 ingest halves the dominant HBM read (ideally the
    # encoder already emits bf16 — this cast is the fallback).
    feat = feature_nchw.reshape(B, C, HW)
    if feat.dtype == jnp.float32:
        feat = feat.astype(jnp.bfloat16)

    # Dropout(p=0.5). The PyTorch module builds nn.Dropout inline in forward(),
    # so it is always in training mode -> always active (train=True default).
    p = 0.5
    if train:
        keep = jax.random.bernoulli(rng_key, 1.0 - p, (B, C))
        scale = keep.astype(jnp.float32) * (1.0 / (1.0 - p))
    else:
        scale = jnp.ones((B, C), jnp.float32)

    # fc weight/bias: transpose and pad output lanes to a multiple of 128 so
    # the kernel's output store is lane-dense.
    Npad = max(128, ((N + 127) // 128) * 128)
    w = jnp.pad(fc_weight.T.astype(jnp.float32), ((0, 0), (0, Npad - N)))
    b = jnp.pad(fc_bias.astype(jnp.float32).reshape(1, N), ((0, 0), (0, Npad - N)))

    THW = _pick_hw_tile(HW)
    TB = _pick_batch_tile(B, C, THW, feat.dtype.itemsize)
    grid = (pl.cdiv(B, TB), pl.cdiv(HW, THW))

    kernel = functools.partial(_sar_classify_head_kernel, inv_hw=1.0 / float(HW))

    logits_pad = pl.pallas_call(
        kernel,
        out_shape=jax.ShapeDtypeStruct((B, Npad), jnp.float32),
        grid_spec=pltpu.PrefetchScalarGridSpec(
            num_scalar_prefetch=0,
            grid=grid,
            in_specs=[
                pl.BlockSpec((TB, C, THW), lambda i, k: (i, 0, k)),  # feature
                pl.BlockSpec((TB, C), lambda i, k: (i, 0)),          # dropout scale
                pl.BlockSpec((C, Npad), lambda i, k: (0, 0)),        # fc weight
                pl.BlockSpec((1, Npad), lambda i, k: (0, 0)),        # fc bias
            ],
            out_specs=pl.BlockSpec((TB, Npad), lambda i, k: (i, 0)),
            scratch_shapes=[pltpu.VMEM((TB, C), jnp.float32)],
        ),
        compiler_params=pltpu.CompilerParams(
            dimension_semantics=("parallel", "arbitrary"),
            vmem_limit_bytes=32 * 1024 * 1024,
        ),
    )(feat, scale, w, b)

    return logits_pad[:, :N]


# ---------------------------------------------------------------------------
# Demo / self-check
# ---------------------------------------------------------------------------
if __name__ == "__main__":
    key = jax.random.PRNGKey(0)
    k_feat, k_w, k_b, k_drop = jax.random.split(key, 4)

    # Small, module-consistent shapes: fc is hard-coded to 512 input features.
    B, C, H, W = 2, 512, 4, 4
    decoder_num = 4

    feature = jax.random.normal(k_feat, (B, C, H, W), dtype=jnp.float32)
    fc_weight = (jax.random.normal(k_w, (decoder_num, C), dtype=jnp.float32)
                 * (1.0 / jnp.sqrt(jnp.float32(C))))
    fc_bias = jax.random.normal(k_b, (decoder_num,), dtype=jnp.float32) * 0.01

    logits = multi_decoder_sar_classify(feature, fc_weight, fc_bias, k_drop)
    logits = jax.block_until_ready(logits)

    # Pure-JAX reference (same bf16 ingest, same dropout mask).
    feat_ref = feature.astype(jnp.bfloat16).astype(jnp.float32).reshape(B, C, H * W)
    pooled_ref = jnp.mean(feat_ref, axis=-1)
    keep_ref = jax.random.bernoulli(k_drop, 0.5, (B, C)).astype(jnp.float32) * 2.0
    ref = (pooled_ref * keep_ref) @ fc_weight.T + fc_bias

    assert logits.shape == (B, decoder_num)
    assert logits.dtype == jnp.float32
    assert bool(jnp.all(jnp.isfinite(logits)))
    assert bool(jnp.allclose(logits, ref, rtol=5e-2, atol=5e-2)), (logits, ref)
    print("KERNEL_OK")
</pallas_src>

<mosaic_0001>
module attributes {stable_mosaic.version = 11 : i64} {
  func.func @_sar_classify_head_kernel(%arg0: i32, %arg1: i32, %arg2: memref<2x512x16xbf16, #tpu.memory_space<vmem>>, %arg3: memref<2x512xf32, #tpu.memory_space<vmem>>, %arg4: memref<512x128xf32, #tpu.memory_space<vmem>>, %arg5: memref<1x128xf32, #tpu.memory_space<vmem>>, %arg6: memref<2x128xf32, #tpu.memory_space<vmem>>, %arg7: memref<2x512xf32, #tpu.memory_space<vmem>>) attributes {dimension_semantics = [#tpu.dimension_semantics<parallel>, #tpu.dimension_semantics<arbitrary>], iteration_bounds = array<i64: 1, 1>, scalar_prefetch = 0 : i64, scratch_operands = 1 : i64, tpu.core_type = #tpu.core_type<tc>, window_params = [{transform_indices = @transform_0, window_bounds = array<i64: 2, 512, 16>}, {transform_indices = @transform_1, window_bounds = array<i64: 2, 512>}, {pipeline_mode = #tpu.pipeline_mode<synchronous>, transform_indices = @transform_2, window_bounds = array<i64: 512, 128>}, {pipeline_mode = #tpu.pipeline_mode<synchronous>, transform_indices = @transform_3, window_bounds = array<i64: 1, 128>}, {transform_indices = @transform_4, window_bounds = array<i64: 2, 128>}]} {
    %c0_i32 = arith.constant 0 : i32
    %0 = arith.cmpi eq, %arg1, %c0_i32 : i32
    %1 = arith.extui %0 : i1 to i32
    %c0_i32_0 = arith.constant 0 : i32
    %2 = arith.cmpi ne, %1, %c0_i32_0 : i32
    scf.if %2 {
      %cst_9 = arith.constant 0.000000e+00 : f32
      %12 = vector.broadcast %cst_9 : f32 to vector<2x512xf32>
      %c0_10 = arith.constant 0 : index
      %c0_11 = arith.constant 0 : index
      %13 = vector.load %arg7[%c0_10, %c0_11] : memref<2x512xf32, #tpu.memory_space<vmem>>, vector<2x512xf32>
      tpu.vector_store %arg7[%c0_10, %c0_11], %12 {strides = array<i32>} : memref<2x512xf32, #tpu.memory_space<vmem>>, vector<2x512xf32>,
    } else {
    }
    %c0 = arith.constant 0 : index
    %c0_1 = arith.constant 0 : index
    %3 = vector.load %arg7[%c0, %c0_1] : memref<2x512xf32, #tpu.memory_space<vmem>>, vector<2x512xf32>
    %c0_2 = arith.constant 0 : index
    %c0_3 = arith.constant 0 : index
    %c0_4 = arith.constant 0 : index
    %4 = vector.load %arg2[%c0_2, %c0_3, %c0_4] : memref<2x512x16xbf16, #tpu.memory_space<vmem>>, vector<2x512x16xbf16>
    %5 = arith.extf %4 : vector<2x512x16xbf16> to vector<2x512x16xf32>
    %cst = arith.constant dense<0.000000e+00> : vector<2x512xf32>
    %6 = vector.multi_reduction <add>, %5, %cst [2] : vector<2x512x16xf32> to vector<2x512xf32>
    %7 = arith.addf %3, %6 : vector<2x512xf32>
    %c0_5 = arith.constant 0 : index
    %c0_6 = arith.constant 0 : index
    %8 = vector.load %arg7[%c0_5, %c0_6] : memref<2x512xf32, #tpu.memory_space<vmem>>, vector<2x512xf32>
    tpu.vector_store %arg7[%c0_5, %c0_6], %7 {strides = array<i32>} : memref<2x512xf32, #tpu.memory_space<vmem>>, vector<2x512xf32>,
    %c0_i32_7 = arith.constant 0 : i32
    %9 = arith.cmpi eq, %arg1, %c0_i32_7 : i32
    %10 = arith.extui %9 : i1 to i32
    %c0_i32_8 = arith.constant 0 : i32
    %11 = arith.cmpi ne, %10, %c0_i32_8 : i32
    scf.if %11 {
      %c0_9 = arith.constant 0 : index
      %c0_10 = arith.constant 0 : index
      %12 = vector.load %arg7[%c0_9, %c0_10] : memref<2x512xf32, #tpu.memory_space<vmem>>, vector<2x512xf32>
      %cst_11 = arith.constant 6.250000e-02 : f32
      %13 = vector.broadcast %cst_11 : f32 to vector<2x512xf32>
      %14 = arith.mulf %12, %13 : vector<2x512xf32>
      %c0_12 = arith.constant 0 : index
      %c0_13 = arith.constant 0 : index
      %15 = vector.load %arg3[%c0_12, %c0_13] : memref<2x512xf32, #tpu.memory_space<vmem>>, vector<2x512xf32>
      %16 = arith.mulf %14, %15 : vector<2x512xf32>
      %c0_14 = arith.constant 0 : index
      %c0_15 = arith.constant 0 : index
      %17 = vector.load %arg4[%c0_14, %c0_15] : memref<512x128xf32, #tpu.memory_space<vmem>>, vector<512x128xf32>
      %cst_16 = arith.constant dense<0.000000e+00> : vector<2x128xf32>
      %18 = tpu.matmul %16, %17, %cst_16 {dimension_numbers = #tpu.dot_dimension_numbers<[1], [0], [0], [1], [0, 0, 1, 1], [], []>} : vector<2x512xf32>, vector<512x128xf32>, vector<2x128xf32> -> vector<2x128xf32>
      %c0_17 = arith.constant 0 : index
      %c0_18 = arith.constant 0 : index
      %19 = vector.load %arg5[%c0_17, %c0_18] : memref<1x128xf32, #tpu.memory_space<vmem>>, vector<1x128xf32>
      %20 = vector.broadcast %19 : vector<1x128xf32> to vector<2x128xf32>
      %21 = arith.addf %18, %20 : vector<2x128xf32>
      %c0_19 = arith.constant 0 : index
      %c0_20 = arith.constant 0 : index
      %22 = vector.load %arg6[%c0_19, %c0_20] : memref<2x128xf32, #tpu.memory_space<vmem>>, vector<2x128xf32>
      tpu.vector_store %arg6[%c0_19, %c0_20], %21 {strides = array<i32>} : memref<2x128xf32, #tpu.memory_space<vmem>>, vector<2x128xf32>,
    } else {
    }
    return
  }
  func.func @transform_0(%arg0: i32, %arg1: i32) -> (i32, i32, i32) {
    %c0_i32 = arith.constant 0 : i32
    %c0_i32_0 = arith.constant 0 : i32
    return %arg0, %c0_i32, %arg1 : i32, i32, i32
  }
  func.func @transform_1(%arg0: i32, %arg1: i32) -> (i32, i32) {
    %c0_i32 = arith.constant 0 : i32
    %c0_i32_0 = arith.constant 0 : i32
    return %arg0, %c0_i32 : i32, i32
  }
  func.func @transform_2(%arg0: i32, %arg1: i32) -> (i32, i32) {
    %c0_i32 = arith.constant 0 : i32
    %c0_i32_0 = arith.constant 0 : i32
    %c0_i32_1 = arith.constant 0 : i32
    return %c0_i32, %c0_i32_0 : i32, i32
  }
  func.func @transform_3(%arg0: i32, %arg1: i32) -> (i32, i32) {
    %c0_i32 = arith.constant 0 : i32
    %c0_i32_0 = arith.constant 0 : i32
    %c0_i32_1 = arith.constant 0 : i32
    return %c0_i32, %c0_i32_0 : i32, i32
  }
  func.func @transform_4(%arg0: i32, %arg1: i32) -> (i32, i32) {
    %c0_i32 = arith.constant 0 : i32
    %c0_i32_0 = arith.constant 0 : i32
    return %arg0, %c0_i32 : i32, i32
  }
}

</mosaic_0001>

<bundles_post_ra>
// kernel: multi_decoder_sar_classify.1
= control target key start
LH: loop header
LB: loop body
LE: loop exit
PB: predicated region body
PF: predicated region fallthrough
CT: control target
= control target key end

     0   :  { %vm280_vm0 = vcmask 130048   ;;  %s11911_s0 = inlined_call_operand.vmem [shape: bf16[2,512,16], index: 0, kind: input, shape index: {}]   ;;  %s11912_s1 = inlined_call_operand.vmem [shape: f32[2,512], index: 1, kind: input, shape index: {}]   ;;  %s11913_s2 = inlined_call_operand.vmem [shape: f32[512,128], index: 2, kind: input, shape index: {}]   ;;  %s11914_s3 = inlined_call_operand.vmem [shape: f32[1,128], index: 3, kind: input, shape index: {}]   ;;  %s11915_s4 = inlined_call_operand.hbm [shape: f32[2,128], index: 4, kind: output, shape index: {}]  }
   0x1   :  { %v8138_v0 = vld [vmem:[%s11911_s0 + $0x8] sm:$0xff]   ;;  %v7883_v1 = vld [vmem:[%s11911_s0] sm:$0xff]   ;;  %v8139_v6 = vld [vmem:[%s11911_s0 + $0x10] sm:$0xff]  }
   0x2   :  { %v7888_v2 = vunpack.c.l.bf16 %v8138_v0  ;;  %v7884_v3 = vunpack.c.l.bf16 %v7883_v1  ;;  %v7889_v4 = vunpack.c.h.bf16 %v8138_v0  ;;  %v7885_v5 = vunpack.c.h.bf16 %v7883_v1  ;;  %v8140_v13 = vld [vmem:[%s11911_s0 + $0x18] sm:$0xff]   ;;  %v8141_v18 = vld [vmem:[%s11911_s0 + $0x20] sm:$0xff]   ;;  %v8142_v23 = vld [vmem:[%s11911_s0 + $0x28] sm:$0xff]  }
   0x3   :  { %v7893_v11 = vunpack.c.h.bf16 %v8139_v6  ;;  %v7892_v12 = vunpack.c.l.bf16 %v8139_v6  ;;  %v7897_v16 = vunpack.c.h.bf16 %v8140_v13  ;;  %v7896_v17 = vunpack.c.l.bf16 %v8140_v13 }
   0x4   :  { %v287_v7 = vsel %vm280_vm0, %v7888_v2, 0.0  ;;  %v281_v8 = vsel %vm280_vm0, %v7884_v3, 0.0  ;;  %v290_v9 = vsel %vm280_vm0, %v7889_v4, 0.0  ;;  %v284_v10 = vsel %vm280_vm0, %v7885_v5, 0.0 }
   0x5   :  { %288 = vadd.xlane.f32.xlu1 %v287_v7  ;;  %282 = vadd.xlane.f32.xlu0 %v281_v8  ;;  %v296_v14 = vsel %vm280_vm0, %v7893_v11, 0.0  ;;  %v293_v15 = vsel %vm280_vm0, %v7892_v12, 0.0  ;;  %v302_v19 = vsel %vm280_vm0, %v7897_v16, 0.0  ;;  %v299_v20 = vsel %vm280_vm0, %v7896_v17, 0.0 }
   0x6   :  { %v7901_v21 = vunpack.c.h.bf16 %v8141_v18  ;;  %v7900_v22 = vunpack.c.l.bf16 %v8141_v18 }
   0x9   :  { %291 = vadd.xlane.f32.xlu1 %v290_v9  ;;  %285 = vadd.xlane.f32.xlu0 %v284_v10 }
   0xd   :  { %297 = vadd.xlane.f32.xlu1 %v296_v14  ;;  %294 = vadd.xlane.f32.xlu0 %v293_v15 }
   0xe   :  { %9 = vsyncpa [#allocation4], 0  ;;  %v308_v24 = vsel %vm280_vm0, %v7901_v21, 0.0  ;;  %v305_v25 = vsel %vm280_vm0, %v7900_v22, 0.0  ;;  %v7905_v26 = vunpack.c.h.bf16 %v8142_v23  ;;  %v7904_v27 = vunpack.c.l.bf16 %v8142_v23  ;;  %v8143_v28 = vld [vmem:[%s11911_s0 + $0x30] sm:$0xff]   ;;  %v8144_v33 = vld [vmem:[%s11911_s0 + $0x38] sm:$0xff]  }
   0xf   :  { %v7909_v31 = vunpack.c.h.bf16 %v8143_v28  ;;  %v7908_v32 = vunpack.c.l.bf16 %v8143_v28  ;;  %v7913_v36 = vunpack.c.h.bf16 %v8144_v33  ;;  %v7912_v37 = vunpack.c.l.bf16 %v8144_v33  ;;  %v8145_v38 = vld [vmem:[%s11911_s0 + $0x40] sm:$0xff]   ;;  %v8146_v43 = vld [vmem:[%s11911_s0 + $0x48] sm:$0xff]   ;;  %v8147_v48 = vld [vmem:[%s11911_s0 + $0x50] sm:$0xff]  }
  0x10   :  { %v314_v29 = vsel %vm280_vm0, %v7905_v26, 0.0  ;;  %v311_v30 = vsel %vm280_vm0, %v7904_v27, 0.0  ;;  %v7917_v41 = vunpack.c.h.bf16 %v8145_v38  ;;  %v7916_v42 = vunpack.c.l.bf16 %v8145_v38  ;;  %v8148_v53 = vld [vmem:[%s11911_s0 + $0x58] sm:$0xff]   ;;  %v8149_v58 = vld [vmem:[%s11911_s0 + $0x60] sm:$0xff]   ;;  %v8150_v63 = vld [vmem:[%s11911_s0 + $0x68] sm:$0xff]  }
  0x11   :  { %303 = vadd.xlane.f32.xlu1 %v302_v19  ;;  %300 = vadd.xlane.f32.xlu0 %v299_v20  ;;  %v320_v34 = vsel %vm280_vm0, %v7909_v31, 0.0  ;;  %v317_v35 = vsel %vm280_vm0, %v7908_v32, 0.0  ;;  %v326_v39 = vsel %vm280_vm0, %v7913_v36, 0.0  ;;  %v323_v40 = vsel %vm280_vm0, %v7912_v37, 0.0  ;;  %v8151_v4 = vld [vmem:[%s11911_s0 + $0x70] sm:$0xff]   ;;  %v8152_v9 = vld [vmem:[%s11911_s0 + $0x78] sm:$0xff]  }
  0x12   :  { %v332_v44 = vsel %vm280_vm0, %v7917_v41, 0.0  ;;  %v329_v45 = vsel %vm280_vm0, %v7916_v42, 0.0  ;;  %v7921_v46 = vunpack.c.h.bf16 %v8146_v43  ;;  %v7920_v47 = vunpack.c.l.bf16 %v8146_v43  ;;  %v8153_v14 = vld [vmem:[%s11911_s0 + $0x80] sm:$0xff]   ;;  %v8154_v19 = vld [vmem:[%s11911_s0 + $0x88] sm:$0xff]  }
  0x13   :  { %v7925_v51 = vunpack.c.h.bf16 %v8147_v48  ;;  %v7924_v52 = vunpack.c.l.bf16 %v8147_v48  ;;  %v7929_v56 = vunpack.c.h.bf16 %v8148_v53  ;;  %v7928_v57 = vunpack.c.l.bf16 %v8148_v53 }
  0x14   :  { %v338_v49 = vsel %vm280_vm0, %v7921_v46, 0.0  ;;  %v335_v50 = vsel %vm280_vm0, %v7920_v47, 0.0  ;;  %v7933_v61 = vunpack.c.h.bf16 %v8149_v58  ;;  %v7932_v62 = vunpack.c.l.bf16 %v8149_v58 }
  0x15   :  { %309 = vadd.xlane.f32.xlu1 %v308_v24  ;;  %306 = vadd.xlane.f32.xlu0 %v305_v25  ;;  %v344_v54 = vsel %vm280_vm0, %v7925_v51, 0.0  ;;  %v341_v55 = vsel %vm280_vm0, %v7924_v52, 0.0  ;;  %v350_v59 = vsel %vm280_vm0, %v7929_v56, 0.0  ;;  %v347_v60 = vsel %vm280_vm0, %v7928_v57, 0.0  ;;  %v8155_v24 = vld [vmem:[%s11911_s0 + $0x90] sm:$0xff]  }
  0x16   :  { %v356_v0 = vsel %vm280_vm0, %v7933_v61, 0.0  ;;  %v353_v1 = vsel %vm280_vm0, %v7932_v62, 0.0  ;;  %v7937_v2 = vunpack.c.h.bf16 %v8150_v63  ;;  %v7936_v3 = vunpack.c.l.bf16 %v8150_v63 }
  0x17   :  { %v7941_v7 = vunpack.c.h.bf16 %v8151_v4  ;;  %v7940_v8 = vunpack.c.l.bf16 %v8151_v4  ;;  %v7945_v12 = vunpack.c.h.bf16 %v8152_v9  ;;  %v7944_v13 = vunpack.c.l.bf16 %v8152_v9 }
  0x18   :  { %v362_v5 = vsel %vm280_vm0, %v7937_v2, 0.0  ;;  %v359_v6 = vsel %vm280_vm0, %v7936_v3, 0.0  ;;  %v7949_v17 = vunpack.c.h.bf16 %v8153_v14  ;;  %v7948_v18 = vunpack.c.l.bf16 %v8153_v14 }
  0x19   :  { %315 = vadd.xlane.f32.xlu1 %v314_v29  ;;  %312 = vadd.xlane.f32.xlu0 %v311_v30  ;;  %v368_v10 = vsel %vm280_vm0, %v7941_v7, 0.0  ;;  %v365_v11 = vsel %vm280_vm0, %v7940_v8, 0.0  ;;  %v374_v15 = vsel %vm280_vm0, %v7945_v12, 0.0  ;;  %v371_v16 = vsel %vm280_vm0, %v7944_v13, 0.0  ;;  %v8156_v29 = vld [vmem:[%s11911_s0 + $0x98] sm:$0xff]  }
  0x1a   :  { %v380_v20 = vsel %vm280_vm0, %v7949_v17, 0.0  ;;  %v377_v21 = vsel %vm280_vm0, %v7948_v18, 0.0  ;;  %v7953_v22 = vunpack.c.h.bf16 %v8154_v19  ;;  %v7952_v23 = vunpack.c.l.bf16 %v8154_v19 }
  0x1b   :  { %v7957_v27 = vunpack.c.h.bf16 %v8155_v24  ;;  %v7956_v28 = vunpack.c.l.bf16 %v8155_v24  ;;  %v7961_v32 = vunpack.c.h.bf16 %v8156_v29  ;;  %v7960_v33 = vunpack.c.l.bf16 %v8156_v29 }
  0x1c   :  { %v386_v25 = vsel %vm280_vm0, %v7953_v22, 0.0  ;;  %v383_v26 = vsel %vm280_vm0, %v7952_v23, 0.0  ;;  %vm6948_vm1 = vcmask 130112   ;;  %vm6955_vm2 = vcmask 195712  }
  0x1d   :  { %321 = vadd.xlane.f32.xlu1 %v320_v34  ;;  %318 = vadd.xlane.f32.xlu0 %v317_v35  ;;  %v392_v30 = vsel %vm280_vm0, %v7957_v27, 0.0  ;;  %v389_v31 = vsel %vm280_vm0, %v7956_v28, 0.0  ;;  %v8157_v34 = vld [vmem:[%s11911_s0 + $0xa0] sm:$0xff]   ;;  %v398_v35 = vsel %vm280_vm0, %v7961_v32, 0.0  ;;  %v395_v36 = vsel %vm280_vm0, %v7960_v33, 0.0 }
  0x1e   :  { %v7965_v37 = vunpack.c.h.bf16 %v8157_v34  ;;  %v7964_v38 = vunpack.c.l.bf16 %v8157_v34  ;;  %vm6962_vm3 = vcmask 261312   ;;  %vm6969_vm4 = vcmask 326912  }
  0x1f   :  { %vm6976_vm5 = vcmask 392512   ;;  %vm6983_vm6 = vcmask 458112   ;;  %vm6990_vm7 = vcmask 523712   ;;  %vm6997_vm8 = vcmask 589312  }
  0x20   :  { %v401_v41 = vsel %vm280_vm0, %v7964_v38, 0.0  ;;  %vm7004_vm9 = vcmask 654912   ;;  %vm7011_vm10 = vcmask 720512   ;;  %vm7018_vm11 = vcmask 786112  }
  0x21   :  { %327 = vadd.xlane.f32.xlu1 %v326_v39  ;;  %324 = vadd.xlane.f32.xlu0 %v323_v40  ;;  %v8158_v39 = vld [vmem:[%s11911_s0 + $0xa8] sm:$0xff]   ;;  %v404_v40 = vsel %vm280_vm0, %v7965_v37, 0.0  ;;  %vm7025_vm12 = vcmask 851712   ;;  %vm7032_vm13 = vcmask 917312   ;;  %vm7039_vm14 = vcmask 982912  }
  0x22   :  { %v7969_v42 = vunpack.c.h.bf16 %v8158_v39  ;;  %v7968_v43 = vunpack.c.l.bf16 %v8158_v39  ;;  %vm7046_vm15 = vcmask 1048512  }
  0x24   :  { %v407_v46 = vsel %vm280_vm0, %v7968_v43, 0.0 }
  0x25   :  { %333 = vadd.xlane.f32.xlu1 %v332_v44  ;;  %330 = vadd.xlane.f32.xlu0 %v329_v45  ;;  %v8159_v44 = vld [vmem:[%s11911_s0 + $0xb0] sm:$0xff]   ;;  %v410_v45 = vsel %vm280_vm0, %v7969_v42, 0.0 }
  0x26   :  { %v7973_v47 = vunpack.c.h.bf16 %v8159_v44  ;;  %v7972_v48 = vunpack.c.l.bf16 %v8159_v44 }
  0x28   :  { %v413_v51 = vsel %vm280_vm0, %v7972_v48, 0.0 }
  0x29   :  { %339 = vadd.xlane.f32.xlu1 %v338_v49  ;;  %336 = vadd.xlane.f32.xlu0 %v335_v50  ;;  %v8160_v49 = vld [vmem:[%s11911_s0 + $0xb8] sm:$0xff]   ;;  %v416_v50 = vsel %vm280_vm0, %v7973_v47, 0.0 }
  0x2a   :  { %v7977_v52 = vunpack.c.h.bf16 %v8160_v49  ;;  %v7976_v53 = vunpack.c.l.bf16 %v8160_v49 }
  0x2c   :  { %v419_v56 = vsel %vm280_vm0, %v7976_v53, 0.0 }
  0x2d   :  { %345 = vadd.xlane.f32.xlu1 %v344_v54  ;;  %342 = vadd.xlane.f32.xlu0 %v341_v55  ;;  %v8161_v54 = vld [vmem:[%s11911_s0 + $0xc0] sm:$0xff]   ;;  %v422_v55 = vsel %vm280_vm0, %v7977_v52, 0.0 }
  0x2e   :  { %v7981_v57 = vunpack.c.h.bf16 %v8161_v54  ;;  %v7980_v58 = vunpack.c.l.bf16 %v8161_v54 }
  0x30   :  { %v425_v61 = vsel %vm280_vm0, %v7980_v58, 0.0 }
  0x31   :  { %351 = vadd.xlane.f32.xlu1 %v350_v59  ;;  %348 = vadd.xlane.f32.xlu0 %v347_v60  ;;  %v8162_v59 = vld [vmem:[%s11911_s0 + $0xc8] sm:$0xff]   ;;  %v428_v60 = vsel %vm280_vm0, %v7981_v57, 0.0 }
  0x32   :  { %v7985_v62 = vunpack.c.h.bf16 %v8162_v59  ;;  %v7984_v63 = vunpack.c.l.bf16 %v8162_v59 }
  0x34   :  { %v431_v2 = vsel %vm280_vm0, %v7984_v63, 0.0  ;;  %v8175_v63 = vld [vmem:[%s11911_s0 + $0x130] sm:$0xff]  }
  0x35   :  { %357 = vadd.xlane.f32.xlu1 %v356_v0  ;;  %354 = vadd.xlane.f32.xlu0 %v353_v1  ;;  %v8163_v0 = vld [vmem:[%s11911_s0 + $0xd0] sm:$0xff]   ;;  %v434_v1 = vsel %vm280_vm0, %v7985_v62, 0.0  ;;  %v8368_v62 = vmov 0  }
  0x36   :  { %v7989_v3 = vunpack.c.h.bf16 %v8163_v0  ;;  %v7988_v4 = vunpack.c.l.bf16 %v8163_v0  ;;  %8343 = vset.pattern.permute.xlu1 %v8368_v62  ;;  %8342 = vset.pattern.permute.xlu0 %v8368_v62 }
  0x38   :  { %v437_v7 = vsel %vm280_vm0, %v7988_v4, 0.0  ;;  %v8037_v4 = vunpack.c.h.bf16 %v8175_v63 }
  0x39   :  { %363 = vadd.xlane.f32.xlu1 %v362_v5  ;;  %360 = vadd.xlane.f32.xlu0 %v359_v6  ;;  %v8164_v5 = vld [vmem:[%s11911_s0 + $0xd8] sm:$0xff]   ;;  %v440_v6 = vsel %vm280_vm0, %v7989_v3, 0.0 }
  0x3a   :  { %v7993_v8 = vunpack.c.h.bf16 %v8164_v5  ;;  %v7992_v9 = vunpack.c.l.bf16 %v8164_v5  ;;  %v8036_v5 = vunpack.c.l.bf16 %v8175_v63 }
  0x3c   :  { %v443_v12 = vsel %vm280_vm0, %v7992_v9, 0.0  ;;  %v509_v9 = vsel %vm280_vm0, %v8036_v5, 0.0 }
  0x3d   :  { %369 = vadd.xlane.f32.xlu1 %v368_v10  ;;  %366 = vadd.xlane.f32.xlu0 %v365_v11  ;;  %v8165_v10 = vld [vmem:[%s11911_s0 + $0xe0] sm:$0xff]   ;;  %v446_v11 = vsel %vm280_vm0, %v7993_v8, 0.0  ;;  %v512_v8 = vsel %vm280_vm0, %v8037_v4, 0.0 }
  0x3e   :  { %v7997_v13 = vunpack.c.h.bf16 %v8165_v10  ;;  %v7996_v14 = vunpack.c.l.bf16 %v8165_v10 }
  0x40   :  { %v449_v17 = vsel %vm280_vm0, %v7996_v14, 0.0 }
  0x41   :  { %375 = vadd.xlane.f32.xlu1 %v374_v15  ;;  %372 = vadd.xlane.f32.xlu0 %v371_v16  ;;  %v8166_v15 = vld [vmem:[%s11911_s0 + $0xe8] sm:$0xff]   ;;  %v452_v16 = vsel %vm280_vm0, %v7997_v13, 0.0  ;;  %v8177_v13 = vld [vmem:[%s11911_s0 + $0x140] sm:$0xff]  }
  0x42   :  { %v8001_v18 = vunpack.c.h.bf16 %v8166_v15  ;;  %v8000_v19 = vunpack.c.l.bf16 %v8166_v15 }
  0x44   :  { %v455_v22 = vsel %vm280_vm0, %v8000_v19, 0.0  ;;  %v8044_v19 = vunpack.c.l.bf16 %v8177_v13 }
  0x45   :  { %381 = vadd.xlane.f32.xlu1 %v380_v20  ;;  %378 = vadd.xlane.f32.xlu0 %v377_v21  ;;  %v8167_v20 = vld [vmem:[%s11911_s0 + $0xf0] sm:$0xff]   ;;  %v458_v21 = vsel %vm280_vm0, %v8001_v18, 0.0  ;;  %v8045_v18 = vunpack.c.h.bf16 %v8177_v13 }
  0x46   :  { %v8005_v23 = vunpack.c.h.bf16 %v8167_v20  ;;  %v8004_v24 = vunpack.c.l.bf16 %v8167_v20  ;;  %v8178_v20 = vld [vmem:[%s11911_s0 + $0x148] sm:$0xff]  }
  0x48   :  { %v461_v27 = vsel %vm280_vm0, %v8004_v24, 0.0 }
  0x49   :  { %387 = vadd.xlane.f32.xlu1 %v386_v25  ;;  %384 = vadd.xlane.f32.xlu0 %v383_v26  ;;  %v8168_v25 = vld [vmem:[%s11911_s0 + $0xf8] sm:$0xff]   ;;  %v464_v26 = vsel %vm280_vm0, %v8005_v23, 0.0  ;;  %v521_v23 = vsel %vm280_vm0, %v8044_v19, 0.0 }
  0x4a   :  { %v8009_v28 = vunpack.c.h.bf16 %v8168_v25  ;;  %v8008_v29 = vunpack.c.l.bf16 %v8168_v25  ;;  %v8049_v25 = vunpack.c.h.bf16 %v8178_v20 }
  0x4c   :  { %v467_v32 = vsel %vm280_vm0, %v8008_v29, 0.0  ;;  %v530_v29 = vsel %vm280_vm0, %v8049_v25, 0.0 }
  0x4d   :  { %393 = vadd.xlane.f32.xlu1 %v392_v30  ;;  %390 = vadd.xlane.f32.xlu0 %v389_v31  ;;  %v8169_v30 = vld [vmem:[%s11911_s0 + $0x100] sm:$0xff]   ;;  %v470_v31 = vsel %vm280_vm0, %v8009_v28, 0.0 }
  0x4e   :  { %v8013_v33 = vunpack.c.h.bf16 %v8169_v30  ;;  %v8012_v34 = vunpack.c.l.bf16 %v8169_v30 }
  0x50   :  { %v473_v37 = vsel %vm280_vm0, %v8012_v34, 0.0  ;;  %v8180_v34 = vld [vmem:[%s11911_s0 + $0x158] sm:$0xff]  }
  0x51   :  { %399 = vadd.xlane.f32.xlu1 %v398_v35  ;;  %396 = vadd.xlane.f32.xlu0 %v395_v36  ;;  %v8170_v35 = vld [vmem:[%s11911_s0 + $0x108] sm:$0xff]   ;;  %v476_v36 = vsel %vm280_vm0, %v8013_v33, 0.0 }
  0x52   :  { %v8017_v38 = vunpack.c.h.bf16 %v8170_v35  ;;  %v8016_v39 = vunpack.c.l.bf16 %v8170_v35 }
  0x54   :  { %v479_v42 = vsel %vm280_vm0, %v8016_v39, 0.0  ;;  %v8057_v39 = vunpack.c.h.bf16 %v8180_v34 }
  0x55   :  { %405 = vadd.xlane.f32.xlu1 %v404_v40  ;;  %402 = vadd.xlane.f32.xlu0 %v401_v41  ;;  %v8171_v40 = vld [vmem:[%s11911_s0 + $0x110] sm:$0xff]   ;;  %v482_v41 = vsel %vm280_vm0, %v8017_v38, 0.0 }
  0x56   :  { %v8021_v43 = vunpack.c.h.bf16 %v8171_v40  ;;  %v8020_v44 = vunpack.c.l.bf16 %v8171_v40  ;;  %v8056_v40 = vunpack.c.l.bf16 %v8180_v34  ;;  %v8187_v34 = vld [vmem:[%s11911_s0 + $0x190] sm:$0xff]  }
  0x58   :  { %v485_v47 = vsel %vm280_vm0, %v8020_v44, 0.0  ;;  %v539_v44 = vsel %vm280_vm0, %v8056_v40, 0.0 }
  0x59   :  { %411 = vadd.xlane.f32.xlu1 %v410_v45  ;;  %408 = vadd.xlane.f32.xlu0 %v407_v46  ;;  %v8172_v45 = vld [vmem:[%s11911_s0 + $0x118] sm:$0xff]   ;;  %v488_v46 = vsel %vm280_vm0, %v8021_v43, 0.0  ;;  %v542_v43 = vsel %vm280_vm0, %v8057_v39, 0.0 }
  0x5a   :  { %v8025_v48 = vunpack.c.h.bf16 %v8172_v45  ;;  %v8024_v49 = vunpack.c.l.bf16 %v8172_v45 }
  0x5c   :  { %v491_v52 = vsel %vm280_vm0, %v8024_v49, 0.0  ;;  %v8182_v49 = vld [vmem:[%s11911_s0 + $0x168] sm:$0xff]  }
  0x5d   :  { %417 = vadd.xlane.f32.xlu1 %v416_v50  ;;  %414 = vadd.xlane.f32.xlu0 %v413_v51  ;;  %v8173_v50 = vld [vmem:[%s11911_s0 + $0x120] sm:$0xff]   ;;  %v494_v51 = vsel %vm280_vm0, %v8025_v48, 0.0  ;;  %v11916_v48 = vlaneseq  ;;  %v8065_v4 = vunpack.c.h.bf16 %v8182_v49  ;;  %v8064_v5 = vunpack.c.l.bf16 %v8182_v49  ;;  %v8190_v49 = vld [vmem:[%s11911_s0 + $0x1a8] sm:$0xff]  }
  0x5e   :  { %v8029_v53 = vunpack.c.h.bf16 %v8173_v50  ;;  %v8028_v54 = vunpack.c.l.bf16 %v8173_v50  ;;  %v8369_v50 = vmov 269488144  }
  0x5f   :  { %v554_v25 = vsel %vm280_vm0, %v8065_v4, 0.0 }
  0x60   :  { %v500_v57 = vsel %vm280_vm0, %v8029_v53, 0.0  ;;  %v497_v58 = vsel %vm280_vm0, %v8028_v54, 0.0  ;;  %v8371_v54 = vmov 1414812756  }
  0x61   :  { %423 = vadd.xlane.f32.xlu1 %v422_v55  ;;  %420 = vadd.xlane.f32.xlu0 %v419_v56  ;;  %v8174_v55 = vld [vmem:[%s11911_s0 + $0x128] sm:$0xff]  }
  0x65   :  { %429 = vadd.xlane.f32.xlu1 %v428_v60  ;;  %426 = vadd.xlane.f32.xlu0 %v425_v61  ;;  %v8033_v60 = vunpack.c.h.bf16 %v8174_v55  ;;  %v8032_v61 = vunpack.c.l.bf16 %v8174_v55  ;;  %v808_v55 = vunpack.c.l.s4 %v8371_v54 }
  0x67   :  { %v809_v13 = vunpack.c.0.s8 %v808_v55  ;;  %v8085_v55 = vunpack.c.h.bf16 %v8187_v34 }
  0x69   :  { %435 = vadd.xlane.f32.xlu1 %v434_v1  ;;  %432 = vadd.xlane.f32.xlu0 %v431_v2  ;;  %v506_v1 = vsel %vm280_vm0, %v8033_v60, 0.0  ;;  %v503_v2 = vsel %vm280_vm0, %v8032_v61, 0.0  ;;  %v8373_v60 = vmov 1983009808  }
  0x6a   :  { %v4380_v61 = vunpack.c.l.s4 %v8373_v60  ;;  %v8192_v60 = vld [vmem:[%s11911_s0 + $0x1b8] sm:$0xff]  }
  0x6d   :  { %441 = vadd.xlane.f32.xlu1 %v440_v6  ;;  %438 = vadd.xlane.f32.xlu0 %v437_v7  ;;  %v8176_v6 = vld [vmem:[%s11911_s0 + $0x138] sm:$0xff]  }
  0x71   :  { %447 = vadd.xlane.f32.xlu1 %v446_v11  ;;  %444 = vadd.xlane.f32.xlu0 %v443_v12  ;;  %v8041_v11 = vunpack.c.h.bf16 %v8176_v6  ;;  %v8040_v12 = vunpack.c.l.bf16 %v8176_v6  ;;  %v8183_v6 = vld [vmem:[%s11911_s0 + $0x170] sm:$0xff]  }
  0x72   :  { %v8068_v19 = vunpack.c.l.bf16 %v8183_v6 }
  0x73   :  { %v518_v15 = vsel %vm280_vm0, %v8041_v11, 0.0 }
  0x75   :  { %453 = vadd.xlane.f32.xlu1 %v452_v16  ;;  %450 = vadd.xlane.f32.xlu0 %v449_v17  ;;  %v515_v16 = vsel %vm280_vm0, %v8040_v12, 0.0 }
  0x79   :  { %459 = vadd.xlane.f32.xlu1 %v458_v21  ;;  %456 = vadd.xlane.f32.xlu0 %v455_v22  ;;  %v524_v22 = vsel %vm280_vm0, %v8045_v18, 0.0  ;;  %v8069_v18 = vunpack.c.h.bf16 %v8183_v6 }
  0x7d   :  { %465 = vadd.xlane.f32.xlu1 %v464_v26  ;;  %462 = vadd.xlane.f32.xlu0 %v461_v27  ;;  %v8048_v26 = vunpack.c.l.bf16 %v8178_v20  ;;  %v8179_v27 = vld [vmem:[%s11911_s0 + $0x150] sm:$0xff]  }
  0x7e   :  { %v8052_v33 = vunpack.c.l.bf16 %v8179_v27 }
  0x7f   :  { %v527_v30 = vsel %vm280_vm0, %v8048_v26, 0.0  ;;  %v551_v26 = vsel %vm280_vm0, %v8064_v5, 0.0 }
  0x81   :  { %471 = vadd.xlane.f32.xlu1 %v470_v31  ;;  %468 = vadd.xlane.f32.xlu0 %v467_v32  ;;  %v8053_v32 = vunpack.c.h.bf16 %v8179_v27 }
  0x85   :  { %477 = vadd.xlane.f32.xlu1 %v476_v36  ;;  %474 = vadd.xlane.f32.xlu0 %v473_v37  ;;  %v536_v36 = vsel %vm280_vm0, %v8053_v32, 0.0  ;;  %v533_v37 = vsel %vm280_vm0, %v8052_v33, 0.0  ;;  %v8186_v33 = vld [vmem:[%s11911_s0 + $0x188] sm:$0xff]  }
  0x86   :  { %v8080_v54 = vunpack.c.l.bf16 %v8186_v33 }
  0x89   :  { %483 = vadd.xlane.f32.xlu1 %v482_v41  ;;  %480 = vadd.xlane.f32.xlu0 %v479_v42  ;;  %v8181_v41 = vld [vmem:[%s11911_s0 + $0x160] sm:$0xff]  }
  0x8d   :  { %489 = vadd.xlane.f32.xlu1 %v488_v46  ;;  %486 = vadd.xlane.f32.xlu0 %v485_v47  ;;  %v8061_v46 = vunpack.c.h.bf16 %v8181_v41  ;;  %v8060_v47 = vunpack.c.l.bf16 %v8181_v41  ;;  %v8188_v41 = vld [vmem:[%s11911_s0 + $0x198] sm:$0xff]  }
  0x8e   :  { %v8089_v4 = vunpack.c.h.bf16 %v8188_v41  ;;  %v8088_v5 = vunpack.c.l.bf16 %v8188_v41 }
  0x8f   :  { %v548_v63 = vsel %vm280_vm0, %v8061_v46, 0.0 }
  0x90   :  { %v8747_v41 = vsel %vm280_vm0, %v8088_v5, 0.0 }
  0x91   :  { %495 = vadd.xlane.f32.xlu1 %v494_v51  ;;  %492 = vadd.xlane.f32.xlu0 %v491_v52  ;;  %v794_v51 = vunpack.c.l.s4 %v8369_v50  ;;  %v8370_v52 = vmov 842150450  }
  0x92   :  { %v8586_v56 = vpop.xlane.xlu1 %288  ;;  %v8590_v59 = vpop.xlane.xlu0 %282  ;;  %v801_v53 = vunpack.c.l.s4 %v8370_v52 }
  0x93   :  { %v795_v11 = vunpack.c.0.s8 %v794_v51 }
  0x94   :  { %v802_v12 = vunpack.c.0.s8 %v801_v53  ;;  %v8081_v53 = vunpack.c.h.bf16 %v8186_v33 }
  0x95   :  { %501 = vadd.xlane.f32.xlu1 %v500_v57  ;;  %498 = vadd.xlane.f32.xlu0 %v497_v58  ;;  %v8372_v57 = vmov 1987475062  }
  0x96   :  { %v8595_v0 = vpop.xlane.xlu1 %291  ;;  %v8599_v3 = vpop.xlane.xlu0 %285  ;;  %v815_v58 = vunpack.c.l.s4 %v8372_v57  ;;  %v8084_v57 = vunpack.c.l.bf16 %v8187_v34 }
  0x99   :  { %507 = vadd.xlane.f32.xlu1 %v506_v1  ;;  %504 = vadd.xlane.f32.xlu0 %v503_v2  ;;  %v545_v1 = vsel %vm280_vm0, %v8060_v47, 0.0  ;;  %v8189_v47 = vld [vmem:[%s11911_s0 + $0x1a0] sm:$0xff]  }
  0x9a   :  { %v8604_v7 = vpop.xlane.xlu1 %297  ;;  %v8608_v10 = vpop.xlane.xlu0 %294  ;;  %v8093_v6 = vunpack.c.h.bf16 %v8189_v47 }
  0x9d   :  { %513 = vadd.xlane.f32.xlu1 %v512_v8  ;;  %510 = vadd.xlane.f32.xlu0 %v509_v9  ;;  %v8184_v8 = vld [vmem:[%s11911_s0 + $0x178] sm:$0xff]   ;;  %v8671_v9 = vshrl.u32 %v11916_v48, 7 }
  0x9e   :  { %v8613_v14 = vpop.xlane.xlu1 %303  ;;  %v8617_v17 = vpop.xlane.xlu0 %300  ;;  %v8073_v20 = vunpack.c.h.bf16 %v8184_v8 }
  0x9f   :  { %11980 = vst [vmem:[#allocation6_spill] sm:$0xff] %v8671_v9  ;;  %v8695_v39 = vsub.s32 %v809_v13, %v8671_v9  ;;  %v8096_v13 = vunpack.c.l.bf16 %v8190_v49 }
  0xa0   :  { %v566_v46 = vsel %vm280_vm0, %v8073_v20, 0.0 }
  0xa1   :  { %519 = vadd.xlane.f32.xlu1 %v518_v15  ;;  %516 = vadd.xlane.f32.xlu0 %v515_v16  ;;  %v816_v15 = vunpack.c.0.s8 %v815_v58  ;;  %v8185_v16 = vld [vmem:[%s11911_s0 + $0x180] sm:$0xff]   ;;  %v8191_v58 = vld [vmem:[%s11911_s0 + $0x1b0] sm:$0xff]  }
  0xa2   :  { %v8622_v21 = vpop.xlane.xlu1 %309  ;;  %v8626_v24 = vpop.xlane.xlu0 %306  ;;  %v8076_v32 = vunpack.c.l.bf16 %v8185_v16 }
  0xa3   :  { %v8698_v40 = vsub.s32 %v816_v15, %v8671_v9  ;;  %v8101_v15 = vunpack.c.h.bf16 %v8191_v58 }
  0xa5   :  { %525 = vadd.xlane.f32.xlu1 %v524_v22  ;;  %522 = vadd.xlane.f32.xlu0 %v521_v23  ;;  %v4381_v22 = vunpack.c.0.s8 %v4380_v61  ;;  %v876_v5 = vrot.slane %v8586_v56, %v8698_v40 }
  0xa6   :  { %v8631_v28 = vpop.xlane.xlu1 %315  ;;  %v8635_v31 = vpop.xlane.xlu0 %312 }
  0xa7   :  { %v8713_v50 = vsub.s32 %v4381_v22, %v8671_v9  ;;  %v578_v22 = vsel %vm280_vm0, %v8081_v53, 0.0  ;;  %v8762_v53 = vsel %vm280_vm0, %v8096_v13, 0.0 }
  0xa9   :  { %531 = vadd.xlane.f32.xlu1 %v530_v29  ;;  %528 = vadd.xlane.f32.xlu0 %v527_v30  ;;  %v8072_v29 = vunpack.c.l.bf16 %v8184_v8  ;;  %v8077_v30 = vunpack.c.h.bf16 %v8185_v16  ;;  %v8092_v8 = vunpack.c.l.bf16 %v8189_v47  ;;  %v8100_v16 = vunpack.c.l.bf16 %v8191_v58  ;;  %v8195_v58 = vld [vmem:[%s11911_s0 + $0x1d0] sm:$0xff]  }
  0xaa   :  { %v8640_v35 = vpop.xlane.xlu1 %321  ;;  %v8644_v38 = vpop.xlane.xlu0 %318  ;;  %v8116_v48 = vunpack.c.l.bf16 %v8195_v58 }
  0xab   :  { %v563_v61 = vsel %vm280_vm0, %v8072_v29, 0.0  ;;  %v8741_v29 = vsel %vm280_vm0, %v8084_v57, 0.0 }
  0xad   :  { %537 = vadd.xlane.f32.xlu1 %v536_v36  ;;  %534 = vadd.xlane.f32.xlu0 %v533_v37  ;;  %v8689_v36 = vsub.s32 %v795_v11, %v8671_v9  ;;  %v8692_v37 = vsub.s32 %v802_v12, %v8671_v9  ;;  %v8097_v11 = vunpack.c.h.bf16 %v8190_v49  ;;  %v8193_v12 = vld [vmem:[%s11911_s0 + $0x1c0] sm:$0xff]   ;;  %v8194_v49 = vld [vmem:[%s11911_s0 + $0x1c8] sm:$0xff]  }
  0xae   :  { %v8649_v42 = vpop.xlane.xlu1 %327  ;;  %v8653_v45 = vpop.xlane.xlu0 %324  ;;  %v8109_v33 = vunpack.c.h.bf16 %v8193_v12  ;;  %v8108_v34 = vunpack.c.l.bf16 %v8193_v12 }
  0xaf   :  { %v8756_v47 = vsel %vm280_vm0, %v8097_v11, 0.0  ;;  %v8197_v11 = vld [vmem:[%s11911_s0 + $0x1e0] sm:$0xff]  }
  0xb0   :  { %v8798_v13 = vsel %vm280_vm0, %v8109_v33, 0.0 }
  0xb1   :  { %543 = vadd.xlane.f32.xlu1 %v542_v43  ;;  %540 = vadd.xlane.f32.xlu0 %v539_v44  ;;  %v560_v43 = vsel %vm280_vm0, %v8069_v18, 0.0  ;;  %v557_v44 = vsel %vm280_vm0, %v8068_v19, 0.0  ;;  %v8105_v18 = vunpack.c.h.bf16 %v8192_v60 }
  0xb2   :  { %v8658_v62 = vpop.xlane.xlu1 %333  ;;  %v8662_v2 = vpop.xlane.xlu0 %330 }
  0xb3   :  { %v8771_v57 = vsel %vm280_vm0, %v8105_v18, 0.0  ;;  %v8112_v18 = vunpack.c.l.bf16 %v8194_v49 }
  0xb5   :  { %549 = vadd.xlane.f32.xlu1 %v548_v63  ;;  %546 = vadd.xlane.f32.xlu0 %v545_v1  ;;  %v572_v63 = vsel %vm280_vm0, %v8077_v30, 0.0  ;;  %v569_v1 = vsel %vm280_vm0, %v8076_v32, 0.0  ;;  %v8744_v30 = vsel %vm280_vm0, %v8089_v4, 0.0  ;;  %v8104_v32 = vunpack.c.l.bf16 %v8192_v60 }
  0xb6   :  { %v8676_v23 = vpop.xlane.xlu1 %339  ;;  %v8680_v27 = vpop.xlane.xlu0 %336  ;;  %v855_v60 = vrot.slane %v8586_v56, %v8689_v36  ;;  %v869_v4 = vrot.slane %v8586_v56, %v8695_v39 }
  0xb7   :  { %11981 = vst [vmem:[#allocation7_spill] sm:$0xff] %v8676_v23  ;;  %11982 = vst [vmem:[#allocation8_spill] sm:$0xff] %v8680_v27  ;;  %v8795_v12 = vsel %vm280_vm0, %v8104_v32, 0.0 }
  0xb9   :  { %555 = vadd.xlane.f32.xlu1 %v554_v25  ;;  %552 = vadd.xlane.f32.xlu0 %v551_v26  ;;  %v575_v25 = vsel %vm280_vm0, %v8080_v54, 0.0  ;;  %v8738_v26 = vsel %vm280_vm0, %v8085_v55, 0.0  ;;  %v8765_v54 = vsel %vm280_vm0, %v8101_v15, 0.0  ;;  %v8768_v55 = vsel %vm280_vm0, %v8100_v16, 0.0 }
  0xba   :  { %v8715_v51 = vpop.xlane.xlu1 %345  ;;  %v8717_v52 = vpop.xlane.xlu0 %342  ;;  %v8801_v15 = vsel %vm280_vm0, %v8108_v34, 0.0  ;;  %v8113_v16 = vunpack.c.h.bf16 %v8194_v49  ;;  %v813_v34 = vrot.slane %v8590_v59, %v8695_v39  ;;  %v820_v49 = vrot.slane %v8590_v59, %v8698_v40 }
  0xbb   :  { %11983 = vst [vmem:[#allocation9_spill] sm:$0xff] %v8715_v51  ;;  %11984 = vst [vmem:[#allocation10_spill] sm:$0xff] %v8717_v52  ;;  %v8124_v51 = vunpack.c.l.bf16 %v8197_v11 }
  0xbc   :  { %11989 = vst [vmem:[#allocation15_spill] sm:$0xff] %v8801_v15  ;;  %v8849_v15 = vsel %vm280_vm0, %v8116_v48, 0.0 }
  0xbd   :  { %561 = vadd.xlane.f32.xlu1 %v560_v43  ;;  %558 = vadd.xlane.f32.xlu0 %v557_v44  ;;  %v8750_v43 = vsel %vm280_vm0, %v8093_v6, 0.0  ;;  %v8753_v44 = vsel %vm280_vm0, %v8092_v8, 0.0  ;;  %11996 = vst [vmem:[#allocation22_spill] sm:$0xff] %v8849_v15 }
  0xbe   :  { %v8731_v19 = vpop.xlane.xlu1 %351  ;;  %v8733_v20 = vpop.xlane.xlu0 %348 }
  0xbf   :  { %11985 = vst [vmem:[#allocation11_spill] sm:$0xff] %v8731_v19  ;;  %11986 = vst [vmem:[#allocation12_spill] sm:$0xff] %v8733_v20  ;;  %v8125_v20 = vunpack.c.h.bf16 %v8197_v11  ;;  %v8809_v19 = vcombine.low %v869_v4, %v876_v5  ;;  %v897_v4 = vrot.slane %v8595_v0, %v8695_v39  ;;  %v904_v5 = vrot.slane %v8595_v0, %v8698_v40 }
  0xc1   :  { %567 = vadd.xlane.f32.xlu1 %v566_v46  ;;  %564 = vadd.xlane.f32.xlu0 %v563_v61  ;;  %v8196_v46 = vld [vmem:[%s11911_s0 + $0x1d8] sm:$0xff]   ;;  %v862_v61 = vrot.slane %v8586_v56, %v8692_v37  ;;  %v8117_v56 = vunpack.c.h.bf16 %v8195_v58 }
  0xc2   :  { %v8787_v6 = vpop.xlane.xlu1 %357  ;;  %v8789_v8 = vpop.xlane.xlu0 %354  ;;  %v8121_v9 = vunpack.c.h.bf16 %v8196_v46  ;;  %v8120_v32 = vunpack.c.l.bf16 %v8196_v46  ;;  %v841_v46 = vrot.slane %v8599_v3, %v8695_v39 }
  0xc3   :  { %11987 = vst [vmem:[#allocation13_spill] sm:$0xff] %v8787_v6  ;;  %11988 = vst [vmem:[#allocation14_spill] sm:$0xff] %v8789_v8  ;;  %v799_v8 = vrot.slane %v8590_v59, %v8689_v36  ;;  %v806_v6 = vrot.slane %v8590_v59, %v8692_v37  ;;  %v8807_v33 = vcombine.low %v855_v60, %v862_v61 }
  0xc4   :  { %v848_v60 = vrot.slane %v8599_v3, %v8698_v40  ;;  %v883_v61 = vrot.slane %v8595_v0, %v8689_v36  ;;  %v890_v59 = vrot.slane %v8595_v0, %v8692_v37  ;;  %v8852_v0 = vsel %vm280_vm0, %v8121_v9, 0.0 }
  0xc5   :  { %573 = vadd.xlane.f32.xlu1 %v572_v63  ;;  %570 = vadd.xlane.f32.xlu0 %v569_v1  ;;  %v827_v63 = vrot.slane %v8599_v3, %v8689_v36  ;;  %v834_v1 = vrot.slane %v8599_v3, %v8692_v37  ;;  %v8842_v3 = vsel %vm280_vm0, %v8117_v56, 0.0  ;;  %11997 = vst [vmem:[#allocation23_spill] sm:$0xff] %v8852_v0 }
  0xc6   :  { %v8815_v58 = vpop.xlane.xlu1 %363  ;;  %v8817_v52 = vpop.xlane.xlu0 %360  ;;  %11993 = vst [vmem:[#allocation19_spill] sm:$0xff] %v8842_v3  ;;  %v4395_v56 = vcombine.low %v841_v46, %v848_v60  ;;  %v4419_v48 = vrot.slane %v8807_v33, %v8713_v50  ;;  %v4426_v9 = vrot.slane %v8809_v19, %v8713_v50  ;;  %v960_v33 = vrot.slane %v8604_v7, %v8698_v40 }
  0xc7   :  { %11990 = vst [vmem:[#allocation16_spill] sm:$0xff] %v8815_v58  ;;  %11991 = vst [vmem:[#allocation17_spill] sm:$0xff] %v8817_v52  ;;  %v8836_v52 = vsel %vm280_vm0, %v8113_v16, 0.0  ;;  %v8839_v58 = vsel %vm280_vm0, %v8112_v18, 0.0  ;;  %v8860_v16 = vcombine.low %v799_v8, %v806_v6  ;;  %v8862_v18 = vcombine.low %v813_v34, %v820_v49 }
  0xc8   :  { %11992 = vst [vmem:[#allocation18_spill] sm:$0xff] %v8839_v58  ;;  %v4394_v11 = vcombine.low %v827_v63, %v834_v1  ;;  %v946_v6 = vrot.slane %v8604_v7, %v8692_v37  ;;  %v953_v8 = vrot.slane %v8604_v7, %v8695_v39  ;;  %v911_v19 = vrot.slane %v8608_v10, %v8689_v36 }
  0xc9   :  { %579 = vadd.xlane.f32.xlu1 %v578_v22  ;;  %576 = vadd.xlane.f32.xlu0 %v575_v25  ;;  %v8855_v22 = vsel %vm280_vm0, %v8120_v32, 0.0  ;;  %v8858_v25 = vsel %vm280_vm0, %v8125_v20, 0.0  ;;  %v939_v20 = vrot.slane %v8604_v7, %v8689_v36  ;;  %v8881_v32 = vsel %vm280_vm0, %v8124_v51, 0.0  ;;  %v8898_v51 = vld [vmem:[%s11911_s0 + $0x1e8] sm:$0xff]  }
  0xca   :  { %v8844_v27 = vpop.xlane.xlu1 %369  ;;  %v8846_v23 = vpop.xlane.xlu0 %366  ;;  %11998 = vst [vmem:[#allocation24_spill] sm:$0xff] %v8855_v22  ;;  %11999 = vst [vmem:[#allocation25_spill] sm:$0xff] %v8858_v25  ;;  %v918_v34 = vrot.slane %v8608_v10, %v8692_v37  ;;  %v925_v49 = vrot.slane %v8608_v10, %v8695_v39  ;;  %v995_v7 = vrot.slane %v8613_v14, %v8689_v36 }
  0xcb   :  { %11994 = vst [vmem:[#allocation20_spill] sm:$0xff] %v8844_v27  ;;  %11995 = vst [vmem:[#allocation21_spill] sm:$0xff] %v8846_v23  ;;  %v8864_v27 = vcombine.low %v883_v61, %v890_v59  ;;  %v8866_v23 = vcombine.low %v897_v4, %v904_v5  ;;  %v4402_v1 = vrot.slane %v4394_v11, %v8713_v50 }
  0xcc   :  { %12000 = vst [vmem:[#allocation26_spill] sm:$0xff] %v8881_v32  ;;  %v4409_v46 = vrot.slane %v4395_v56, %v8713_v50  ;;  %v1002_v60 = vrot.slane %v8613_v14, %v8692_v37  ;;  %v1009_v61 = vrot.slane %v8613_v14, %v8695_v39  ;;  %v1016_v59 = vrot.slane %v8613_v14, %v8698_v40 }
  0xcd   :  { %585 = vadd.xlane.f32.xlu1 %v8738_v26  ;;  %582 = vadd.xlane.f32.xlu0 %v8741_v29  ;;  %v932_v29 = vrot.slane %v8608_v10, %v8698_v40  ;;  %v967_v4 = vrot.slane %v8617_v17, %v8689_v36  ;;  %v974_v5 = vrot.slane %v8617_v17, %v8692_v37  ;;  %v8129_v56 = vunpack.c.h.bf16 %v8898_v51 }
  0xce   :  { %v8891_v63 = vpop.xlane.xlu1 %375  ;;  %v8893_v26 = vpop.xlane.xlu0 %372  ;;  %v981_v10 = vrot.slane %v8617_v17, %v8695_v39  ;;  %v988_v11 = vrot.slane %v8617_v17, %v8698_v40  ;;  %v1051_v14 = vrot.slane %v8622_v21, %v8689_v36  ;;  %v1072_v32 = vrot.slane %v8622_v21, %v8698_v40 }
  0xcf   :  { %12001 = vst [vmem:[#allocation27_spill] sm:$0xff] %v8891_v63  ;;  %12002 = vst [vmem:[#allocation28_spill] sm:$0xff] %v8893_v26  ;;  %v1058_v26 = vrot.slane %v8622_v21, %v8692_v37  ;;  %v1065_v63 = vrot.slane %v8622_v21, %v8695_v39  ;;  %v8939_v22 = vcombine.low %v911_v19, %v918_v34 }
  0xd0   :  { %v4385_v0 = vrot.slane %v8860_v16, %v8713_v50  ;;  %v8943_v15 = vcombine.low %v995_v7, %v1002_v60  ;;  %v8945_v3 = vcombine.low %v1009_v61, %v1016_v59  ;;  %v8947_v58 = vcombine.low %v925_v49, %v932_v29 }
  0xd1   :  { %591 = vadd.xlane.f32.xlu1 %v8744_v30  ;;  %588 = vadd.xlane.f32.xlu0 %v8747_v41  ;;  %v8935_v30 = vcombine.low %v939_v20, %v946_v6  ;;  %v8937_v41 = vcombine.low %v953_v8, %v960_v33  ;;  %v8949_v21 = vcombine.low %v4419_v48, %v4426_v9  ;;  %v8128_v20 = vunpack.c.l.bf16 %v8898_v51 }
  0xd2   :  { %v8931_v25 = vpop.xlane.xlu1 %381  ;;  %v8933_v17 = vpop.xlane.xlu0 %378  ;;  %v8958_v6 = vcombine.low %v4402_v1, %v4409_v46  ;;  %v4530_v16 = vcombine.low %v1051_v14, %v1058_v26  ;;  %v4531_v8 = vcombine.low %v1065_v63, %v1072_v32  ;;  %v4392_v48 = vrot.slane %v8862_v18, %v8713_v50 }
  0xd3   :  { %12003 = vst [vmem:[#allocation29_spill] sm:$0xff] %v8931_v25  ;;  %12004 = vst [vmem:[#allocation30_spill] sm:$0xff] %v8933_v17  ;;  %v8951_v25 = vcombine.low %v967_v4, %v974_v5  ;;  %v8953_v17 = vcombine.low %v981_v10, %v988_v11  ;;  %v4436_v9 = vrot.slane %v8864_v27, %v8713_v50  ;;  %v8993_v7 = vsel %vm280_vm0, %v8129_v56, 0.0 }
  0xd4   :  { %12005 = vst [vmem:[#allocation31_spill] sm:$0xff] %v8949_v21  ;;  %12006 = vst [vmem:[#allocation32_spill] sm:$0xff] %v8958_v6  ;;  %v1037_v34 = vrot.slane %v8626_v24, %v8695_v39  ;;  %v1044_v32 = vrot.slane %v8626_v24, %v8698_v40  ;;  %v1107_v49 = vrot.slane %v8631_v28, %v8689_v36 }
  0xd5   :  { %597 = vadd.xlane.f32.xlu1 %v8750_v43  ;;  %594 = vadd.xlane.f32.xlu0 %v8753_v44  ;;  %v1023_v43 = vrot.slane %v8626_v24, %v8689_v36  ;;  %v1030_v44 = vrot.slane %v8626_v24, %v8692_v37  ;;  %v1114_v18 = vrot.slane %v8631_v28, %v8692_v37 }
  0xd6   :  { %v8960_v33 = vpop.xlane.xlu1 %387  ;;  %v8962_v19 = vpop.xlane.xlu0 %384  ;;  %v1121_v27 = vrot.slane %v8631_v28, %v8695_v39  ;;  %v4443_v63 = vrot.slane %v8866_v23, %v8713_v50  ;;  %v1128_v26 = vrot.slane %v8631_v28, %v8698_v40  ;;  %v1079_v51 = vrot.slane %v8635_v31, %v8689_v36 }
  0xd7   :  { %v1086_v24 = vrot.slane %v8635_v31, %v8692_v37  ;;  %v1093_v29 = vrot.slane %v8635_v31, %v8695_v39  ;;  %v1100_v23 = vrot.slane %v8635_v31, %v8698_v40  ;;  %v4538_v46 = vrot.slane %v4530_v16, %v8713_v50 }
  0xd8   :  { %v4545_v60 = vrot.slane %v4531_v8, %v8713_v50  ;;  %v1177_v61 = vrot.slane %v8640_v35, %v8695_v39  ;;  %v1184_v31 = vrot.slane %v8640_v35, %v8698_v40  ;;  %v1135_v59 = vrot.slane %v8644_v38, %v8689_v36 }
  0xd9   :  { %603 = vadd.xlane.f32.xlu1 %v8756_v47  ;;  %600 = vadd.xlane.f32.xlu0 %v8762_v53  ;;  %v1163_v47 = vrot.slane %v8640_v35, %v8689_v36  ;;  %v1170_v53 = vrot.slane %v8640_v35, %v8692_v37  ;;  %v1142_v4 = vrot.slane %v8644_v38, %v8692_v37  ;;  %v9028_v35 = vsel %vm280_vm0, %v8128_v20, 0.0 }
  0xda   :  { %v8999_v28 = vpop.xlane.xlu1 %393  ;;  %v9001_v1 = vpop.xlane.xlu0 %390  ;;  %v1149_v5 = vrot.slane %v8644_v38, %v8695_v39  ;;  %v1156_v10 = vrot.slane %v8644_v38, %v8698_v40  ;;  %v9021_v11 = vcombine.low %v1107_v49, %v1114_v18  ;;  %v9023_v56 = vcombine.low %v1023_v43, %v1030_v44  ;;  %v9041_v38 = vld [vmem:[%s11911_s0 + $0x1f0] sm:$0xff]  }
  0xdb   :  { %v9030_v14 = vcombine.low %v4385_v0, %v4392_v48  ;;  %v4565_v16 = vcombine.low %v1121_v27, %v1128_v26  ;;  %v9032_v8 = vcombine.low %v1037_v34, %v1044_v32  ;;  %v9047_v20 = vcombine.low %v1163_v47, %v1170_v53 }
  0xdc   :  { %v9049_v0 = vcombine.low %v1177_v61, %v1184_v31  ;;  %v9051_v48 = vcombine.low %v1079_v51, %v1086_v24  ;;  %v9053_v43 = vcombine.low %v1093_v29, %v1100_v23  ;;  %v9055_v44 = vcombine.low %v1135_v59, %v1142_v4  ;;  %v12015_v59 = vld [vmem:[#allocation15_spill] sm:$0xff] }
  0xdd   :  { %609 = vadd.xlane.f32.xlu1 %v8765_v54  ;;  %606 = vadd.xlane.f32.xlu0 %v8768_v55  ;;  %12007 = vst [vmem:[#allocation33_spill] sm:$0xff] %v9030_v14  ;;  %v9043_v54 = vcombine.low %v4436_v9, %v4443_v63  ;;  %v4453_v55 = vrot.slane %v8939_v22, %v8713_v50  ;;  %v8133_v18 = vunpack.c.h.bf16 %v9041_v38  ;;  %v8132_v4 = vunpack.c.l.bf16 %v9041_v38 }
  0xde   :  { %v9034_v21 = vpop.xlane.xlu1 %399  ;;  %v9036_v6 = vpop.xlane.xlu0 %396  ;;  %v9057_v34 = vcombine.low %v1149_v5, %v1156_v10  ;;  %v9059_v32 = vcombine.low %v4538_v46, %v4545_v60  ;;  %v4460_v9 = vrot.slane %v8947_v58, %v8713_v50  ;;  %v1219_v22 = vrot.slane %v8649_v42, %v8689_v36 }
  0xdf   :  { %12008 = vst [vmem:[#allocation34_spill] sm:$0xff] %v9034_v21  ;;  %12009 = vst [vmem:[#allocation35_spill] sm:$0xff] %v9036_v6  ;;  %v1226_v49 = vrot.slane %v8649_v42, %v8692_v37  ;;  %v4572_v27 = vrot.slane %v9021_v11, %v8713_v50  ;;  %v1233_v63 = vrot.slane %v8649_v42, %v8695_v39 }
  0xe0   :  { %12010 = vst [vmem:[#allocation36_spill] sm:$0xff] %v9043_v54  ;;  %12011 = vst [vmem:[#allocation37_spill] sm:$0xff] %v9057_v34  ;;  %v1240_v58 = vrot.slane %v8649_v42, %v8698_v40  ;;  %v1191_v26 = vrot.slane %v8653_v45, %v8689_v36  ;;  %v1198_v51 = vrot.slane %v8653_v45, %v8692_v37 }
  0xe1   :  { %12012 = vst [vmem:[#allocation38_spill] sm:$0xff] %v9059_v32  ;;  %615 = vadd.xlane.f32.xlu1 %v8771_v57  ;;  %612 = vadd.xlane.f32.xlu0 %v8795_v12  ;;  %v1275_v24 = vrot.slane %v8658_v62, %v8689_v36  ;;  %v1205_v29 = vrot.slane %v8653_v45, %v8695_v39 }
  0xe2   :  { %v9080_v57 = vpop.xlane.xlu1 %405  ;;  %v9082_v12 = vpop.xlane.xlu0 %402  ;;  %v1212_v23 = vrot.slane %v8653_v45, %v8698_v40  ;;  %v4579_v42 = vrot.slane %v4565_v16, %v8713_v50  ;;  %v1282_v46 = vrot.slane %v8658_v62, %v8692_v37  ;;  %v1289_v60 = vrot.slane %v8658_v62, %v8695_v39 }
  0xe3   :  { %12013 = vst [vmem:[#allocation39_spill] sm:$0xff] %v9080_v57  ;;  %12014 = vst [vmem:[#allocation40_spill] sm:$0xff] %v9082_v12  ;;  %v1296_v47 = vrot.slane %v8658_v62, %v8698_v40  ;;  %v1247_v53 = vrot.slane %v8662_v2, %v8689_v36  ;;  %v1254_v61 = vrot.slane %v8662_v2, %v8692_v37 }
  0xe4   :  { %v1261_v45 = vrot.slane %v8662_v2, %v8695_v39  ;;  %v1268_v31 = vrot.slane %v8662_v2, %v8698_v40  ;;  %v9108_v5 = vcombine.low %v1219_v22, %v1226_v49  ;;  %v9110_v62 = vcombine.low %v1233_v63, %v1240_v58  ;;  %v12020_v2 = vld [vmem:[#allocation7_spill] sm:$0xff] }
  0xe5   :  { %621 = vadd.xlane.f32.xlu1 %v8798_v13  ;;  %618 = vadd.xlane.f32.xlu0 %v12015_v59  ;;  %v9112_v10 = vcombine.low %v1191_v26, %v1198_v51  ;;  %v9118_v32 = vcombine.low %v4453_v55, %v4460_v9  ;;  %v1331_v54 = vrot.slane %v12020_v2, %v8689_v36  ;;  %v12024_v51 = vld [vmem:[#allocation18_spill] sm:$0xff]  ;;  %v9143_v59 = vsel %vm280_vm0, %v8133_v18, 0.0 }
  0xe6   :  { %v9114_v11 = vpop.xlane.xlu1 %411  ;;  %v9116_v16 = vpop.xlane.xlu0 %408  ;;  %v1338_v13 = vrot.slane %v12020_v2, %v8692_v37  ;;  %v1345_v38 = vrot.slane %v12020_v2, %v8695_v39  ;;  %v1352_v22 = vrot.slane %v12020_v2, %v8698_v40  ;;  %v9128_v49 = vcombine.low %v1275_v24, %v1282_v46  ;;  %v12026_v46 = vld [vmem:[#allocation8_spill] sm:$0xff] }
  0xe7   :  { %12016 = vst [vmem:[#allocation15_spill] sm:$0xff] %v9112_v10  ;;  %12017 = vst [vmem:[#allocation41_spill] sm:$0xff] %v9114_v11  ;;  %v9130_v63 = vcombine.low %v1289_v60, %v1296_v47  ;;  %v9132_v58 = vcombine.low %v1205_v29, %v1212_v23  ;;  %v4470_v55 = vrot.slane %v8935_v30, %v8713_v50  ;;  %v12038_v11 = vld [vmem:[#allocation23_spill] sm:$0xff]  ;;  %v12039_v10 = vld [vmem:[#allocation24_spill] sm:$0xff] }
  0xe8   :  { %12018 = vst [vmem:[#allocation42_spill] sm:$0xff] %v9116_v16  ;;  %12019 = vst [vmem:[#allocation43_spill] sm:$0xff] %v9118_v32  ;;  %v9136_v9 = vcombine.low %v1247_v53, %v1254_v61  ;;  %v9138_v26 = vcombine.low %v1261_v45, %v1268_v31  ;;  %v9145_v24 = vcombine.low %v4572_v27, %v4579_v42  ;;  %v12029_v61 = vld [vmem:[#allocation9_spill] sm:$0xff] }
  0xe9   :  { %12021 = vst [vmem:[#allocation7_spill] sm:$0xff] %v9132_v58  ;;  %627 = vadd.xlane.f32.xlu1 %v8836_v52  ;;  %624 = vadd.xlane.f32.xlu0 %v12024_v51  ;;  %v1303_v29 = vrot.slane %v12026_v46, %v8689_v36  ;;  %v1310_v23 = vrot.slane %v12026_v46, %v8692_v37  ;;  %v12032_v51 = vld [vmem:[#allocation22_spill] sm:$0xff] }
  0xea   :  { %12022 = vst [vmem:[#allocation44_spill] sm:$0xff] %v9136_v9  ;;  %12023 = vst [vmem:[#allocation45_spill] sm:$0xff] %v9138_v26  ;;  %v9151_v30 = vpop.xlane.xlu1 %417  ;;  %v9153_v60 = vpop.xlane.xlu0 %414  ;;  %v4477_v52 = vrot.slane %v8937_v41, %v8713_v50  ;;  %v4606_v47 = vrot.slane %v9047_v20, %v8713_v50  ;;  %v9159_v18 = vcombine.low %v1331_v54, %v1338_v13  ;;  %v12030_v13 = vld [vmem:[#allocation10_spill] sm:$0xff] }
  0xeb   :  { %12025 = vst [vmem:[#allocation18_spill] sm:$0xff] %v9145_v24  ;;  %12027 = vst [vmem:[#allocation8_spill] sm:$0xff] %v9151_v30  ;;  %v9161_v27 = vcombine.low %v1345_v38, %v1352_v22  ;;  %v1317_v42 = vrot.slane %v12026_v46, %v8695_v39  ;;  %v1324_v53 = vrot.slane %v12026_v46, %v8698_v40  ;;  %v12031_v22 = vld [vmem:[#allocation19_spill] sm:$0xff]  ;;  %v9184_v46 = vsel %vm280_vm0, %v8132_v4, 0.0 }
  0xec   :  { %12028 = vst [vmem:[#allocation46_spill] sm:$0xff] %v9153_v60  ;;  %v1387_v45 = vrot.slane %v12029_v61, %v8689_v36  ;;  %v1394_v31 = vrot.slane %v12029_v61, %v8692_v37  ;;  %v4613_v41 = vrot.slane %v9049_v0, %v8713_v50  ;;  %v4487_v54 = vrot.slane %v8951_v25, %v8713_v50 }
  0xed   :  { %v1401_v20 = vrot.slane %v12029_v61, %v8695_v39  ;;  %v1408_v2 = vrot.slane %v12029_v61, %v8698_v40  ;;  %v1359_v38 = vrot.slane %v12030_v13, %v8689_v36  ;;  %633 = vadd.xlane.f32.xlu1 %v12031_v22  ;;  %630 = vadd.xlane.f32.xlu0 %v12032_v51  ;;  %v9199_v22 = vld [vmem:[%s11911_s0 + $0x1f8] sm:$0xff]   ;;  %v12035_v51 = vld [vmem:[#allocation11_spill] sm:$0xff] }
  0xee   :  { %v1366_v0 = vrot.slane %v12030_v13, %v8692_v37  ;;  %v1373_v25 = vrot.slane %v12030_v13, %v8695_v39  ;;  %v1380_v24 = vrot.slane %v12030_v13, %v8698_v40  ;;  %v9192_v61 = vpop.xlane.xlu1 %423  ;;  %v9194_v26 = vpop.xlane.xlu0 %420  ;;  %v4494_v4 = vrot.slane %v8953_v17, %v8713_v50 }
  0xef   :  { %12033 = vst [vmem:[#allocation9_spill] sm:$0xff] %v9192_v61  ;;  %12034 = vst [vmem:[#allocation10_spill] sm:$0xff] %v9194_v26  ;;  %v1443_v32 = vrot.slane %v12035_v51, %v8689_v36  ;;  %v1450_v9 = vrot.slane %v12035_v51, %v8692_v37  ;;  %v1457_v13 = vrot.slane %v12035_v51, %v8695_v39  ;;  %v12036_v61 = vld [vmem:[#allocation12_spill] sm:$0xff] }
  0xf0   :  { %v1464_v26 = vrot.slane %v12035_v51, %v8698_v40  ;;  %v1415_v60 = vrot.slane %v12036_v61, %v8689_v36  ;;  %v1422_v30 = vrot.slane %v12036_v61, %v8692_v37  ;;  %v1429_v17 = vrot.slane %v12036_v61, %v8695_v39 }
  0xf1   :  { %v1436_v14 = vrot.slane %v12036_v61, %v8698_v40  ;;  %v9219_v16 = vcombine.low %v1303_v29, %v1310_v23  ;;  %v9221_v58 = vcombine.low %v1317_v42, %v1324_v53  ;;  %639 = vadd.xlane.f32.xlu1 %v12038_v11  ;;  %636 = vadd.xlane.f32.xlu0 %v12039_v10  ;;  %v8137_v51 = vunpack.c.h.bf16 %v9199_v22 }
  0xf2   :  { %v9226_v12 = vcombine.low %v4470_v55, %v4477_v52  ;;  %v9228_v57 = vcombine.low %v1387_v45, %v1394_v31  ;;  %v9230_v6 = vcombine.low %v1401_v20, %v1408_v2  ;;  %v9232_v21 = vcombine.low %v1359_v38, %v1366_v0  ;;  %v9234_v34 = vpop.xlane.xlu1 %429  ;;  %v9236_v29 = vpop.xlane.xlu0 %426  ;;  %v12049_v38 = vld [vmem:[#allocation16_spill] sm:$0xff] }
  0xf3   :  { %12037 = vst [vmem:[#allocation19_spill] sm:$0xff] %v9221_v58  ;;  %v9238_v23 = vcombine.low %v4606_v47, %v4613_v41  ;;  %v9240_v42 = vcombine.low %v1443_v32, %v1450_v9  ;;  %v9242_v11 = vcombine.low %v1457_v13, %v1464_v26  ;;  %v9244_v10 = vcombine.low %v1373_v25, %v1380_v24  ;;  %v12044_v47 = vld [vmem:[#allocation13_spill] sm:$0xff]  ;;  %v12046_v24 = vld [vmem:[#allocation26_spill] sm:$0xff] }
  0xf4   :  { %12040 = vst [vmem:[#allocation22_spill] sm:$0xff] %v9232_v21  ;;  %v4640_v55 = vrot.slane %v9108_v5, %v8713_v50  ;;  %v9248_v52 = vcombine.low %v1415_v60, %v1422_v30  ;;  %v9250_v53 = vcombine.low %v1429_v17, %v1436_v14  ;;  %v9252_v45 = vcombine.low %v4487_v54, %v4494_v4  ;;  %v12045_v26 = vld [vmem:[#allocation25_spill] sm:$0xff]  ;;  %v12047_v60 = vld [vmem:[#allocation14_spill] sm:$0xff] }
  0xf5   :  { %12041 = vst [vmem:[#allocation11_spill] sm:$0xff] %v9244_v10  ;;  %v4647_v31 = vrot.slane %v9110_v62, %v8713_v50  ;;  %v1499_v32 = vrot.slane %v12044_v47, %v8689_v36  ;;  %v1506_v9 = vrot.slane %v12044_v47, %v8692_v37  ;;  %645 = vadd.xlane.f32.xlu1 %v12045_v26  ;;  %v8136_v5 = vunpack.c.l.bf16 %v9199_v22  ;;  %v12050_v17 = vld [vmem:[#allocation17_spill] sm:$0xff] }
  0xf6   :  { %12042 = vst [vmem:[#allocation12_spill] sm:$0xff] %v9248_v52  ;;  %12043 = vst [vmem:[#allocation23_spill] sm:$0xff] %v9250_v53  ;;  %642 = vadd.xlane.f32.xlu0 %v12046_v24  ;;  %v4504_v14 = vrot.slane %v8943_v15, %v8713_v50  ;;  %v1513_v30 = vrot.slane %v12044_v47, %v8695_v39  ;;  %v1520_v62 = vrot.slane %v12044_v47, %v8698_v40  ;;  %v9273_v20 = vpop.xlane.xlu1 %435  ;;  %v9275_v2 = vpop.xlane.xlu0 %432 }
  0xf7   :  { %v1471_v41 = vrot.slane %v12047_v60, %v8689_v36  ;;  %v1478_v54 = vrot.slane %v12047_v60, %v8692_v37  ;;  %12048 = vst [vmem:[#allocation24_spill] sm:$0xff] %v9275_v2  ;;  %v1555_v0 = vrot.slane %v12049_v38, %v8689_v36  ;;  %v1485_v15 = vrot.slane %v12047_v60, %v8695_v39 }
  0xf8   :  { %v1492_v25 = vrot.slane %v12047_v60, %v8698_v40  ;;  %v4511_v61 = vrot.slane %v8945_v3, %v8713_v50  ;;  %v1562_v22 = vrot.slane %v12049_v38, %v8692_v37  ;;  %v1569_v4 = vrot.slane %v12049_v38, %v8695_v39 }
  0xf9   :  { %v1576_v13 = vrot.slane %v12049_v38, %v8698_v40  ;;  %v1527_v47 = vrot.slane %v12050_v17, %v8689_v36  ;;  %v1534_v26 = vrot.slane %v12050_v17, %v8692_v37  ;;  %v1541_v24 = vrot.slane %v12050_v17, %v8695_v39  ;;  %651 = vadd.xlane.f32.xlu1 %v8993_v7 }
  0xfa   :  { %v1548_v3 = vrot.slane %v12050_v17, %v8698_v40  ;;  %648 = vadd.xlane.f32.xlu0 %v9028_v35  ;;  %v662_v60 = vsel %vm280_vm0, %v8137_v51, 0.0  ;;  %v9302_v53 = vcombine.low %v1499_v32, %v1506_v9  ;;  %v9304_v38 = vcombine.low %v1513_v30, %v1520_v62  ;;  %v9308_v10 = vpop.xlane.xlu1 %441  ;;  %v9310_v21 = vpop.xlane.xlu0 %438  ;;  %v12055_v17 = vld [vmem:[#allocation20_spill] sm:$0xff] }
  0xfb   :  { %v9306_v52 = vcombine.low %v1471_v41, %v1478_v54  ;;  %12052 = vst [vmem:[#allocation25_spill] sm:$0xff] %v9308_v10  ;;  %12053 = vst [vmem:[#allocation26_spill] sm:$0xff] %v9310_v21  ;;  %v9312_v2 = vcombine.low %v4640_v55, %v4647_v31  ;;  %v1611_v58 = vrot.slane %v12055_v17, %v8689_v36  ;;  %v659_v41 = vsel %vm280_vm0, %v8136_v5, 0.0 }
  0xfc   :  { %v1618_v7 = vrot.slane %v12055_v17, %v8692_v37  ;;  %v1625_v35 = vrot.slane %v12055_v17, %v8695_v39  ;;  %v1632_v51 = vrot.slane %v12055_v17, %v8698_v40  ;;  %v9322_v32 = vcombine.low %v1555_v0, %v1562_v22  ;;  %v12060_v0 = vld [vmem:[#allocation21_spill] sm:$0xff] }
  0xfd   :  { %12051 = vst [vmem:[#allocation13_spill] sm:$0xff] %v9306_v52  ;;  %12054 = vst [vmem:[#allocation14_spill] sm:$0xff] %v9312_v2  ;;  %v9324_v9 = vcombine.low %v1569_v4, %v1576_v13  ;;  %v9326_v30 = vcombine.low %v1485_v15, %v1492_v25  ;;  %v4674_v55 = vrot.slane %v9128_v49, %v8713_v50  ;;  %657 = vadd.xlane.f32.xlu1 %v9143_v59  ;;  %v12065_v13 = vld [vmem:[#allocation27_spill] sm:$0xff]  ;;  %vm7601_vm0 = vcmask 1041409  }
  0xfe   :  { %v9330_v31 = vcombine.low %v1527_v47, %v1534_v26  ;;  %v9332_v62 = vcombine.low %v1541_v24, %v1548_v3  ;;  %654 = vadd.xlane.f32.xlu0 %v9184_v46  ;;  %v9337_v54 = vcombine.low %v4504_v14, %v4511_v61  ;;  %v1583_v22 = vrot.slane %v12060_v0, %v8689_v36  ;;  %v9343_v25 = vpop.xlane.xlu1 %447  ;;  %v9345_v49 = vpop.xlane.xlu0 %444  ;;  %v12066_v3 = vld [vmem:[#allocation28_spill] sm:$0xff] }
  0xff   :  { %12056 = vst [vmem:[#allocation16_spill] sm:$0xff] %v9326_v30  ;;  %v1590_v15 = vrot.slane %v12060_v0, %v8692_v37  ;;  %12061 = vst [vmem:[#allocation21_spill] sm:$0xff] %v9343_v25  ;;  %v4681_v4 = vrot.slane %v9130_v63, %v8713_v50  ;;  %v4521_v59 = vrot.slane %v9023_v56, %v8713_v50 }
 0x100   :  { %12057 = vst [vmem:[#allocation17_spill] sm:$0xff] %v9330_v31  ;;  %12058 = vst [vmem:[#allocation20_spill] sm:$0xff] %v9332_v62  ;;  %v9351_v46 = vcombine.low %v1611_v58, %v1618_v7  ;;  %v9353_v5 = vcombine.low %v1625_v35, %v1632_v51  ;;  %v1597_v14 = vrot.slane %v12060_v0, %v8695_v39 }
 0x101   :  { %12059 = vst [vmem:[#allocation47_spill] sm:$0xff] %v9337_v54  ;;  %12062 = vst [vmem:[#allocation48_spill] sm:$0xff] %v9345_v49  ;;  %v1604_v61 = vrot.slane %v12060_v0, %v8698_v40  ;;  %v1667_v47 = vrot.slane %v12065_v13, %v8689_v36  ;;  %v1674_v26 = vrot.slane %v12065_v13, %v8692_v37  ;;  %663 = vadd.xlane.f32.xlu1 %v662_v60 }
 0x102   :  { %12063 = vst [vmem:[#allocation49_spill] sm:$0xff] %v9351_v46  ;;  %12064 = vst [vmem:[#allocation50_spill] sm:$0xff] %v9353_v5  ;;  %v4528_v63 = vrot.slane %v9032_v8, %v8713_v50  ;;  %v4708_v56 = vrot.slane %v9159_v18, %v8713_v50  ;;  %v1681_v58 = vrot.slane %v12065_v13, %v8695_v39  ;;  %660 = vadd.xlane.f32.xlu0 %v659_v41  ;;  %v9379_v35 = vpop.xlane.xlu1 %453  ;;  %v9381_v51 = vpop.xlane.xlu0 %450 }
 0x103   :  { %v1688_v24 = vrot.slane %v12065_v13, %v8698_v40  ;;  %v1639_v17 = vrot.slane %v12066_v3, %v8689_v36  ;;  %v1646_v7 = vrot.slane %v12066_v3, %v8692_v37  ;;  %v1653_v8 = vrot.slane %v12066_v3, %v8695_v39  ;;  %12067 = vst [vmem:[#allocation27_spill] sm:$0xff] %v9379_v35  ;;  %v12069_v13 = vld [vmem:[#allocation29_spill] sm:$0xff] }
 0x104   :  { %v1660_v18 = vrot.slane %v12066_v3, %v8698_v40  ;;  %12068 = vst [vmem:[#allocation28_spill] sm:$0xff] %v9381_v51  ;;  %v4715_v0 = vrot.slane %v9161_v27, %v8713_v50  ;;  %v1723_v60 = vrot.slane %v12069_v13, %v8689_v36  ;;  %v1730_v41 = vrot.slane %v12069_v13, %v8692_v37  ;;  %v12070_v3 = vld [vmem:[#allocation30_spill] sm:$0xff] }
 0x105   :  { %v1737_v62 = vrot.slane %v12069_v13, %v8695_v39  ;;  %v1744_v31 = vrot.slane %v12069_v13, %v8698_v40  ;;  %v1695_v30 = vrot.slane %v12070_v3, %v8689_v36  ;;  %v1702_v52 = vrot.slane %v12070_v3, %v8692_v37 }
 0x106   :  { %v1709_v27 = vrot.slane %v12070_v3, %v8695_v39  ;;  %v1716_v51 = vrot.slane %v12070_v3, %v8698_v40  ;;  %v9401_v35 = vcombine.low %v1667_v47, %v1674_v26  ;;  %v9403_v49 = vcombine.low %v1583_v22, %v1590_v15  ;;  %v9415_v10 = vpop.xlane.xlu1 %459  ;;  %v9417_v46 = vpop.xlane.xlu0 %456 }
 0x107   :  { %v9405_v25 = vcombine.low %v1597_v14, %v1604_v61  ;;  %v9407_v54 = vcombine.low %v4674_v55, %v4681_v4  ;;  %v9409_v13 = vcombine.low %v1681_v58, %v1688_v24  ;;  %v9411_v21 = vcombine.low %v1639_v17, %v1646_v7 }
 0x108   :  { %12071 = vst [vmem:[#allocation29_spill] sm:$0xff] %v9403_v49  ;;  %v9413_v5 = vcombine.low %v1653_v8, %v1660_v18  ;;  %v9419_v2 = vcombine.low %v4521_v59, %v4528_v63  ;;  %v9421_v47 = vcombine.low %v1723_v60, %v1730_v41  ;;  %v1779_v22 = vrot.slane %v8960_v33, %v8689_v36  ;;  %v12083_v41 = vld [vmem:[#allocation34_spill] sm:$0xff] }
 0x109   :  { %12072 = vst [vmem:[#allocation30_spill] sm:$0xff] %v9405_v25  ;;  %12073 = vst [vmem:[#allocation51_spill] sm:$0xff] %v9411_v21  ;;  %v1786_v55 = vrot.slane %v8960_v33, %v8692_v37  ;;  %v4555_v15 = vrot.slane %v9051_v48, %v8713_v50  ;;  %v9429_v4 = vcombine.low %v1737_v62, %v1744_v31 }
 0x10a   :  { %12074 = vst [vmem:[#allocation52_spill] sm:$0xff] %v9413_v5  ;;  %12075 = vst [vmem:[#allocation53_spill] sm:$0xff] %v9421_v47  ;;  %v9431_v14 = vcombine.low %v1695_v30, %v1702_v52  ;;  %v9433_v61 = vcombine.low %v1709_v27, %v1716_v51  ;;  %v9435_v26 = vcombine.low %v4708_v56, %v4715_v0  ;;  %v9453_v56 = vpop.xlane.xlu1 %465  ;;  %v12082_v0 = vld [vmem:[#allocation37_spill] sm:$0xff] }
 0x10b   :  { %12076 = vst [vmem:[#allocation54_spill] sm:$0xff] %v9429_v4  ;;  %v1793_v59 = vrot.slane %v8960_v33, %v8695_v39  ;;  %v1800_v63 = vrot.slane %v8960_v33, %v8698_v40  ;;  %v4562_v58 = vrot.slane %v9053_v43, %v8713_v50  ;;  %v4742_v48 = vrot.slane %v9228_v57, %v8713_v50  ;;  %v9455_v33 = vpop.xlane.xlu0 %462 }
 0x10c   :  { %12077 = vst [vmem:[#allocation55_spill] sm:$0xff] %v9431_v14  ;;  %12078 = vst [vmem:[#allocation56_spill] sm:$0xff] %v9433_v61  ;;  %v1751_v52 = vrot.slane %v8962_v19, %v8689_v36  ;;  %v1758_v30 = vrot.slane %v8962_v19, %v8692_v37  ;;  %v1765_v31 = vrot.slane %v8962_v19, %v8695_v39 }
 0x10d   :  { %v1772_v62 = vrot.slane %v8962_v19, %v8698_v40  ;;  %12079 = vst [vmem:[#allocation57_spill] sm:$0xff] %v9453_v56  ;;  %12080 = vst [vmem:[#allocation58_spill] sm:$0xff] %v9455_v33  ;;  %v9457_v43 = vcombine.low %v1779_v22, %v1786_v55  ;;  %v1835_v57 = vrot.slane %v8999_v28, %v8689_v36 }
 0x10e   :  { %v4749_v24 = vrot.slane %v9230_v6, %v8713_v50  ;;  %v4589_v17 = vrot.slane %v9055_v44, %v8713_v50  ;;  %v1842_v7 = vrot.slane %v8999_v28, %v8692_v37  ;;  %v1849_v19 = vrot.slane %v8999_v28, %v8695_v39  ;;  %v9489_v55 = vpop.xlane.xlu1 %471 }
 0x10f   :  { %12081 = vst [vmem:[#allocation59_spill] sm:$0xff] %v9457_v43  ;;  %v1856_v8 = vrot.slane %v8999_v28, %v8698_v40  ;;  %v1807_v18 = vrot.slane %v9001_v1, %v8689_v36  ;;  %v1814_v51 = vrot.slane %v9001_v1, %v8692_v37  ;;  %v1821_v6 = vrot.slane %v9001_v1, %v8695_v39  ;;  %v9491_v61 = vpop.xlane.xlu0 %468 }
 0x110   :  { %v1828_v44 = vrot.slane %v9001_v1, %v8698_v40  ;;  %v4596_v60 = vrot.slane %v12082_v0, %v8713_v50  ;;  %v1891_v3 = vrot.slane %v12083_v41, %v8689_v36  ;;  %v1898_v28 = vrot.slane %v12083_v41, %v8692_v37  ;;  %12084 = vst [vmem:[#allocation37_spill] sm:$0xff] %v9489_v55  ;;  %v12086_v1 = vld [vmem:[#allocation35_spill] sm:$0xff] }
 0x111   :  { %v1905_v27 = vrot.slane %v12083_v41, %v8695_v39  ;;  %v1912_v22 = vrot.slane %v12083_v41, %v8698_v40  ;;  %12085 = vst [vmem:[#allocation34_spill] sm:$0xff] %v9491_v61  ;;  %v1863_v14 = vrot.slane %v12086_v1, %v8689_v36  ;;  %v1870_v0 = vrot.slane %v12086_v1, %v8692_v37 }
 0x112   :  { %v1877_v5 = vrot.slane %v12086_v1, %v8695_v39  ;;  %v1884_v21 = vrot.slane %v12086_v1, %v8698_v40  ;;  %v9501_v25 = vcombine.low %v1793_v59, %v1800_v63  ;;  %v9503_v49 = vcombine.low %v1751_v52, %v1758_v30  ;;  %v9523_v63 = vpop.xlane.xlu1 %477  ;;  %v12093_v52 = vld [vmem:[#allocation32_spill] sm:$0xff] }
 0x113   :  { %v9505_v41 = vcombine.low %v1765_v31, %v1772_v62  ;;  %v9507_v43 = vcombine.low %v4555_v15, %v4562_v58  ;;  %v9509_v61 = vcombine.low %v1835_v57, %v1842_v7  ;;  %v9511_v55 = vcombine.low %v1849_v19, %v1856_v8  ;;  %6557 = vperm.xlu1 %8343, %v12093_v52   ;;  %v9526_v15 = vpop.xlane.xlu0 %474  ;;  %v12096_v57 = vld [vmem:[#allocation39_spill] sm:$0xff]  ;;  %v12102_v52 = vld [vmem:[#allocation42_spill] sm:$0xff] }
 0x114   :  { %12087 = vst [vmem:[#allocation35_spill] sm:$0xff] %v9503_v49  ;;  %v9513_v33 = vcombine.low %v1807_v18, %v1814_v51  ;;  %v9515_v56 = vcombine.low %v4742_v48, %v4749_v24  ;;  %v9517_v4 = vcombine.low %v1891_v3, %v1898_v28  ;;  %v9519_v47 = vcombine.low %v1905_v27, %v1912_v22  ;;  %v12099_v18 = vld [vmem:[#allocation41_spill] sm:$0xff]  ;;  %v12100_v3 = vld [vmem:[#allocation31_spill] sm:$0xff] }
 0x115   :  { %12088 = vst [vmem:[#allocation60_spill] sm:$0xff] %v9505_v41  ;;  %v9521_v59 = vcombine.low %v1821_v6, %v1828_v44  ;;  %v4776_v58 = vrot.slane %v9240_v42, %v8713_v50  ;;  %v9530_v30 = vcombine.low %v1863_v14, %v1870_v0  ;;  %v9532_v31 = vcombine.low %v1877_v5, %v1884_v21  ;;  %v12097_v21 = vld [vmem:[#allocation40_spill] sm:$0xff]  ;;  %v12101_v27 = vld [vmem:[#allocation7_spill] sm:$0xff] }
 0x116   :  { %12089 = vst [vmem:[#allocation61_spill] sm:$0xff] %v9513_v33  ;;  %12090 = vst [vmem:[#allocation62_spill] sm:$0xff] %v9517_v4  ;;  %v9534_v48 = vcombine.low %v4589_v17, %v4596_v60  ;;  %v4783_v62 = vrot.slane %v9242_v11, %v8713_v50  ;;  %v1947_v24 = vrot.slane %v12096_v57, %v8689_v36  ;;  %v12098_v17 = vld [vmem:[#allocation15_spill] sm:$0xff]  ;;  %v9560_v60 = vpop.xlane.xlu1 %483 }
 0x117   :  { %12091 = vst [vmem:[#allocation63_spill] sm:$0xff] %v9519_v47  ;;  %12092 = vst [vmem:[#allocation64_spill] sm:$0xff] %v9521_v59  ;;  %v1954_v7 = vrot.slane %v12096_v57, %v8692_v37  ;;  %v1961_v19 = vrot.slane %v12096_v57, %v8695_v39  ;;  %v1968_v42 = vrot.slane %v12096_v57, %v8698_v40  ;;  %6560 = vperm.xlu1 %8343, %v12100_v3   ;;  %v9563_v28 = vpop.xlane.xlu0 %480 }
 0x118   :  { %12094 = vst [vmem:[#allocation32_spill] sm:$0xff] %v9530_v30  ;;  %12095 = vst [vmem:[#allocation65_spill] sm:$0xff] %v9532_v31  ;;  %v1919_v5 = vrot.slane %v12097_v21, %v8689_v36  ;;  %v1926_v14 = vrot.slane %v12097_v21, %v8692_v37  ;;  %v1933_v11 = vrot.slane %v12097_v21, %v8695_v39 }
 0x119   :  { %v4623_v8 = vrot.slane %v12098_v17, %v8713_v50  ;;  %v2003_v51 = vrot.slane %v12099_v18, %v8689_v36  ;;  %v2010_v6 = vrot.slane %v12099_v18, %v8692_v37  ;;  %v1940_v44 = vrot.slane %v12097_v21, %v8698_v40  ;;  %v12103_v17 = vld [vmem:[#allocation33_spill] sm:$0xff] }
 0x11a   :  { %v4630_v22 = vrot.slane %v12101_v27, %v8713_v50  ;;  %v2017_v1 = vrot.slane %v12099_v18, %v8695_v39  ;;  %v2024_v0 = vrot.slane %v12099_v18, %v8698_v40  ;;  %v1975_v57 = vrot.slane %v12102_v52, %v8689_v36  ;;  %6554 = vperm.xlu0 %8342, %v12103_v17   ;;  %v12107_v18 = vld [vmem:[#allocation8_spill] sm:$0xff] }
 0x11b   :  { %v1982_v21 = vrot.slane %v12102_v52, %v8692_v37  ;;  %v9576_v3 = vcombine.low %v1947_v24, %v1954_v7  ;;  %v9578_v31 = vcombine.low %v1961_v19, %v1968_v42  ;;  %v1989_v27 = vrot.slane %v12102_v52, %v8695_v39  ;;  %v9598_v42 = vpop.xlane.xlu1 %489 }
 0x11c   :  { %v1996_v30 = vrot.slane %v12102_v52, %v8698_v40  ;;  %v9584_v59 = vcombine.low %v1919_v5, %v1926_v14  ;;  %v2059_v33 = vrot.slane %v12107_v18, %v8689_v36  ;;  %v2066_v41 = vrot.slane %v12107_v18, %v8692_v37  ;;  %12109 = vst [vmem:[#allocation31_spill] sm:$0xff] %v9598_v42  ;;  %v12110_v5 = vld [vmem:[#allocation36_spill] sm:$0xff]  ;;  %v9601_v14 = vpop.xlane.xlu0 %486 }
 0x11d   :  { %12104 = vst [vmem:[#allocation39_spill] sm:$0xff] %v9576_v3  ;;  %12105 = vst [vmem:[#allocation40_spill] sm:$0xff] %v9578_v31  ;;  %v9590_v49 = vcombine.low %v4776_v58, %v4783_v62  ;;  %v9592_v24 = vcombine.low %v1933_v11, %v1940_v44  ;;  %v2073_v7 = vrot.slane %v12107_v18, %v8695_v39  ;;  %6563 = vperm.xlu1 %8343, %v12110_v5   ;;  %v12115_v11 = vld [vmem:[#allocation38_spill] sm:$0xff] }
 0x11e   :  { %12106 = vst [vmem:[#allocation15_spill] sm:$0xff] %v9584_v59  ;;  %v2080_v19 = vrot.slane %v12107_v18, %v8698_v40  ;;  %12111 = vst [vmem:[#allocation7_spill] sm:$0xff] %v9601_v14  ;;  %v4810_v52 = vrot.slane %v9302_v53, %v8713_v50  ;;  %v9605_v17 = vcombine.low %v2003_v51, %v2010_v6  ;;  %6581 = vperm.xlu0 %8342, %v12115_v11   ;;  %v12118_v53 = vld [vmem:[#allocation44_spill] sm:$0xff] }
 0x11f   :  { %12108 = vst [vmem:[#allocation41_spill] sm:$0xff] %v9592_v24  ;;  %v9607_v58 = vcombine.low %v2017_v1, %v2024_v0  ;;  %v9609_v62 = vcombine.low %v1975_v57, %v1982_v21  ;;  %v9612_v44 = vcombine.low %v4623_v8, %v4630_v22  ;;  %v9614_v18 = vcombine.low %v1989_v27, %v1996_v30  ;;  %v12117_v24 = vld [vmem:[#allocation46_spill] sm:$0xff]  ;;  %v12121_v0 = vld [vmem:[#allocation9_spill] sm:$0xff]  ;;  %v12123_v21 = vld [vmem:[#allocation43_spill] sm:$0xff] }
 0x120   :  { %12112 = vst [vmem:[#allocation42_spill] sm:$0xff] %v9605_v17  ;;  %v2031_v5 = vrot.slane %v12117_v24, %v8689_v36  ;;  %v4817_v59 = vrot.slane %v9304_v38, %v8713_v50  ;;  %v4657_v51 = vrot.slane %v12118_v53, %v8713_v50  ;;  %v9622_v6 = vcombine.low %v2059_v33, %v2066_v41  ;;  %v9634_v38 = vpop.xlane.xlu1 %495  ;;  %v9637_v33 = vpop.xlane.xlu0 %492  ;;  %v12125_v41 = vld [vmem:[#allocation45_spill] sm:$0xff]  ;;  %v12126_v53 = vld [vmem:[#allocation10_spill] sm:$0xff] }
 0x121   :  { %12113 = vst [vmem:[#allocation33_spill] sm:$0xff] %v9607_v58  ;;  %12114 = vst [vmem:[#allocation8_spill] sm:$0xff] %v9609_v62  ;;  %v2038_v1 = vrot.slane %v12117_v24, %v8692_v37  ;;  %v2045_v8 = vrot.slane %v12117_v24, %v8695_v39  ;;  %v2052_v30 = vrot.slane %v12117_v24, %v8698_v40  ;;  %6566 = vperm.xlu1 %8343, %v12123_v21  }
 0x122   :  { %12116 = vst [vmem:[#allocation36_spill] sm:$0xff] %v9614_v18  ;;  %12119 = vst [vmem:[#allocation38_spill] sm:$0xff] %v9622_v6  ;;  %v9630_v22 = vcombine.low %v2073_v7, %v2080_v19  ;;  %v2115_v57 = vrot.slane %v12121_v0, %v8689_v36  ;;  %v4664_v27 = vrot.slane %v12125_v41, %v8713_v50  ;;  %v12127_v18 = vld [vmem:[#allocation18_spill] sm:$0xff] }
 0x123   :  { %12122 = vst [vmem:[#allocation44_spill] sm:$0xff] %v9634_v38  ;;  %12124 = vst [vmem:[#allocation9_spill] sm:$0xff] %v9637_v33  ;;  %v4844_v11 = vrot.slane %v9322_v32, %v8713_v50  ;;  %v2122_v24 = vrot.slane %v12121_v0, %v8692_v37  ;;  %v2129_v7 = vrot.slane %v12121_v0, %v8695_v39  ;;  %6587 = vperm.xlu0 %8342, %v12127_v18  }
 0x124   :  { %12120 = vst [vmem:[#allocation46_spill] sm:$0xff] %v9630_v22  ;;  %v2136_v19 = vrot.slane %v12121_v0, %v8698_v40  ;;  %v2087_v21 = vrot.slane %v12126_v53, %v8689_v36  ;;  %v2094_v41 = vrot.slane %v12126_v53, %v8692_v37  ;;  %v2101_v32 = vrot.slane %v12126_v53, %v8695_v39  ;;  %v9676_v31 = vpop.xlane.xlu1 %501  ;;  %v9679_v3 = vpop.xlane.xlu0 %498 }
 0x125   :  { %v2108_v62 = vrot.slane %v12126_v53, %v8698_v40  ;;  %v4851_v22 = vrot.slane %v9324_v9, %v8713_v50  ;;  %v2171_v0 = vrot.slane %v9234_v34, %v8689_v36  ;;  %v2178_v6 = vrot.slane %v9234_v34, %v8692_v37  ;;  %12128 = vst [vmem:[#allocation43_spill] sm:$0xff] %v9676_v31 }
 0x126   :  { %v2185_v18 = vrot.slane %v9234_v34, %v8695_v39  ;;  %v2192_v58 = vrot.slane %v9234_v34, %v8698_v40  ;;  %v2143_v17 = vrot.slane %v9236_v29, %v8689_v36  ;;  %v2150_v53 = vrot.slane %v9236_v29, %v8692_v37  ;;  %6569 = vperm.xlu1 %8343, %v9226_v12  }
 0x127   :  { %v2157_v9 = vrot.slane %v9236_v29, %v8695_v39  ;;  %v2164_v33 = vrot.slane %v9236_v29, %v8698_v40  ;;  %v9681_v38 = vcombine.low %v2115_v57, %v2122_v24  ;;  %v9683_v34 = vcombine.low %v2031_v5, %v2038_v1  ;;  %6593 = vperm.xlu0 %8342, %v9238_v23  }
 0x128   :  { %v9685_v14 = vcombine.low %v2045_v8, %v2052_v30  ;;  %v9688_v47 = vcombine.low %v4810_v52, %v4817_v59  ;;  %v9690_v4 = vcombine.low %v2129_v7, %v2136_v19  ;;  %v9692_v42 = vcombine.low %v2087_v21, %v2094_v41  ;;  %v12142_v19 = vld [vmem:[#allocation25_spill] sm:$0xff] }
 0x129   :  { %12129 = vst [vmem:[#allocation45_spill] sm:$0xff] %v9683_v34  ;;  %v9694_v29 = vcombine.low %v2101_v32, %v2108_v62  ;;  %v9696_v31 = vcombine.low %v4657_v51, %v4664_v27  ;;  %v9698_v12 = vcombine.low %v2171_v0, %v2178_v6  ;;  %v2227_v5 = vrot.slane %v9273_v20, %v8689_v36  ;;  %v9712_v62 = vpop.xlane.xlu1 %507  ;;  %v9715_v51 = vpop.xlane.xlu0 %504  ;;  %v12143_v32 = vld [vmem:[#allocation50_spill] sm:$0xff] }
 0x12a   :  { %12130 = vst [vmem:[#allocation10_spill] sm:$0xff] %v9685_v14  ;;  %12131 = vst [vmem:[#allocation18_spill] sm:$0xff] %v9692_v42  ;;  %v2234_v1 = vrot.slane %v9273_v20, %v8692_v37  ;;  %v4691_v23 = vrot.slane %v9219_v16, %v8713_v50  ;;  %v9706_v59 = vcombine.low %v2185_v18, %v2192_v58  ;;  %6572 = vperm.xlu1 %8343, %v9252_v45   ;;  %v12137_v58 = vld [vmem:[#allocation14_spill] sm:$0xff]  ;;  %v12140_v45 = vld [vmem:[#allocation24_spill] sm:$0xff] }
 0x12b   :  { %12132 = vst [vmem:[#allocation66_spill] sm:$0xff] %v9694_v29  ;;  %12133 = vst [vmem:[#allocation67_spill] sm:$0xff] %v9698_v12  ;;  %v9708_v52 = vcombine.low %v2143_v17, %v2150_v53  ;;  %v9710_v8 = vcombine.low %v2157_v9, %v2164_v33  ;;  %v9717_v6 = vcombine.low %v4844_v11, %v4851_v22  ;;  %6599 = vperm.xlu0 %8342, %v12137_v58   ;;  %v12138_v17 = vld [vmem:[#allocation19_spill] sm:$0xff]  ;;  %v12139_v33 = vld [vmem:[#allocation49_spill] sm:$0xff] }
 0x12c   :  { %12134 = vst [vmem:[#allocation68_spill] sm:$0xff] %v9706_v59  ;;  %v2241_v30 = vrot.slane %v9273_v20, %v8695_v39  ;;  %v2248_v16 = vrot.slane %v9273_v20, %v8698_v40  ;;  %v4698_v57 = vrot.slane %v12138_v17, %v8713_v50  ;;  %v4878_v27 = vrot.slane %v12139_v33, %v8713_v50  ;;  %v12144_v9 = vld [vmem:[#allocation26_spill] sm:$0xff]  ;;  %v12145_v17 = vld [vmem:[#allocation47_spill] sm:$0xff] }
 0x12d   :  { %12135 = vst [vmem:[#allocation69_spill] sm:$0xff] %v9708_v52  ;;  %12136 = vst [vmem:[#allocation70_spill] sm:$0xff] %v9710_v8  ;;  %v2199_v24 = vrot.slane %v12140_v45, %v8689_v36  ;;  %v2206_v22 = vrot.slane %v12140_v45, %v8692_v37  ;;  %v2213_v11 = vrot.slane %v12140_v45, %v8695_v39  ;;  %v9755_v33 = vpop.xlane.xlu0 %510  ;;  %v12147_v8 = vld [vmem:[#allocation21_spill] sm:$0xff] }
 0x12e   :  { %v2220_v20 = vrot.slane %v12140_v45, %v8698_v40  ;;  %v9736_v7 = vcombine.low %v2227_v5, %v2234_v1  ;;  %v2283_v21 = vrot.slane %v12142_v19, %v8689_v36  ;;  %v2290_v41 = vrot.slane %v12142_v19, %v8692_v37  ;;  %v9752_v1 = vpop.xlane.xlu1 %513  ;;  %6575 = vperm.xlu1 %8343, %v12145_v17  }
 0x12f   :  { %v4885_v0 = vrot.slane %v12143_v32, %v8713_v50  ;;  %v2297_v18 = vrot.slane %v12142_v19, %v8695_v39  ;;  %v2304_v53 = vrot.slane %v12142_v19, %v8698_v40  ;;  %v2255_v58 = vrot.slane %v12144_v9, %v8689_v36  ;;  %6605 = vperm.xlu0 %8342, %v9407_v54   ;;  %v12150_v54 = vld [vmem:[#allocation22_spill] sm:$0xff] }
 0x130   :  { %12141 = vst [vmem:[#allocation14_spill] sm:$0xff] %v9736_v7  ;;  %v2262_v5 = vrot.slane %v12144_v9, %v8692_v37  ;;  %v9757_v45 = vcombine.low %v2241_v30, %v2248_v16  ;;  %v2269_v32 = vrot.slane %v12144_v9, %v8695_v39  ;;  %v2276_v19 = vrot.slane %v12144_v9, %v8698_v40 }
 0x131   :  { %v9764_v7 = vcombine.low %v4691_v23, %v4698_v57  ;;  %v2339_v52 = vrot.slane %v12147_v8, %v8689_v36  ;;  %v2346_v17 = vrot.slane %v12147_v8, %v8692_v37  ;;  %v2353_v30 = vrot.slane %v12147_v8, %v8695_v39  ;;  %v12151_v57 = vld [vmem:[#allocation11_spill] sm:$0xff] }
 0x132   :  { %12146 = vst [vmem:[#allocation19_spill] sm:$0xff] %v9757_v45  ;;  %v2360_v16 = vrot.slane %v12147_v8, %v8698_v40  ;;  %v9774_v45 = vcombine.low %v2199_v24, %v2206_v22  ;;  %v9776_v29 = vcombine.low %v2213_v11, %v2220_v20  ;;  %v4725_v23 = vrot.slane %v12150_v54, %v8713_v50  ;;  %v9788_v59 = vpop.xlane.xlu1 %519  ;;  %v9791_v8 = vpop.xlane.xlu0 %516  ;;  %v12157_v11 = vld [vmem:[#allocation48_spill] sm:$0xff] }
 0x133   :  { %v4732_v9 = vrot.slane %v12151_v57, %v8713_v50  ;;  %v9782_v42 = vcombine.low %v2283_v21, %v2290_v41  ;;  %v9784_v14 = vcombine.low %v2297_v18, %v2304_v53  ;;  %v9786_v34 = vcombine.low %v2255_v58, %v2262_v5  ;;  %12155 = vst [vmem:[#allocation47_spill] sm:$0xff] %v9788_v59  ;;  %v12160_v53 = vld [vmem:[#allocation27_spill] sm:$0xff] }
 0x134   :  { %12148 = vst [vmem:[#allocation49_spill] sm:$0xff] %v9774_v45  ;;  %12149 = vst [vmem:[#allocation24_spill] sm:$0xff] %v9776_v29  ;;  %6578 = vperm.xlu1 %8343, %v9419_v2   ;;  %v9793_v24 = vcombine.low %v4878_v27, %v4885_v0  ;;  %v9795_v22 = vcombine.low %v2269_v32, %v2276_v19  ;;  %v2311_v20 = vrot.slane %v12157_v11, %v8689_v36 }
 0x135   :  { %12152 = vst [vmem:[#allocation25_spill] sm:$0xff] %v9782_v42  ;;  %12153 = vst [vmem:[#allocation50_spill] sm:$0xff] %v9784_v14  ;;  %v2318_v21 = vrot.slane %v12157_v11, %v8692_v37  ;;  %6611 = vperm.xlu0 %8342, %v9435_v26   ;;  %v4912_v41 = vrot.slane %v9401_v35, %v8713_v50  ;;  %v9804_v18 = vcombine.low %v2339_v52, %v2346_v17  ;;  %v12161_v35 = vld [vmem:[#allocation12_spill] sm:$0xff] }
 0x136   :  { %12154 = vst [vmem:[#allocation26_spill] sm:$0xff] %v9786_v34  ;;  %12156 = vst [vmem:[#allocation21_spill] sm:$0xff] %v9795_v22  ;;  %v9806_v2 = vcombine.low %v2353_v30, %v2360_v16  ;;  %v2325_v27 = vrot.slane %v12157_v11, %v8695_v39  ;;  %v2332_v0 = vrot.slane %v12157_v11, %v8698_v40  ;;  %v12162_v30 = vld [vmem:[#allocation28_spill] sm:$0xff]  ;;  %v9828_v54 = vpop.xlane.xlu1 %525  ;;  %v12164_v11 = vld [vmem:[#allocation23_spill] sm:$0xff] }
 0x137   :  { %12158 = vst [vmem:[#allocation22_spill] sm:$0xff] %v9804_v18  ;;  %v2395_v58 = vrot.slane %v12160_v53, %v8689_v36  ;;  %v9814_v5 = vcombine.low %v4725_v23, %v4732_v9  ;;  %v4919_v26 = vrot.slane %v9409_v13, %v8713_v50  ;;  %v4759_v52 = vrot.slane %v12161_v35, %v8713_v50  ;;  %v9831_v13 = vpop.xlane.xlu0 %522  ;;  %v12166_v22 = vld [vmem:[#allocation54_spill] sm:$0xff] }
 0x138   :  { %12159 = vst [vmem:[#allocation11_spill] sm:$0xff] %v9806_v2  ;;  %v2402_v32 = vrot.slane %v12160_v53, %v8692_v37  ;;  %v2409_v19 = vrot.slane %v12160_v53, %v8695_v39  ;;  %v2416_v17 = vrot.slane %v12160_v53, %v8698_v40  ;;  %v2367_v16 = vrot.slane %v12162_v30, %v8689_v36 }
 0x139   :  { %6584 = vperm.xlu1 %8343, %v9507_v43   ;;  %12163 = vst [vmem:[#allocation48_spill] sm:$0xff] %v9831_v13  ;;  %v2374_v23 = vrot.slane %v12162_v30, %v8692_v37  ;;  %v2381_v57 = vrot.slane %v12162_v30, %v8695_v39  ;;  %v2388_v9 = vrot.slane %v12162_v30, %v8698_v40 }
 0x13a   :  { %6617 = vperm.xlu0 %8342, %v9515_v56   ;;  %v4766_v53 = vrot.slane %v12164_v11, %v8713_v50  ;;  %v2451_v35 = vrot.slane %v9415_v10, %v8689_v36  ;;  %v2458_v43 = vrot.slane %v9415_v10, %v8692_v37  ;;  %v2465_v59 = vrot.slane %v9415_v10, %v8695_v39  ;;  %v12165_v11 = vld [vmem:[#allocation53_spill] sm:$0xff] }
 0x13b   :  { %v2472_v2 = vrot.slane %v9415_v10, %v8698_v40  ;;  %v2423_v30 = vrot.slane %v9417_v46, %v8689_v36  ;;  %v2430_v56 = vrot.slane %v9417_v46, %v8692_v37  ;;  %v4946_v18 = vrot.slane %v12165_v11, %v8713_v50  ;;  %v9866_v10 = vpop.xlane.xlu1 %531  ;;  %v9869_v12 = vpop.xlane.xlu0 %528 }
 0x13c   :  { %v4953_v34 = vrot.slane %v12166_v22, %v8713_v50  ;;  %v9858_v14 = vcombine.low %v2395_v58, %v2402_v32  ;;  %v9860_v42 = vcombine.low %v2409_v19, %v2416_v17  ;;  %v9862_v29 = vcombine.low %v2311_v20, %v2318_v21  ;;  %v12176_v19 = vld [vmem:[#allocation13_spill] sm:$0xff] }
 0x13d   :  { %v9864_v45 = vcombine.low %v2325_v27, %v2332_v0  ;;  %6590 = vperm.xlu1 %8343, %v9534_v48   ;;  %v9871_v13 = vcombine.low %v2367_v16, %v2374_v23  ;;  %v9873_v11 = vcombine.low %v2381_v57, %v2388_v9  ;;  %v2437_v22 = vrot.slane %v9417_v46, %v8695_v39 }
 0x13e   :  { %12167 = vst [vmem:[#allocation27_spill] sm:$0xff] %v9858_v14  ;;  %12168 = vst [vmem:[#allocation12_spill] sm:$0xff] %v9860_v42  ;;  %6623 = vperm.xlu0 %8342, %v9590_v49   ;;  %v9878_v58 = vcombine.low %v4912_v41, %v4919_v26  ;;  %v9880_v20 = vcombine.low %v2451_v35, %v2458_v43  ;;  %v9882_v21 = vcombine.low %v2465_v59, %v2472_v2  ;;  %v12177_v49 = vld [vmem:[#allocation16_spill] sm:$0xff]  ;;  %v12178_v26 = vld [vmem:[#allocation57_spill] sm:$0xff] }
 0x13f   :  { %12169 = vst [vmem:[#allocation28_spill] sm:$0xff] %v9862_v29  ;;  %12170 = vst [vmem:[#allocation23_spill] sm:$0xff] %v9864_v45  ;;  %v2444_v48 = vrot.slane %v9417_v46, %v8698_v40  ;;  %v9886_v27 = vcombine.low %v4759_v52, %v4766_v53  ;;  %v9888_v0 = vcombine.low %v2423_v30, %v2430_v56  ;;  %v12179_v52 = vld [vmem:[#allocation58_spill] sm:$0xff]  ;;  %v12180_v35 = vld [vmem:[#allocation37_spill] sm:$0xff] }
 0x140   :  { %12171 = vst [vmem:[#allocation53_spill] sm:$0xff] %v9871_v13  ;;  %12172 = vst [vmem:[#allocation54_spill] sm:$0xff] %v9873_v11  ;;  %v9890_v32 = vcombine.low %v4946_v18, %v4953_v34  ;;  %v4793_v17 = vrot.slane %v12176_v19, %v8713_v50  ;;  %v4800_v41 = vrot.slane %v12177_v49, %v8713_v50  ;;  %v9904_v34 = vpop.xlane.xlu1 %537  ;;  %v9907_v18 = vpop.xlane.xlu0 %534  ;;  %v12181_v30 = vld [vmem:[#allocation59_spill] sm:$0xff] }
 0x141   :  { %12173 = vst [vmem:[#allocation71_spill] sm:$0xff] %v9880_v20  ;;  %12174 = vst [vmem:[#allocation72_spill] sm:$0xff] %v9882_v21  ;;  %v2507_v16 = vrot.slane %v12178_v26, %v8689_v36  ;;  %v2514_v59 = vrot.slane %v12178_v26, %v8692_v37  ;;  %v2521_v46 = vrot.slane %v12178_v26, %v8695_v39  ;;  %6596 = vperm.xlu1 %8343, %v9612_v44  }
 0x142   :  { %12175 = vst [vmem:[#allocation73_spill] sm:$0xff] %v9888_v0  ;;  %v2528_v2 = vrot.slane %v12178_v26, %v8698_v40  ;;  %v2479_v23 = vrot.slane %v12179_v52, %v8689_v36  ;;  %v2486_v57 = vrot.slane %v12179_v52, %v8692_v37  ;;  %v2493_v9 = vrot.slane %v12179_v52, %v8695_v39 }
 0x143   :  { %v2500_v53 = vrot.slane %v12179_v52, %v8698_v40  ;;  %6629 = vperm.xlu0 %8342, %v9688_v47   ;;  %v2563_v43 = vrot.slane %v12180_v35, %v8689_v36  ;;  %v2570_v44 = vrot.slane %v12180_v35, %v8692_v37  ;;  %v4980_v56 = vrot.slane %v12181_v30, %v8713_v50  ;;  %v12182_v47 = vld [vmem:[#allocation34_spill] sm:$0xff] }
 0x144   :  { %v4987_v19 = vrot.slane %v9501_v25, %v8713_v50  ;;  %v2577_v49 = vrot.slane %v12180_v35, %v8695_v39  ;;  %v2584_v26 = vrot.slane %v12180_v35, %v8698_v40  ;;  %v2535_v52 = vrot.slane %v12182_v47, %v8689_v36  ;;  %v9942_v11 = vpop.xlane.xlu1 %543  ;;  %v9945_v35 = vpop.xlane.xlu0 %540 }
 0x145   :  { %v2542_v0 = vrot.slane %v12182_v47, %v8692_v37  ;;  %v9934_v21 = vcombine.low %v2507_v16, %v2514_v59  ;;  %v9936_v20 = vcombine.low %v2437_v22, %v2444_v48  ;;  %v2549_v30 = vrot.slane %v12182_v47, %v8695_v39  ;;  %6602 = vperm.xlu1 %8343, %v9696_v31  }
 0x146   :  { %v2556_v25 = vrot.slane %v12182_v47, %v8698_v40  ;;  %v9947_v13 = vcombine.low %v2521_v46, %v2528_v2  ;;  %v9949_v42 = vcombine.low %v2479_v23, %v2486_v57  ;;  %v9951_v16 = vcombine.low %v2493_v9, %v2500_v53  ;;  %v12189_v47 = vld [vmem:[#allocation17_spill] sm:$0xff] }
 0x147   :  { %12183 = vst [vmem:[#allocation13_spill] sm:$0xff] %v9934_v21  ;;  %12184 = vst [vmem:[#allocation16_spill] sm:$0xff] %v9936_v20  ;;  %6635 = vperm.xlu0 %8342, %v9717_v6   ;;  %v9954_v22 = vcombine.low %v4793_v17, %v4800_v41  ;;  %v9956_v48 = vcombine.low %v2563_v43, %v2570_v44  ;;  %v2619_v59 = vrot.slane %v9523_v63, %v8689_v36  ;;  %v12192_v6 = vld [vmem:[#allocation20_spill] sm:$0xff] }
 0x148   :  { %12185 = vst [vmem:[#allocation57_spill] sm:$0xff] %v9947_v13  ;;  %12186 = vst [vmem:[#allocation58_spill] sm:$0xff] %v9949_v42  ;;  %v2626_v31 = vrot.slane %v9523_v63, %v8692_v37  ;;  %v4827_v46 = vrot.slane %v12189_v47, %v8713_v50  ;;  %v9964_v2 = vcombine.low %v2577_v49, %v2584_v26  ;;  %v9976_v53 = vpop.xlane.xlu1 %549  ;;  %v9979_v43 = vpop.xlane.xlu0 %546 }
 0x149   :  { %12187 = vst [vmem:[#allocation37_spill] sm:$0xff] %v9951_v16  ;;  %12188 = vst [vmem:[#allocation59_spill] sm:$0xff] %v9956_v48  ;;  %v9966_v23 = vcombine.low %v2535_v52, %v2542_v0  ;;  %v9968_v57 = vcombine.low %v4980_v56, %v4987_v19  ;;  %v4834_v17 = vrot.slane %v12192_v6, %v8713_v50  ;;  %6608 = vperm.xlu1 %8343, %v9764_v7   ;;  %v12199_v16 = vld [vmem:[#allocation31_spill] sm:$0xff] }
 0x14a   :  { %12190 = vst [vmem:[#allocation34_spill] sm:$0xff] %v9964_v2  ;;  %v2633_v41 = vrot.slane %v9523_v63, %v8695_v39  ;;  %v9974_v9 = vcombine.low %v2549_v30, %v2556_v25  ;;  %v5014_v0 = vrot.slane %v9509_v61, %v8713_v50  ;;  %v5021_v44 = vrot.slane %v9511_v55, %v8713_v50  ;;  %v12194_v55 = vld [vmem:[#allocation29_spill] sm:$0xff] }
 0x14b   :  { %12191 = vst [vmem:[#allocation17_spill] sm:$0xff] %v9966_v23  ;;  %v2640_v56 = vrot.slane %v9523_v63, %v8698_v40  ;;  %v2591_v19 = vrot.slane %v9526_v15, %v8689_v36  ;;  %v2598_v49 = vrot.slane %v9526_v15, %v8692_v37  ;;  %v2605_v7 = vrot.slane %v9526_v15, %v8695_v39  ;;  %v12195_v63 = vld [vmem:[#allocation30_spill] sm:$0xff] }
 0x14c   :  { %12193 = vst [vmem:[#allocation20_spill] sm:$0xff] %v9974_v9  ;;  %6641 = vperm.xlu0 %8342, %v9793_v24   ;;  %v9994_v26 = vcombine.low %v2619_v59, %v2626_v31  ;;  %v2612_v61 = vrot.slane %v9526_v15, %v8698_v40  ;;  %v4861_v52 = vrot.slane %v12194_v55, %v8713_v50  ;;  %v10021_v9 = vpop.xlane.xlu0 %552 }
 0x14d   :  { %v4868_v30 = vrot.slane %v12195_v63, %v8713_v50  ;;  %v2675_v25 = vrot.slane %v9560_v60, %v8689_v36  ;;  %v2682_v47 = vrot.slane %v9560_v60, %v8692_v37  ;;  %v2689_v24 = vrot.slane %v9560_v60, %v8695_v39  ;;  %v10018_v63 = vpop.xlane.xlu1 %555  ;;  %6614 = vperm.xlu1 %8343, %v9814_v5  }
 0x14e   :  { %v2696_v59 = vrot.slane %v9560_v60, %v8698_v40  ;;  %v2647_v15 = vrot.slane %v9563_v28, %v8689_v36  ;;  %v2654_v31 = vrot.slane %v9563_v28, %v8692_v37  ;;  %v2661_v6 = vrot.slane %v9563_v28, %v8695_v39  ;;  %12196 = vst [vmem:[#allocation29_spill] sm:$0xff] %v10018_v63 }
 0x14f   :  { %v2668_v55 = vrot.slane %v9563_v28, %v8698_v40  ;;  %12197 = vst [vmem:[#allocation30_spill] sm:$0xff] %v10021_v9  ;;  %v10023_v23 = vcombine.low %v2633_v41, %v2640_v56  ;;  %v10025_v60 = vcombine.low %v2591_v19, %v2598_v49  ;;  %v4835_v2 = vcombine.low %v4827_v46, %v4834_v17 }
 0x150   :  { %6647 = vperm.xlu0 %8342, %v9878_v58   ;;  %v5022_v48 = vcombine.low %v5014_v0, %v5021_v44  ;;  %v2731_v42 = vrot.slane %v12199_v16, %v8689_v36  ;;  %v2738_v28 = vrot.slane %v12199_v16, %v8692_v37  ;;  %v2745_v13 = vrot.slane %v12199_v16, %v8695_v39  ;;  %v10051_v44 = vpop.xlane.xlu0 %558 }
 0x151   :  { %12198 = vst [vmem:[#allocation74_spill] sm:$0xff] %v10025_v60  ;;  %v2752_v5 = vrot.slane %v12199_v16, %v8698_v40  ;;  %v10036_v41 = vcombine.low %v2675_v25, %v2682_v47  ;;  %v10038_v56 = vcombine.low %v2689_v24, %v2696_v59  ;;  %v10040_v19 = vcombine.low %v2605_v7, %v2612_v61  ;;  %v10048_v0 = vpop.xlane.xlu1 %561  ;;  %v12206_v16 = vld [vmem:[#allocation62_spill] sm:$0xff]  ;;  %v12207_v25 = vld [vmem:[#allocation63_spill] sm:$0xff] }
 0x152   :  { %v10042_v58 = vcombine.low %v4861_v52, %v4868_v30  ;;  %v10044_v46 = vcombine.low %v2647_v15, %v2654_v31  ;;  %v10046_v17 = vcombine.low %v2661_v6, %v2668_v55  ;;  %12204 = vst [vmem:[#allocation78_spill] sm:$0xff] %v10048_v0  ;;  %6620 = vperm.xlu1 %8343, %v9886_v27   ;;  %12205 = vst [vmem:[#allocation79_spill] sm:$0xff] %v10051_v44  ;;  %v12208_v7 = vld [vmem:[#allocation7_spill] sm:$0xff]  ;;  %v12212_v6 = vld [vmem:[#allocation52_spill] sm:$0xff] }
 0x153   :  { %12200 = vst [vmem:[#allocation31_spill] sm:$0xff] %v10036_v41  ;;  %12201 = vst [vmem:[#allocation75_spill] sm:$0xff] %v10038_v56  ;;  %v5048_v49 = vrot.slane %v12206_v16, %v8713_v50  ;;  %v5055_v47 = vrot.slane %v12207_v25, %v8713_v50  ;;  %v2703_v61 = vrot.slane %v12208_v7, %v8689_v36  ;;  %v12209_v27 = vld [vmem:[#allocation51_spill] sm:$0xff]  ;;  %v12213_v16 = vld [vmem:[#allocation44_spill] sm:$0xff] }
 0x154   :  { %12202 = vst [vmem:[#allocation76_spill] sm:$0xff] %v10040_v19  ;;  %12203 = vst [vmem:[#allocation77_spill] sm:$0xff] %v10046_v17  ;;  %v2710_v52 = vrot.slane %v12208_v7, %v8692_v37  ;;  %v2717_v30 = vrot.slane %v12208_v7, %v8695_v39  ;;  %6653 = vperm.xlu0 %8342, %v9890_v32   ;;  %v4895_v24 = vrot.slane %v12209_v27, %v8713_v50  ;;  %v12214_v32 = vld [vmem:[#allocation39_spill] sm:$0xff] }
 0x155   :  { %v10066_v59 = vcombine.low %v2731_v42, %v2738_v28  ;;  %v10068_v15 = vcombine.low %v2745_v13, %v2752_v5  ;;  %v2724_v31 = vrot.slane %v12208_v7, %v8698_v40  ;;  %v4902_v55 = vrot.slane %v12212_v6, %v8713_v50  ;;  %v12215_v42 = vld [vmem:[#allocation40_spill] sm:$0xff]  ;;  %v12216_v7 = vld [vmem:[#allocation9_spill] sm:$0xff]  ;;  %v10090_v14 = vpop.xlane.xlu1 %567 }
 0x156   :  { %v2787_v25 = vrot.slane %v12213_v16, %v8689_v36  ;;  %v2794_v21 = vrot.slane %v12213_v16, %v8692_v37  ;;  %v5082_v20 = vrot.slane %v12214_v32, %v8713_v50  ;;  %v5089_v28 = vrot.slane %v12215_v42, %v8713_v50  ;;  %12217 = vst [vmem:[#allocation7_spill] sm:$0xff] %v10090_v14  ;;  %v10093_v32 = vpop.xlane.xlu0 %564  ;;  %v12221_v14 = vld [vmem:[#allocation43_spill] sm:$0xff] }
 0x157   :  { %12210 = vst [vmem:[#allocation62_spill] sm:$0xff] %v10066_v59  ;;  %12211 = vst [vmem:[#allocation63_spill] sm:$0xff] %v10068_v15  ;;  %v2801_v13 = vrot.slane %v12213_v16, %v8695_v39  ;;  %v2808_v5 = vrot.slane %v12213_v16, %v8698_v40  ;;  %v2759_v27 = vrot.slane %v12216_v7, %v8689_v36  ;;  %6626 = vperm.xlu1 %8343, %v9954_v22   ;;  %v12219_v16 = vld [vmem:[#allocation55_spill] sm:$0xff]  ;;  %v12220_v15 = vld [vmem:[#allocation56_spill] sm:$0xff] }
 0x158   :  { %v2766_v6 = vrot.slane %v12216_v7, %v8692_v37  ;;  %12218 = vst [vmem:[#allocation51_spill] sm:$0xff] %v10093_v32  ;;  %v2773_v42 = vrot.slane %v12216_v7, %v8695_v39  ;;  %v2780_v45 = vrot.slane %v12216_v7, %v8698_v40  ;;  %6659 = vperm.xlu0 %8342, %v9968_v57  }
 0x159   :  { %v4929_v29 = vrot.slane %v12219_v16, %v8713_v50  ;;  %v4936_v59 = vrot.slane %v12220_v15, %v8713_v50  ;;  %v2843_v56 = vrot.slane %v12221_v14, %v8689_v36  ;;  %v2850_v22 = vrot.slane %v12221_v14, %v8692_v37  ;;  %v10122_v9 = vpop.xlane.xlu1 %573 }
 0x15a   :  { %v2857_v32 = vrot.slane %v12221_v14, %v8695_v39  ;;  %v2864_v7 = vrot.slane %v12221_v14, %v8698_v40  ;;  %v10112_v41 = vcombine.low %v2787_v25, %v2794_v21  ;;  %v10114_v57 = vcombine.low %v2703_v61, %v2710_v52  ;;  %v10124_v63 = vpop.xlane.xlu0 %570  ;;  %v12228_v52 = vld [vmem:[#allocation42_spill] sm:$0xff] }
 0x15b   :  { %v10116_v16 = vcombine.low %v2717_v30, %v2724_v31  ;;  %v5056_v44 = vcombine.low %v5048_v49, %v5055_v47  ;;  %v10118_v15 = vcombine.low %v2801_v13, %v2808_v5  ;;  %v10120_v0 = vcombine.low %v2759_v27, %v2766_v6  ;;  %6632 = vperm.xlu1 %8343, %v4835_v2  }
 0x15c   :  { %12222 = vst [vmem:[#allocation52_spill] sm:$0xff] %v10112_v41  ;;  %v4903_v19 = vcombine.low %v4895_v24, %v4902_v55  ;;  %v5090_v60 = vcombine.low %v5082_v20, %v5089_v28  ;;  %v10126_v17 = vcombine.low %v2773_v42, %v2780_v45  ;;  %v2815_v14 = vrot.slane %v9679_v3, %v8689_v36  ;;  %v12229_v24 = vld [vmem:[#allocation33_spill] sm:$0xff]  ;;  %v12230_v55 = vld [vmem:[#allocation35_spill] sm:$0xff] }
 0x15d   :  { %12223 = vst [vmem:[#allocation44_spill] sm:$0xff] %v10118_v15  ;;  %12224 = vst [vmem:[#allocation39_spill] sm:$0xff] %v10120_v0  ;;  %v2822_v21 = vrot.slane %v9679_v3, %v8692_v37  ;;  %v2829_v49 = vrot.slane %v9679_v3, %v8695_v39  ;;  %6665 = vperm.xlu0 %8342, %v5022_v48   ;;  %v10134_v47 = vcombine.low %v2843_v56, %v2850_v22 }
 0x15e   :  { %12225 = vst [vmem:[#allocation40_spill] sm:$0xff] %v10126_v17  ;;  %v10136_v61 = vcombine.low %v2857_v32, %v2864_v7  ;;  %v2836_v2 = vrot.slane %v9679_v3, %v8698_v40  ;;  %v4937_v20 = vcombine.low %v4929_v29, %v4936_v59  ;;  %v2899_v45 = vrot.slane %v9712_v62, %v8689_v36  ;;  %v10156_v59 = vpop.xlane.xlu1 %579  ;;  %v10159_v28 = vpop.xlane.xlu0 %576 }
 0x15f   :  { %12226 = vst [vmem:[#allocation9_spill] sm:$0xff] %v10134_v47  ;;  %v5116_v30 = vrot.slane %v12228_v52, %v8713_v50  ;;  %v5123_v31 = vrot.slane %v12229_v24, %v8713_v50  ;;  %v4963_v48 = vrot.slane %v12230_v55, %v8713_v50  ;;  %v2906_v56 = vrot.slane %v9712_v62, %v8692_v37  ;;  %v12233_v24 = vld [vmem:[#allocation46_spill] sm:$0xff] }
 0x160   :  { %12227 = vst [vmem:[#allocation55_spill] sm:$0xff] %v10136_v61  ;;  %v2913_v25 = vrot.slane %v9712_v62, %v8695_v39  ;;  %v2920_v3 = vrot.slane %v9712_v62, %v8698_v40  ;;  %v2871_v29 = vrot.slane %v9715_v51, %v8689_v36  ;;  %6638 = vperm.xlu1 %8343, %v10042_v58   ;;  %v12231_v62 = vld [vmem:[#allocation60_spill] sm:$0xff] }
 0x161   :  { %v2878_v13 = vrot.slane %v9715_v51, %v8692_v37  ;;  %v2885_v5 = vrot.slane %v9715_v51, %v8695_v39  ;;  %v2892_v27 = vrot.slane %v9715_v51, %v8698_v40  ;;  %6671 = vperm.xlu0 %8342, %v5056_v44   ;;  %v4970_v6 = vrot.slane %v12231_v62, %v8713_v50  ;;  %v12232_v44 = vld [vmem:[#allocation38_spill] sm:$0xff] }
 0x162   :  { %v2955_v32 = vrot.slane %v9752_v1, %v8689_v36  ;;  %v2962_v58 = vrot.slane %v9752_v1, %v8692_v37  ;;  %v2969_v42 = vrot.slane %v9752_v1, %v8695_v39  ;;  %v2976_v22 = vrot.slane %v9752_v1, %v8698_v40  ;;  %v10193_v1 = vpop.xlane.xlu1 %585  ;;  %v10195_v41 = vpop.xlane.xlu0 %582 }
 0x163   :  { %v2927_v7 = vrot.slane %v9755_v33, %v8689_v36  ;;  %v2934_v51 = vrot.slane %v9755_v33, %v8692_v37  ;;  %v5150_v52 = vrot.slane %v12232_v44, %v8713_v50  ;;  %v5157_v55 = vrot.slane %v12233_v24, %v8713_v50  ;;  %v12248_v24 = vld [vmem:[#allocation65_spill] sm:$0xff] }
 0x164   :  { %v10185_v62 = vcombine.low %v2899_v45, %v2906_v56  ;;  %v10187_v61 = vcombine.low %v2913_v25, %v2920_v3  ;;  %v10189_v47 = vcombine.low %v2815_v14, %v2822_v21  ;;  %v10191_v15 = vcombine.low %v2829_v49, %v2836_v2  ;;  %6644 = vperm.xlu1 %8343, %v4903_v19   ;;  %v12243_v25 = vld [vmem:[#allocation61_spill] sm:$0xff] }
 0x165   :  { %v10197_v17 = vcombine.low %v2871_v29, %v2878_v13  ;;  %v10199_v0 = vcombine.low %v2885_v5, %v2892_v27  ;;  %v2941_v44 = vrot.slane %v9755_v33, %v8695_v39  ;;  %6677 = vperm.xlu0 %8342, %v5090_v60   ;;  %v5124_v45 = vcombine.low %v5116_v30, %v5123_v31  ;;  %v12244_v29 = vld [vmem:[#allocation64_spill] sm:$0xff] }
 0x166   :  { %12234 = vst [vmem:[#allocation56_spill] sm:$0xff] %v10185_v62  ;;  %12235 = vst [vmem:[#allocation43_spill] sm:$0xff] %v10187_v61  ;;  %v10203_v56 = vcombine.low %v2955_v32, %v2962_v58  ;;  %v10205_v14 = vcombine.low %v2969_v42, %v2976_v22  ;;  %v2948_v21 = vrot.slane %v9755_v33, %v8698_v40  ;;  %v10225_v5 = vpop.xlane.xlu0 %588  ;;  %v12246_v58 = vld [vmem:[#allocation32_spill] sm:$0xff] }
 0x167   :  { %12236 = vst [vmem:[#allocation42_spill] sm:$0xff] %v10189_v47  ;;  %12237 = vst [vmem:[#allocation33_spill] sm:$0xff] %v10191_v15  ;;  %v4971_v49 = vcombine.low %v4963_v48, %v4970_v6  ;;  %v10209_v19 = vcombine.low %v2927_v7, %v2934_v51  ;;  %v5158_v2 = vcombine.low %v5150_v52, %v5157_v55  ;;  %v10223_v48 = vpop.xlane.xlu1 %591  ;;  %v12247_v7 = vld [vmem:[#allocation48_spill] sm:$0xff] }
 0x168   :  { %12238 = vst [vmem:[#allocation35_spill] sm:$0xff] %v10197_v17  ;;  %12239 = vst [vmem:[#allocation60_spill] sm:$0xff] %v10199_v0  ;;  %v4997_v3 = vrot.slane %v12243_v25, %v8713_v50  ;;  %v5004_v13 = vrot.slane %v12244_v29, %v8713_v50  ;;  %v2983_v60 = vrot.slane %v9791_v8, %v8689_v36  ;;  %6650 = vperm.xlu1 %8343, %v4937_v20  }
 0x169   :  { %12240 = vst [vmem:[#allocation38_spill] sm:$0xff] %v10203_v56  ;;  %12241 = vst [vmem:[#allocation46_spill] sm:$0xff] %v10205_v14  ;;  %v2990_v30 = vrot.slane %v9791_v8, %v8692_v37  ;;  %v2997_v31 = vrot.slane %v9791_v8, %v8695_v39  ;;  %v3004_v33 = vrot.slane %v9791_v8, %v8698_v40  ;;  %6683 = vperm.xlu0 %8342, %v5124_v45   ;;  %v12252_v56 = vld [vmem:[#allocation68_spill] sm:$0xff] }
 0x16a   :  { %12242 = vst [vmem:[#allocation80_spill] sm:$0xff] %v10209_v19  ;;  %12245 = vst [vmem:[#allocation61_spill] sm:$0xff] %v10223_v48  ;;  %v3067_v27 = vrot.slane %v9828_v54, %v8689_v36  ;;  %v5184_v6 = vrot.slane %v9681_v38, %v8713_v50  ;;  %v5191_v32 = vrot.slane %v9690_v4, %v8713_v50  ;;  %v10257_v29 = vpop.xlane.xlu0 %594 }
 0x16b   :  { %v5031_v42 = vrot.slane %v12246_v58, %v8713_v50  ;;  %v3074_v8 = vrot.slane %v9828_v54, %v8692_v37  ;;  %v3081_v20 = vrot.slane %v9828_v54, %v8695_v39  ;;  %v3088_v22 = vrot.slane %v9828_v54, %v8698_v40  ;;  %v10255_v25 = vpop.xlane.xlu1 %597  ;;  %12250 = vst [vmem:[#allocation32_spill] sm:$0xff] %v10257_v29  ;;  %v12251_v58 = vld [vmem:[#allocation67_spill] sm:$0xff] }
 0x16c   :  { %v3039_v51 = vrot.slane %v12247_v7, %v8689_v36  ;;  %v3046_v38 = vrot.slane %v12247_v7, %v8692_v37  ;;  %v3053_v4 = vrot.slane %v12247_v7, %v8695_v39  ;;  %v3060_v52 = vrot.slane %v12247_v7, %v8698_v40  ;;  %12249 = vst [vmem:[#allocation64_spill] sm:$0xff] %v10255_v25 }
 0x16d   :  { %v5038_v55 = vrot.slane %v12248_v24, %v8713_v50  ;;  %v3123_v45 = vrot.slane %v9866_v10, %v8689_v36  ;;  %v3130_v54 = vrot.slane %v9866_v10, %v8692_v37  ;;  %6656 = vperm.xlu1 %8343, %v4971_v49   ;;  %v5218_v14 = vrot.slane %v12251_v58, %v8713_v50 }
 0x16e   :  { %v5225_v7 = vrot.slane %v12252_v56, %v8713_v50  ;;  %v3137_v24 = vrot.slane %v9866_v10, %v8695_v39  ;;  %v3144_v61 = vrot.slane %v9866_v10, %v8698_v40  ;;  %v3095_v62 = vrot.slane %v9869_v12, %v8689_v36  ;;  %6689 = vperm.xlu0 %8342, %v5158_v2   ;;  %v10289_v2 = vpop.xlane.xlu0 %600 }
 0x16f   :  { %v3102_v49 = vrot.slane %v9869_v12, %v8692_v37  ;;  %v10271_v19 = vcombine.low %v2941_v44, %v2948_v21  ;;  %v10273_v0 = vcombine.low %v2983_v60, %v2990_v30  ;;  %v10275_v58 = vcombine.low %v2997_v31, %v3004_v33  ;;  %v10287_v21 = vpop.xlane.xlu1 %603  ;;  %v12256_v31 = vld [vmem:[#allocation15_spill] sm:$0xff] }
 0x170   :  { %v5005_v56 = vcombine.low %v4997_v3, %v5004_v13  ;;  %v5754_v17 = vcombine.low %v3067_v27, %v3074_v8  ;;  %v5755_v15 = vcombine.low %v3081_v20, %v3088_v22  ;;  %v10277_v47 = vcombine.low %v3039_v51, %v3046_v38  ;;  %v12257_v27 = vld [vmem:[#allocation41_spill] sm:$0xff] }
 0x171   :  { %12253 = vst [vmem:[#allocation48_spill] sm:$0xff] %v10271_v19  ;;  %12254 = vst [vmem:[#allocation65_spill] sm:$0xff] %v10273_v0  ;;  %v5192_v29 = vcombine.low %v5184_v6, %v5191_v32  ;;  %v10279_v10 = vcombine.low %v3123_v45, %v3130_v54  ;;  %v10281_v25 = vcombine.low %v3053_v4, %v3060_v52  ;;  %v12260_v45 = vld [vmem:[#allocation8_spill] sm:$0xff] }
 0x172   :  { %12255 = vst [vmem:[#allocation67_spill] sm:$0xff] %v10275_v58  ;;  %v3109_v48 = vrot.slane %v9869_v12, %v8695_v39  ;;  %v3116_v44 = vrot.slane %v9869_v12, %v8698_v40  ;;  %6662 = vperm.xlu1 %8343, %v5005_v56   ;;  %v10291_v3 = vcombine.low %v3137_v24, %v3144_v61  ;;  %v10321_v51 = vpop.xlane.xlu0 %606 }
 0x173   :  { %v10293_v13 = vcombine.low %v3095_v62, %v3102_v49  ;;  %6695 = vperm.xlu0 %8342, %v5192_v29   ;;  %v5039_v60 = vcombine.low %v5031_v42, %v5038_v55  ;;  %v5226_v30 = vcombine.low %v5218_v14, %v5225_v7  ;;  %v5065_v33 = vrot.slane %v12256_v31, %v8713_v50  ;;  %v10319_v22 = vpop.xlane.xlu1 %609  ;;  %v12261_v29 = vld [vmem:[#allocation36_spill] sm:$0xff] }
 0x174   :  { %v5072_v6 = vrot.slane %v12257_v27, %v8713_v50  ;;  %v5490_v12 = vrot.slane %v9994_v26, %v8713_v50  ;;  %v5497_v32 = vrot.slane %v10023_v23, %v8713_v50  ;;  %v3515_v61 = vrot.slane %v10122_v9, %v8689_v36  ;;  %12258 = vst [vmem:[#allocation68_spill] sm:$0xff] %v10319_v22 }
 0x175   :  { %v3522_v62 = vrot.slane %v10122_v9, %v8692_v37  ;;  %v3529_v14 = vrot.slane %v10122_v9, %v8695_v39  ;;  %v3536_v42 = vrot.slane %v10122_v9, %v8698_v40  ;;  %v3179_v8 = vrot.slane %v9904_v34, %v8689_v36  ;;  %12259 = vst [vmem:[#allocation15_spill] sm:$0xff] %v10321_v51 }
 0x176   :  { %v3186_v26 = vrot.slane %v9904_v34, %v8692_v37  ;;  %v3193_v23 = vrot.slane %v9904_v34, %v8695_v39  ;;  %v10317_v20 = vcombine.low %v3109_v48, %v3116_v44  ;;  %6668 = vperm.xlu1 %8343, %v5039_v60   ;;  %v3200_v38 = vrot.slane %v9904_v34, %v8698_v40  ;;  %v10347_v27 = vpop.xlane.xlu0 %612 }
 0x177   :  { %v3151_v9 = vrot.slane %v9907_v18, %v8689_v36  ;;  %v3158_v4 = vrot.slane %v9907_v18, %v8692_v37  ;;  %v3165_v52 = vrot.slane %v9907_v18, %v8695_v39  ;;  %6701 = vperm.xlu0 %8342, %v5226_v30   ;;  %v5073_v48 = vcombine.low %v5065_v33, %v5072_v6  ;;  %v10345_v33 = vpop.xlane.xlu1 %615 }
 0x178   :  { %v5498_v55 = vcombine.low %v5490_v12, %v5497_v32  ;;  %v5099_v54 = vrot.slane %v12260_v45, %v8713_v50  ;;  %v5106_v7 = vrot.slane %v12261_v29, %v8713_v50  ;;  %v6026_v24 = vcombine.low %v3515_v61, %v3522_v62  ;;  %12262 = vst [vmem:[#allocation41_spill] sm:$0xff] %v10345_v33  ;;  %v12264_v61 = vld [vmem:[#allocation45_spill] sm:$0xff] }
 0x179   :  { %v6027_v34 = vcombine.low %v3529_v14, %v3536_v42  ;;  %v5762_v49 = vrot.slane %v5754_v17, %v8713_v50  ;;  %v5769_v56 = vrot.slane %v5755_v15, %v8713_v50  ;;  %v10337_v44 = vcombine.low %v3179_v8, %v3186_v26  ;;  %12263 = vst [vmem:[#allocation8_spill] sm:$0xff] %v10347_v27  ;;  %v12265_v14 = vld [vmem:[#allocation10_spill] sm:$0xff] }
 0x17a   :  { %v3235_v60 = vrot.slane %v9942_v11, %v8689_v36  ;;  %v3242_v30 = vrot.slane %v9942_v11, %v8692_v37  ;;  %v3172_v31 = vrot.slane %v9907_v18, %v8698_v40  ;;  %6674 = vperm.xlu1 %8343, %v5073_v48   ;;  %v10349_v6 = vcombine.low %v3193_v23, %v3200_v38  ;;  %v10375_v45 = vpop.xlane.xlu0 %618  ;;  %v12272_v48 = vld [vmem:[#allocation77_spill] sm:$0xff] }
 0x17b   :  { %v3249_v17 = vrot.slane %v9942_v11, %v8695_v39  ;;  %v3256_v15 = vrot.slane %v9942_v11, %v8698_v40  ;;  %v10355_v12 = vcombine.low %v3151_v9, %v3158_v4  ;;  %6749 = vperm.xlu0 %8342, %v5498_v55   ;;  %v3207_v32 = vrot.slane %v9945_v35, %v8689_v36  ;;  %v622_v55 = vpop.xlane.xlu1 %621 }
 0x17c   :  { %v5107_v18 = vcombine.low %v5099_v54, %v5106_v7  ;;  %v5133_v62 = vrot.slane %v12264_v61, %v8713_v50  ;;  %v5140_v42 = vrot.slane %v12265_v14, %v8713_v50  ;;  %v3214_v8 = vrot.slane %v9945_v35, %v8692_v37 }
 0x17d   :  { %v5770_v26 = vcombine.low %v5762_v49, %v5769_v56  ;;  %v6034_v23 = vrot.slane %v6026_v24, %v8713_v50  ;;  %v6041_v11 = vrot.slane %v6027_v34, %v8713_v50  ;;  %v10367_v38 = vcombine.low %v3235_v60, %v3242_v30  ;;  %v12267_v49 = vld [vmem:[#allocation18_spill] sm:$0xff] }
 0x17e   :  { %v10369_v9 = vcombine.low %v3165_v52, %v3172_v31  ;;  %6680 = vperm.xlu1 %8343, %v5107_v18   ;;  %v3963_v54 = vrot.slane %v622_v55, %v8689_v36  ;;  %v3970_v29 = vrot.slane %v622_v55, %v8692_v37  ;;  %v3977_v7 = vrot.slane %v622_v55, %v8695_v39  ;;  %v12268_v60 = vld [vmem:[#allocation66_spill] sm:$0xff] }
 0x17f   :  { %v3984_v24 = vrot.slane %v622_v55, %v8698_v40  ;;  %6797 = vperm.xlu0 %8342, %v5770_v26   ;;  %v10381_v52 = vcombine.low %v3249_v17, %v3256_v15  ;;  %v5141_v34 = vcombine.low %v5133_v62, %v5140_v42  ;;  %v5167_v56 = vrot.slane %v12267_v49, %v8713_v50  ;;  %v10397_v62 = vpop.xlane.xlu1 %627 }
 0x180   :  { %v5174_v30 = vrot.slane %v12268_v60, %v8713_v50  ;;  %v10387_v31 = vcombine.low %v3207_v32, %v3214_v8  ;;  %v6298_v18 = vcombine.low %v3963_v54, %v3970_v29  ;;  %v6042_v14 = vcombine.low %v6034_v23, %v6041_v11  ;;  %v10399_v32 = vpop.xlane.xlu0 %624  ;;  %v12270_v54 = vld [vmem:[#allocation69_spill] sm:$0xff] }
 0x181   :  { %12266 = vst [vmem:[#allocation36_spill] sm:$0xff] %v10381_v52  ;;  %v6299_v61 = vcombine.low %v3977_v7, %v3984_v24  ;;  %v3291_v4 = vrot.slane %v9976_v53, %v8689_v36  ;;  %v3298_v26 = vrot.slane %v9976_v53, %v8692_v37  ;;  %v3305_v17 = vrot.slane %v9976_v53, %v8695_v39  ;;  %v12271_v7 = vld [vmem:[#allocation70_spill] sm:$0xff] }
 0x182   :  { %12269 = vst [vmem:[#allocation45_spill] sm:$0xff] %v10387_v31  ;;  %v3312_v15 = vrot.slane %v9976_v53, %v8698_v40  ;;  %6686 = vperm.xlu1 %8343, %v5141_v34   ;;  %v3543_v42 = vrot.slane %v10159_v28, %v8689_v36  ;;  %v3550_v8 = vrot.slane %v10159_v28, %v8692_v37  ;;  %v12274_v31 = vld [vmem:[#allocation76_spill] sm:$0xff] }
 0x183   :  { %v3557_v23 = vrot.slane %v10159_v28, %v8695_v39  ;;  %v3564_v11 = vrot.slane %v10159_v28, %v8698_v40  ;;  %6845 = vperm.xlu0 %8342, %v6042_v14   ;;  %v3263_v53 = vrot.slane %v9979_v43, %v8689_v36  ;;  %v5175_v55 = vcombine.low %v5167_v56, %v5174_v30  ;;  %v10425_v30 = vpop.xlane.xlu1 %633 }
 0x184   :  { %v5201_v29 = vrot.slane %v12270_v54, %v8713_v50  ;;  %v5208_v24 = vrot.slane %v12271_v7, %v8713_v50  ;;  %v3270_v34 = vrot.slane %v9979_v43, %v8692_v37  ;;  %v3277_v49 = vrot.slane %v9979_v43, %v8695_v39  ;;  %v10427_v54 = vpop.xlane.xlu0 %630 }
 0x185   :  { %v6306_v60 = vrot.slane %v6298_v18, %v8713_v50  ;;  %v6313_v28 = vrot.slane %v6299_v61, %v8713_v50  ;;  %v3487_v14 = vrot.slane %v10124_v63, %v8689_v36  ;;  %v3494_v56 = vrot.slane %v10124_v63, %v8692_v37 }
 0x186   :  { %6692 = vperm.xlu1 %8343, %v5175_v55   ;;  %v5507_v7 = vrot.slane %v10044_v46, %v8713_v50  ;;  %v5514_v33 = vrot.slane %v12272_v48, %v8713_v50  ;;  %v3501_v18 = vrot.slane %v10124_v63, %v8695_v39  ;;  %v3508_v61 = vrot.slane %v10124_v63, %v8698_v40  ;;  %v12273_v55 = vld [vmem:[#allocation74_spill] sm:$0xff] }
 0x187   :  { %v6043_v58 = vcombine.low %v3543_v42, %v3550_v8  ;;  %v6044_v0 = vcombine.low %v3557_v23, %v3564_v11  ;;  %v6314_v27 = vcombine.low %v6306_v60, %v6313_v28  ;;  %v5209_v22 = vcombine.low %v5201_v29, %v5208_v24 }
 0x188   :  { %v5473_v19 = vrot.slane %v12273_v55, %v8713_v50  ;;  %v5480_v51 = vrot.slane %v12274_v31, %v8713_v50  ;;  %v3284_v46 = vrot.slane %v9979_v43, %v8698_v40  ;;  %v3935_v48 = vrot.slane %v10375_v45, %v8689_v36  ;;  %v10455_v43 = vpop.xlane.xlu1 %639  ;;  %v10457_v23 = vpop.xlane.xlu0 %636 }
 0x189   :  { %v5745_v52 = vrot.slane %v10277_v47, %v8713_v50  ;;  %v5752_v63 = vrot.slane %v10281_v25, %v8713_v50  ;;  %v3942_v42 = vrot.slane %v10375_v45, %v8692_v37  ;;  %v3949_v8 = vrot.slane %v10375_v45, %v8695_v39  ;;  %6893 = vperm.xlu0 %8342, %v6314_v27  }
 0x18a   :  { %v3956_v31 = vrot.slane %v10375_v45, %v8698_v40  ;;  %6698 = vperm.xlu1 %8343, %v5209_v22   ;;  %v6009_v11 = vcombine.low %v3487_v14, %v3494_v56  ;;  %v6010_v47 = vcombine.low %v3501_v18, %v3508_v61  ;;  %v6051_v29 = vrot.slane %v6043_v58, %v8713_v50 }
 0x18b   :  { %v6058_v25 = vrot.slane %v6044_v0, %v8713_v50  ;;  %v10461_v24 = vcombine.low %v3291_v4, %v3298_v26  ;;  %v12275_v60 = vrot.slane %v9945_v35, %v8698_v40  ;;  %v12276_v45 = vrot.slane %v9945_v35, %v8695_v39  ;;  %v12279_v0 = vld [vmem:[#allocation14_spill] sm:$0xff] }
 0x18c   :  { %v5515_v28 = vcombine.low %v5507_v7, %v5514_v33  ;;  %v5481_v22 = vcombine.low %v5473_v19, %v5480_v51  ;;  %v10471_v55 = vcombine.low %v3305_v17, %v3312_v15  ;;  %v10473_v14 = vcombine.low %v3263_v53, %v3270_v34  ;;  %v10479_v18 = vpop.xlane.xlu1 %645  ;;  %v10481_v61 = vpop.xlane.xlu0 %642  ;;  %v12280_v19 = vld [vmem:[#allocation19_spill] sm:$0xff]  ;;  %v12281_v7 = vld [vmem:[#allocation29_spill] sm:$0xff] }
 0x18d   :  { %v10469_v27 = vcombine.low %v12276_v45, %v12275_v60  ;;  %v10475_v56 = vcombine.low %v3277_v49, %v3284_v46  ;;  %v5252_v58 = vrot.slane %v12279_v0, %v8713_v50  ;;  %v6281_v4 = vcombine.low %v3935_v48, %v3942_v42 }
 0x18e   :  { %12277 = vst [vmem:[#allocation10_spill] sm:$0xff] %v10473_v14  ;;  %v6282_v26 = vcombine.low %v3949_v8, %v3956_v31  ;;  %6752 = vperm.xlu0 %8342, %v5515_v28   ;;  %6746 = vperm.xlu1 %8343, %v5481_v22   ;;  %v5753_v35 = vcombine.low %v5745_v52, %v5752_v63  ;;  %v12282_v8 = vld [vmem:[#allocation30_spill] sm:$0xff] }
 0x18f   :  { %12278 = vst [vmem:[#allocation18_spill] sm:$0xff] %v10475_v56  ;;  %v6059_v33 = vcombine.low %v6051_v29, %v6058_v25  ;;  %v5259_v51 = vrot.slane %v12280_v19, %v8713_v50  ;;  %v6017_v17 = vrot.slane %v6009_v11, %v8713_v50  ;;  %v6024_v15 = vrot.slane %v6010_v47, %v8713_v50 }
 0x190   :  { %v4019_v53 = vrot.slane %v10397_v62, %v8689_v36  ;;  %v4026_v34 = vrot.slane %v10397_v62, %v8692_v37  ;;  %v4033_v49 = vrot.slane %v10397_v62, %v8695_v39  ;;  %v4040_v52 = vrot.slane %v10397_v62, %v8698_v40  ;;  %v10505_v11 = vpop.xlane.xlu1 %651  ;;  %v10507_v62 = vpop.xlane.xlu0 %648 }
 0x191   :  { %v3347_v46 = vrot.slane %v12281_v7, %v8689_v36  ;;  %v3354_v48 = vrot.slane %v12281_v7, %v8692_v37  ;;  %v3361_v63 = vrot.slane %v12281_v7, %v8695_v39  ;;  %v3368_v42 = vrot.slane %v12281_v7, %v8698_v40 }
 0x192   :  { %v3319_v31 = vrot.slane %v12282_v8, %v8689_v36  ;;  %6848 = vperm.xlu0 %8342, %v6059_v33   ;;  %6794 = vperm.xlu1 %8343, %v5753_v35   ;;  %v6289_v47 = vrot.slane %v6281_v4, %v8713_v50  ;;  %v6296_v29 = vrot.slane %v6282_v26, %v8713_v50 }
 0x193   :  { %v3326_v25 = vrot.slane %v12282_v8, %v8692_v37  ;;  %v3333_v60 = vrot.slane %v12282_v8, %v8695_v39  ;;  %v5796_v45 = vrot.slane %v10279_v10, %v8713_v50  ;;  %v5803_v28 = vrot.slane %v10291_v3, %v8713_v50 }
 0x194   :  { %v6332_v22 = vcombine.low %v4019_v53, %v4026_v34  ;;  %v6333_v0 = vcombine.low %v4033_v49, %v4040_v52  ;;  %v5260_v35 = vcombine.low %v5252_v58, %v5259_v51  ;;  %v6025_v33 = vcombine.low %v6017_v17, %v6024_v15  ;;  %v10529_v3 = vpop.xlane.xlu1 %657  ;;  %v10531_v51 = vpop.xlane.xlu0 %654  ;;  %v12285_v17 = vld [vmem:[#allocation49_spill] sm:$0xff]  ;;  %v12286_v52 = vld [vmem:[#allocation24_spill] sm:$0xff] }
 0x195   :  { %v3340_v4 = vrot.slane %v12282_v8, %v8698_v40  ;;  %v3599_v26 = vrot.slane %v10195_v41, %v8689_v36  ;;  %v3606_v19 = vrot.slane %v10195_v41, %v8692_v37  ;;  %v3613_v7 = vrot.slane %v10195_v41, %v8695_v39  ;;  %12283 = vst [vmem:[#allocation66_spill] sm:$0xff] %v10529_v3 }
 0x196   :  { %v3620_v10 = vrot.slane %v10195_v41, %v8698_v40  ;;  %6707 = vperm.xlu0 %8342, %v5260_v35   ;;  %6842 = vperm.xlu1 %8343, %v6025_v33   ;;  %v6297_v58 = vcombine.low %v6289_v47, %v6296_v29  ;;  %12284 = vst [vmem:[#allocation69_spill] sm:$0xff] %v10531_v51 }
 0x197   :  { %v5235_v15 = vrot.slane %v12285_v17, %v8713_v50  ;;  %v3991_v53 = vrot.slane %v10399_v32, %v8689_v36  ;;  %v3998_v34 = vrot.slane %v10399_v32, %v8692_v37  ;;  %v5804_v49 = vcombine.low %v5796_v45, %v5803_v28  ;;  %v12287_v28 = vld [vmem:[#allocation78_spill] sm:$0xff] }
 0x198   :  { %v5242_v41 = vrot.slane %v12286_v52, %v8713_v50  ;;  %v4005_v8 = vrot.slane %v10399_v32, %v8695_v39  ;;  %v4012_v47 = vrot.slane %v10399_v32, %v8698_v40  ;;  %v6340_v29 = vrot.slane %v6332_v22, %v8713_v50  ;;  %v10557_v14 = vpop.xlane.xlu1 %663  ;;  %v10567_v22 = vpop.xlane.xlu0 %660 }
 0x199   :  { %v6347_v35 = vrot.slane %v6333_v0, %v8713_v50  ;;  %v10547_v33 = vcombine.low %v3347_v46, %v3354_v48  ;;  %v10549_v17 = vcombine.low %v3361_v63, %v3368_v42  ;;  %v10551_v51 = vcombine.low %v3319_v31, %v3326_v25  ;;  %12288 = vst [vmem:[#allocation70_spill] sm:$0xff] %v10557_v14 }
 0x19a   :  { %v10553_v45 = vcombine.low %v3333_v60, %v3340_v4  ;;  %v3403_v52 = vrot.slane %v12287_v28, %v8689_v36  ;;  %v6077_v3 = vcombine.low %v3599_v26, %v3606_v19  ;;  %v6078_v56 = vcombine.low %v3613_v7, %v3620_v10  ;;  %6803 = vperm.xlu0 %8342, %v5804_v49   ;;  %v12291_v7 = vld [vmem:[#allocation79_spill] sm:$0xff] }
 0x19b   :  { %6890 = vperm.xlu1 %8343, %v6297_v58   ;;  %v5541_v32 = vrot.slane %v10114_v57, %v8713_v50  ;;  %v5548_v46 = vrot.slane %v10116_v16, %v8713_v50  ;;  %v5779_v48 = vrot.slane %v10293_v13, %v8713_v50  ;;  %v5786_v63 = vrot.slane %v10317_v20, %v8713_v50 }
 0x19c   :  { %v6315_v42 = vcombine.low %v3991_v53, %v3998_v34  ;;  %v6316_v31 = vcombine.low %v4005_v8, %v4012_v47  ;;  %v6348_v25 = vcombine.low %v6340_v29, %v6347_v35  ;;  %v5243_v60 = vcombine.low %v5235_v15, %v5242_v41  ;;  %12289 = vst [vmem:[#allocation77_spill] sm:$0xff] %v10567_v22  ;;  %v10583_v19 = vpop.permute.xlu1 %6557 }
 0x19d   :  { %v3410_v0 = vrot.slane %v12287_v28, %v8692_v37  ;;  %v3417_v57 = vrot.slane %v12287_v28, %v8695_v39  ;;  %v3571_v16 = vrot.slane %v10156_v59, %v8689_v36  ;;  %v3578_v13 = vrot.slane %v10156_v59, %v8692_v37  ;;  %12290 = vst [vmem:[#allocation74_spill] sm:$0xff] %v10583_v19 }
 0x19e   :  { %v3424_v20 = vrot.slane %v12287_v28, %v8698_v40  ;;  %v3585_v4 = vrot.slane %v10156_v59, %v8695_v39  ;;  %v3592_v26 = vrot.slane %v10156_v59, %v8698_v40  ;;  %6899 = vperm.xlu0 %8342, %v6348_v25   ;;  %v3375_v10 = vrot.slane %v12291_v7, %v8689_v36 }
 0x19f   :  { %6704 = vperm.xlu1 %8343, %v5243_v60   ;;  %v3382_v58 = vrot.slane %v12291_v7, %v8692_v37  ;;  %v5549_v15 = vcombine.low %v5541_v32, %v5548_v46  ;;  %v5787_v53 = vcombine.low %v5779_v48, %v5786_v63  ;;  %v6085_v34 = vrot.slane %v6077_v3, %v8713_v50  ;;  %v12294_v63 = vld [vmem:[#allocation25_spill] sm:$0xff] }
 0x1a0   :  { %v6092_v49 = vrot.slane %v6078_v56, %v8713_v50  ;;  %v6323_v41 = vrot.slane %v6315_v42, %v8713_v50  ;;  %v6330_v59 = vrot.slane %v6316_v31, %v8713_v50  ;;  %v10593_v8 = vcombine.low %v3403_v52, %v3410_v0  ;;  %v10603_v3 = vpop.permute.xlu1 %6560  ;;  %v10605_v52 = vpop.permute.xlu0 %6554  ;;  %v12295_v31 = vld [vmem:[#allocation50_spill] sm:$0xff] }
 0x1a1   :  { %v3389_v47 = vrot.slane %v12291_v7, %v8695_v39  ;;  %v3396_v29 = vrot.slane %v12291_v7, %v8698_v40  ;;  %v6060_v35 = vcombine.low %v3571_v16, %v3578_v13  ;;  %v6061_v28 = vcombine.low %v3585_v4, %v3592_v26  ;;  %12292 = vst [vmem:[#allocation76_spill] sm:$0xff] %v10603_v3  ;;  %v12296_v16 = vld [vmem:[#allocation31_spill] sm:$0xff] }
 0x1a2   :  { %v4075_v32 = vrot.slane %v10425_v30, %v8689_v36  ;;  %v4082_v56 = vrot.slane %v10425_v30, %v8692_v37  ;;  %6758 = vperm.xlu0 %8342, %v5549_v15   ;;  %12293 = vst [vmem:[#allocation14_spill] sm:$0xff] %v10605_v52  ;;  %v4089_v46 = vrot.slane %v10425_v30, %v8695_v39  ;;  %v12297_v4 = vld [vmem:[#allocation75_spill] sm:$0xff]  ;;  %v12311_v52 = vld [vmem:[#allocation40_spill] sm:$0xff] }
 0x1a3   :  { %6800 = vperm.xlu1 %8343, %v5787_v53   ;;  %v4096_v48 = vrot.slane %v10425_v30, %v8698_v40  ;;  %v5286_v42 = vrot.slane %v12294_v63, %v8713_v50  ;;  %v5293_v25 = vrot.slane %v12295_v31, %v8713_v50  ;;  %v6093_v60 = vcombine.low %v6085_v34, %v6092_v49  ;;  %v12298_v15 = vld [vmem:[#allocation7_spill] sm:$0xff]  ;;  %v12306_v53 = vld [vmem:[#allocation21_spill] sm:$0xff] }
 0x1a4   :  { %v6331_v0 = vcombine.low %v6323_v41, %v6330_v59  ;;  %v5524_v13 = vrot.slane %v12296_v16, %v8713_v50  ;;  %v5531_v26 = vrot.slane %v12297_v4, %v8713_v50  ;;  %v10619_v7 = vcombine.low %v3417_v57, %v3424_v20  ;;  %v10633_v41 = vpop.permute.xlu1 %6563  ;;  %v10635_v57 = vpop.permute.xlu0 %6581 }
 0x1a5   :  { %v10623_v30 = vcombine.low %v3375_v10, %v3382_v58  ;;  %v10625_v3 = vcombine.low %v3389_v47, %v3396_v29  ;;  %v3627_v34 = vrot.slane %v10193_v1, %v8689_v36  ;;  %v3634_v49 = vrot.slane %v10193_v1, %v8692_v37  ;;  %12301 = vst [vmem:[#allocation30_spill] sm:$0xff] %v10633_v41 }
 0x1a6   :  { %6854 = vperm.xlu0 %8342, %v6093_v60   ;;  %12302 = vst [vmem:[#allocation49_spill] sm:$0xff] %v10635_v57  ;;  %v6366_v20 = vcombine.low %v4075_v32, %v4082_v56  ;;  %v6367_v10 = vcombine.low %v4089_v46, %v4096_v48  ;;  %v5294_v58 = vcombine.low %v5286_v42, %v5293_v25 }
 0x1a7   :  { %12299 = vst [vmem:[#allocation19_spill] sm:$0xff] %v10623_v30  ;;  %12300 = vst [vmem:[#allocation29_spill] sm:$0xff] %v10625_v3  ;;  %6896 = vperm.xlu1 %8343, %v6331_v0   ;;  %v5830_v59 = vrot.slane %v10337_v44, %v8713_v50  ;;  %v5532_v47 = vcombine.low %v5524_v13, %v5531_v26  ;;  %v5837_v29 = vrot.slane %v10349_v6, %v8713_v50  ;;  %v12305_v26 = vld [vmem:[#allocation26_spill] sm:$0xff] }
 0x1a8   :  { %v6068_v31 = vrot.slane %v6060_v35, %v8713_v50  ;;  %v6075_v16 = vrot.slane %v6061_v28, %v8713_v50  ;;  %v3641_v60 = vrot.slane %v10193_v1, %v8695_v39  ;;  %v3655_v0 = vrot.slane %v10225_v5, %v8689_v36  ;;  %v10657_v28 = vpop.permute.xlu1 %6566  ;;  %v10659_v46 = vpop.permute.xlu0 %6587 }
 0x1a9   :  { %v3662_v32 = vrot.slane %v10225_v5, %v8692_v37  ;;  %v3669_v44 = vrot.slane %v10225_v5, %v8695_v39  ;;  %v3676_v56 = vrot.slane %v10225_v5, %v8698_v40  ;;  %v4047_v6 = vrot.slane %v10427_v54, %v8689_v36  ;;  %12303 = vst [vmem:[#allocation24_spill] sm:$0xff] %v10657_v28  ;;  %v12310_v28 = vld [vmem:[#allocation39_spill] sm:$0xff] }
 0x1aa   :  { %v4054_v35 = vrot.slane %v10427_v54, %v8692_v37  ;;  %6713 = vperm.xlu0 %8342, %v5294_v58   ;;  %12304 = vst [vmem:[#allocation78_spill] sm:$0xff] %v10659_v46  ;;  %v4061_v48 = vrot.slane %v10427_v54, %v8695_v39  ;;  %v4068_v42 = vrot.slane %v10427_v54, %v8698_v40  ;;  %v12307_v46 = vld [vmem:[#allocation61_spill] sm:$0xff] }
 0x1ab   :  { %6755 = vperm.xlu1 %8343, %v5532_v47   ;;  %v6374_v5 = vrot.slane %v6366_v20, %v8713_v50  ;;  %v6381_v25 = vrot.slane %v6367_v10, %v8713_v50  ;;  %v5838_v13 = vcombine.low %v5830_v59, %v5837_v29  ;;  %v6076_v4 = vcombine.low %v6068_v31, %v6075_v16 }
 0x1ac   :  { %v5269_v58 = vrot.slane %v12305_v26, %v8713_v50  ;;  %v5276_v47 = vrot.slane %v12306_v53, %v8713_v50  ;;  %v3648_v63 = vrot.slane %v10193_v1, %v8698_v40  ;;  %v3683_v57 = vrot.slane %v12307_v46, %v8689_v36  ;;  %v10681_v31 = vpop.permute.xlu1 %6569  ;;  %v10683_v53 = vpop.permute.xlu0 %6593 }
 0x1ad   :  { %v3690_v54 = vrot.slane %v12307_v46, %v8692_v37  ;;  %v3697_v20 = vrot.slane %v12307_v46, %v8695_v39  ;;  %v3704_v10 = vrot.slane %v12307_v46, %v8698_v40  ;;  %v6111_v59 = vcombine.low %v3655_v0, %v3662_v32  ;;  %12308 = vst [vmem:[#allocation79_spill] sm:$0xff] %v10681_v31 }
 0x1ae   :  { %v6112_v29 = vcombine.low %v3669_v44, %v3676_v56  ;;  %6809 = vperm.xlu0 %8342, %v5838_v13   ;;  %12309 = vst [vmem:[#allocation25_spill] sm:$0xff] %v10683_v53  ;;  %v6349_v1 = vcombine.low %v4047_v6, %v4054_v35  ;;  %v6350_v16 = vcombine.low %v4061_v48, %v4068_v42  ;;  %v12312_v6 = vld [vmem:[#allocation64_spill] sm:$0xff] }
 0x1af   :  { %6851 = vperm.xlu1 %8343, %v6076_v4   ;;  %v6382_v26 = vcombine.low %v6374_v5, %v6381_v25  ;;  %v5575_v41 = vrot.slane %v12310_v28, %v8713_v50  ;;  %v5277_v19 = vcombine.low %v5269_v58, %v5276_v47  ;;  %v5582_v22 = vrot.slane %v12311_v52, %v8713_v50  ;;  %v12315_v42 = vld [vmem:[#allocation32_spill] sm:$0xff] }
 0x1b0   :  { %v5813_v0 = vrot.slane %v10355_v12, %v8713_v50  ;;  %v5820_v32 = vrot.slane %v10369_v9, %v8713_v50  ;;  %v10693_v44 = vcombine.low %v3627_v34, %v3634_v49  ;;  %v10695_v56 = vcombine.low %v3641_v60, %v3648_v63  ;;  %v10707_v9 = vpop.permute.xlu1 %6572  ;;  %v10709_v63 = vpop.permute.xlu0 %6599 }
 0x1b1   :  { %v3739_v35 = vrot.slane %v12312_v6, %v8689_v36  ;;  %v3746_v28 = vrot.slane %v12312_v6, %v8692_v37  ;;  %v10701_v46 = vcombine.low %v3683_v57, %v3690_v54  ;;  %v3753_v52 = vrot.slane %v12312_v6, %v8695_v39  ;;  %12313 = vst [vmem:[#allocation50_spill] sm:$0xff] %v10707_v9 }
 0x1b2   :  { %v3760_v12 = vrot.slane %v12312_v6, %v8698_v40  ;;  %6905 = vperm.xlu0 %8342, %v6382_v26   ;;  %12314 = vst [vmem:[#allocation31_spill] sm:$0xff] %v10709_v63  ;;  %v6119_v34 = vrot.slane %v6111_v59, %v8713_v50  ;;  %v6126_v49 = vrot.slane %v6112_v29, %v8713_v50  ;;  %v12317_v26 = vld [vmem:[#allocation22_spill] sm:$0xff] }
 0x1b3   :  { %6710 = vperm.xlu1 %8343, %v5277_v19   ;;  %v6357_v60 = vrot.slane %v6349_v1, %v8713_v50  ;;  %v6364_v57 = vrot.slane %v6350_v16, %v8713_v50  ;;  %v10715_v48 = vcombine.low %v3697_v20, %v3704_v10  ;;  %v3711_v5 = vrot.slane %v12315_v42, %v8689_v36 }
 0x1b4   :  { %v5583_v25 = vcombine.low %v5575_v41, %v5582_v22  ;;  %v5821_v13 = vcombine.low %v5813_v0, %v5820_v32  ;;  %v10719_v4 = vcombine.low %v3739_v35, %v3746_v28  ;;  %v3718_v19 = vrot.slane %v12315_v42, %v8692_v37  ;;  %v10733_v41 = vpop.permute.xlu1 %6575  ;;  %v10735_v10 = vpop.permute.xlu0 %6605  ;;  %v12318_v32 = vld [vmem:[#allocation11_spill] sm:$0xff]  ;;  %v12319_v35 = vld [vmem:[#allocation62_spill] sm:$0xff] }
 0x1b5   :  { %v3725_v58 = vrot.slane %v12315_v42, %v8695_v39  ;;  %v3732_v47 = vrot.slane %v12315_v42, %v8698_v40  ;;  %v10727_v54 = vcombine.low %v3753_v52, %v3760_v12  ;;  %v4131_v20 = vrot.slane %v10455_v43, %v8689_v36  ;;  %12316 = vst [vmem:[#allocation75_spill] sm:$0xff] %v10733_v41  ;;  %v12320_v52 = vld [vmem:[#allocation63_spill] sm:$0xff] }
 0x1b6   :  { %v4138_v22 = vrot.slane %v10455_v43, %v8692_v37  ;;  %6764 = vperm.xlu0 %8342, %v5583_v25   ;;  %v4145_v59 = vrot.slane %v10455_v43, %v8695_v39  ;;  %v4152_v29 = vrot.slane %v10455_v43, %v8698_v40  ;;  %v6127_v1 = vcombine.low %v6119_v34, %v6126_v49 }
 0x1b7   :  { %6806 = vperm.xlu1 %8343, %v5821_v13   ;;  %v6365_v16 = vcombine.low %v6357_v60, %v6364_v57  ;;  %v5320_v0 = vrot.slane %v12317_v26, %v8713_v50  ;;  %v5327_v6 = vrot.slane %v12318_v32, %v8713_v50  ;;  %v5558_v28 = vrot.slane %v12319_v35, %v8713_v50  ;;  %v12323_v35 = vld [vmem:[#allocation36_spill] sm:$0xff] }
 0x1b8   :  { %v5565_v12 = vrot.slane %v12320_v52, %v8713_v50  ;;  %v10749_v42 = vcombine.low %v3711_v5, %v3718_v19  ;;  %v10751_v25 = vcombine.low %v3725_v58, %v3732_v47  ;;  %v3767_v43 = vrot.slane %v10289_v2, %v8689_v36  ;;  %v10766_v19 = vpop.permute.xlu1 %6578  ;;  %v10768_v58 = vpop.permute.xlu0 %6611 }
 0x1b9   :  { %v3774_v34 = vrot.slane %v10289_v2, %v8692_v37  ;;  %v3781_v60 = vrot.slane %v10289_v2, %v8695_v39  ;;  %v3788_v57 = vrot.slane %v10289_v2, %v8698_v40  ;;  %v12321_v13 = vlaneseq  ;;  %12322 = vst [vmem:[#allocation7_spill] sm:$0xff] %v10766_v19 }
 0x1ba   :  { %6860 = vperm.xlu0 %8342, %v6127_v1   ;;  %v6400_v47 = vcombine.low %v4131_v20, %v4138_v22  ;;  %v6401_v26 = vcombine.low %v4145_v59, %v4152_v29  ;;  %v5864_v32 = vrot.slane %v10367_v38, %v8713_v50  ;;  %v5871_v52 = vrot.slane %v12323_v35, %v8713_v50  ;;  %v12326_v35 = vld [vmem:[#allocation23_spill] sm:$0xff] }
 0x1bb   :  { %v10764_v5 = vand.u32 127, %v12321_v13  ;;  %6902 = vperm.xlu1 %8343, %v6365_v16   ;;  %v5328_v49 = vcombine.low %v5320_v0, %v5327_v6  ;;  %v5566_v63 = vcombine.low %v5558_v28, %v5565_v12  ;;  %v6102_v2 = vrot.slane %v10693_v44, %v8713_v50  ;;  %v12325_v13 = vld [vmem:[#allocation28_spill] sm:$0xff]  ;;  %v12327_v20 = vld [vmem:[#allocation15_spill] sm:$0xff]  ;;  %v12330_v16 = vld [vmem:[#allocation33_spill] sm:$0xff] }
 0x1bc   :  { %v6109_v1 = vrot.slane %v10695_v56, %v8713_v50  ;;  %v10784_v22 = vcombine.low %v3767_v43, %v3774_v34  ;;  %v10786_v59 = vcombine.low %v3781_v60, %v3788_v57  ;;  %v4103_v29 = vrot.slane %v10457_v23, %v8689_v36  ;;  %v10793_v0 = vpop.permute.xlu1 %6584  ;;  %v10795_v6 = vpop.permute.xlu0 %6617 }
 0x1bd   :  { %v4110_v44 = vrot.slane %v10457_v23, %v8692_v37  ;;  %v6943_v56 = vadd.s32 4294967288, %v10764_v5  ;;  %12324 = vst [vmem:[#allocation26_spill] sm:$0xff] %v10793_v0  ;;  %v4117_v28 = vrot.slane %v10457_v23, %v8695_v39  ;;  %v4124_v12 = vrot.slane %v10457_v23, %v8698_v40  ;;  %v12331_v0 = vld [vmem:[#allocation45_spill] sm:$0xff] }
 0x1be   :  { %6719 = vperm.xlu0 %8342, %v5328_v49   ;;  %v5872_v43 = vcombine.low %v5864_v32, %v5871_v52  ;;  %v6408_v34 = vrot.slane %v6400_v47, %v8713_v50  ;;  %v6110_v60 = vcombine.low %v6102_v2, %v6109_v1  ;;  %v6415_v57 = vrot.slane %v6401_v26, %v8713_v50  ;;  %v12329_v47 = vld [vmem:[#allocation42_spill] sm:$0xff] }
 0x1bf   :  { %6761 = vperm.xlu1 %8343, %v5566_v63   ;;  %v5303_v49 = vrot.slane %v12325_v13, %v8713_v50  ;;  %v5310_v63 = vrot.slane %v12326_v35, %v8713_v50  ;;  %v4187_v26 = vrot.slane %v10479_v18, %v8689_v36  ;;  %v6383_v32 = vcombine.low %v4103_v29, %v4110_v44 }
 0x1c0   :  { %v6950_v52 = vadd.s32 4294967280, %v10764_v5  ;;  %v6957_v2 = vadd.s32 4294967272, %v10764_v5  ;;  %v10819_v1 = vpop.permute.xlu1 %6590  ;;  %v10821_v13 = vpop.permute.xlu0 %6623  ;;  %v4194_v35 = vrot.slane %v10479_v18, %v8692_v37  ;;  %v6384_v23 = vcombine.low %v4117_v28, %v4124_v12 }
 0x1c1   :  { %12328 = vst [vmem:[#allocation21_spill] sm:$0xff] %v10819_v1  ;;  %v5609_v38 = vrot.slane %v12329_v47, %v8713_v50  ;;  %v5616_v29 = vrot.slane %v12330_v16, %v8713_v50  ;;  %v6416_v44 = vcombine.low %v6408_v34, %v6415_v57  ;;  %v5311_v53 = vcombine.low %v5303_v49, %v5310_v63  ;;  %v12332_v34 = vld [vmem:[#allocation6_spill] sm:$0xff] }
 0x1c2   :  { %6815 = vperm.xlu0 %8342, %v5872_v43   ;;  %v5847_v43 = vrot.slane %v12331_v0, %v8713_v50  ;;  %v4201_v1 = vrot.slane %v10479_v18, %v8695_v39  ;;  %v4208_v28 = vrot.slane %v10479_v18, %v8698_v40  ;;  %v4159_v12 = vrot.slane %v10481_v61, %v8689_v36 }
 0x1c3   :  { %6857 = vperm.xlu1 %8343, %v6110_v60   ;;  %v5854_v60 = vrot.slane %v10469_v27, %v8713_v50  ;;  %v4166_v16 = vrot.slane %v10481_v61, %v8692_v37  ;;  %v10842_v57 = vsub.s32 %v6943_v56, %v12332_v34  ;;  %v10845_v0 = vsub.s32 %v6950_v52, %v12332_v34 }
 0x1c4   :  { %v10849_v27 = vsub.s32 %v10764_v5, %v12332_v34  ;;  %v10851_v49 = vpop.permute.xlu1 %6596  ;;  %v10853_v18 = vpop.permute.xlu0 %6629  ;;  %v10855_v63 = vcombine.low %v4187_v26, %v4194_v35  ;;  %v4173_v47 = vrot.slane %v10481_v61, %v8695_v39  ;;  %v5617_v56 = vcombine.low %v5609_v38, %v5616_v29 }
 0x1c5   :  { %12333 = vst [vmem:[#allocation61_spill] sm:$0xff] %v10851_v49  ;;  %v6153_v52 = vrot.slane %v10749_v42, %v8713_v50  ;;  %v5855_v19 = vcombine.low %v5847_v43, %v5854_v60  ;;  %v6391_v49 = vrot.slane %v6383_v32, %v8713_v50  ;;  %v10865_v41 = vcombine.low %v4201_v1, %v4208_v28  ;;  %v12335_v43 = vld [vmem:[#allocation12_spill] sm:$0xff] }
 0x1c6   :  { %6911 = vperm.xlu0 %8342, %v6416_v44   ;;  %v6160_v44 = vrot.slane %v10751_v25, %v8713_v50  ;;  %v4180_v26 = vrot.slane %v10481_v61, %v8698_v40  ;;  %v10869_v35 = vcombine.low %v4159_v12, %v4166_v16  ;;  %v10872_v38 = vsub.s32 %v6957_v2, %v12332_v34  ;;  %v12334_v2 = vld [vmem:[#allocation27_spill] sm:$0xff]  ;;  %v12336_v28 = vld [vmem:[#allocation52_spill] sm:$0xff] }
 0x1c7   :  { %6716 = vperm.xlu1 %8343, %v5311_v53   ;;  %v6398_v53 = vrot.slane %v6384_v23, %v8713_v50  ;;  %v4243_v42 = vrot.slane %v10505_v11, %v8689_v36  ;;  %v4250_v25 = vrot.slane %v10505_v11, %v8692_v37  ;;  %v4257_v32 = vrot.slane %v10505_v11, %v8695_v39  ;;  %v12337_v16 = vld [vmem:[#allocation44_spill] sm:$0xff] }
 0x1c8   :  { %v6999_v23 = vadd.s32 4294967224, %v10764_v5  ;;  %v6603_v1 = vpop.permute.xlu1 %6602  ;;  %v10881_v61 = vpop.permute.xlu0 %6635  ;;  %v5354_v29 = vrot.slane %v12334_v2, %v8713_v50  ;;  %v5361_v60 = vrot.slane %v12335_v43, %v8713_v50  ;;  %v5592_v12 = vrot.slane %v12336_v28, %v8713_v50 }
 0x1c9   :  { %v5599_v9 = vrot.slane %v12337_v16, %v8713_v50  ;;  %v6161_v31 = vcombine.low %v6153_v52, %v6160_v44  ;;  %v6399_v14 = vcombine.low %v6391_v49, %v6398_v53  ;;  %v10894_v3 = vcombine.low %v4173_v47, %v4180_v26 }
 0x1ca   :  { %6770 = vperm.xlu0 %8342, %v5617_v56   ;;  %v4264_v56 = vrot.slane %v10505_v11, %v8698_v40  ;;  %v4215_v2 = vrot.slane %v10507_v62, %v8689_v36  ;;  %v4222_v43 = vrot.slane %v10507_v62, %v8692_v37  ;;  %v6964_v28 = vadd.s32 4294967264, %v10764_v5 }
 0x1cb   :  { %6812 = vperm.xlu1 %8343, %v5855_v19   ;;  %v7051_v19 = vrot.slane %v6603_v1, %v10849_v27  ;;  %v10901_v30 = vcombine.low %v4243_v42, %v4250_v25  ;;  %v4229_v16 = vrot.slane %v10507_v62, %v8695_v39  ;;  %v6971_v11 = vadd.s32 4294967256, %v10764_v5 }
 0x1cc   :  { %v7055_v49 = vrot.slane %v10735_v10, %v10842_v57  ;;  %v6609_v47 = vpop.permute.xlu1 %6608  ;;  %v10908_v52 = vpop.permute.xlu0 %6641  ;;  %v5362_v53 = vcombine.low %v5354_v29, %v5361_v60  ;;  %v5600_v26 = vcombine.low %v5592_v12, %v5599_v9  ;;  %v5898_v42 = vrot.slane %v10461_v24, %v8713_v50 }
 0x1cd   :  { %v7060_v44 = vrot.slane %v6609_v47, %v10845_v0  ;;  %v5905_v1 = vrot.slane %v10471_v55, %v8713_v50  ;;  %v6136_v10 = vrot.slane %v10701_v46, %v8713_v50  ;;  %v10923_v47 = vsub.s32 %v6964_v28, %v12332_v34 }
 0x1ce   :  { %6866 = vperm.xlu0 %8342, %v6161_v31   ;;  %v7056_v25 = vsel %vm6948_vm1, %v7055_v49, %v7051_v19  ;;  %v10920_v31 = vcombine.low %v4257_v32, %v4264_v56  ;;  %v6978_v9 = vadd.s32 4294967248, %v10764_v5  ;;  %v10928_v29 = vsub.s32 %v6971_v11, %v12332_v34  ;;  %v12338_v19 = vld [vmem:[#allocation53_spill] sm:$0xff] }
 0x1cf   :  { %6908 = vperm.xlu1 %8343, %v6399_v14   ;;  %v6143_v14 = vrot.slane %v10715_v48, %v8713_v50  ;;  %v7061_v24 = vsel %vm6955_vm2, %v7060_v44, %v7056_v25  ;;  %v6985_v55 = vadd.s32 4294967240, %v10764_v5  ;;  %v7065_v46 = vrot.slane %v10768_v58, %v10872_v38  ;;  %v12339_v44 = vld [vmem:[#allocation54_spill] sm:$0xff] }
 0x1d0   :  { %v6615_v48 = vpop.permute.xlu1 %6614  ;;  %v10933_v32 = vpop.permute.xlu0 %6647  ;;  %v6442_v12 = vrot.slane %v10855_v63, %v8713_v50  ;;  %v6449_v56 = vrot.slane %v10865_v41, %v8713_v50  ;;  %v5337_v28 = vrot.slane %v12338_v19, %v8713_v50  ;;  %v5906_v49 = vcombine.low %v5898_v42, %v5905_v1 }
 0x1d1   :  { %v7070_v60 = vrot.slane %v6615_v48, %v10923_v47  ;;  %v7066_v11 = vsel %vm6962_vm3, %v7065_v46, %v7061_v24  ;;  %v6144_v58 = vcombine.low %v6136_v10, %v6143_v14  ;;  %v10949_v25 = vsub.s32 %v6978_v9, %v12332_v34  ;;  %v12340_v9 = vld [vmem:[#allocation35_spill] sm:$0xff]  ;;  %v12341_v46 = vld [vmem:[#allocation60_spill] sm:$0xff] }
 0x1d2   :  { %6725 = vperm.xlu0 %8342, %v5362_v53   ;;  %v5344_v53 = vrot.slane %v12339_v44, %v8713_v50  ;;  %v6992_v63 = vadd.s32 4294967232, %v10764_v5  ;;  %v10954_v48 = vsub.s32 %v6985_v55, %v12332_v34  ;;  %v7075_v42 = vrot.slane %v10795_v6, %v10928_v29 }
 0x1d3   :  { %6767 = vperm.xlu1 %8343, %v5600_v26   ;;  %v10946_v26 = vsub.s32 %v6999_v23, %v12332_v34  ;;  %v7071_v41 = vsel %vm6969_vm4, %v7070_v60, %v7066_v11  ;;  %v6450_v14 = vcombine.low %v6442_v12, %v6449_v56  ;;  %v5643_v24 = vrot.slane %v12340_v9, %v8713_v50  ;;  %v12342_v11 = vld [vmem:[#allocation10_spill] sm:$0xff] }
 0x1d4   :  { %v6621_v1 = vpop.permute.xlu1 %6620  ;;  %v10958_v23 = vpop.permute.xlu0 %6653  ;;  %v5650_v60 = vrot.slane %v12341_v46, %v8713_v50  ;;  %v7076_v55 = vsel %vm6976_vm5, %v7075_v42, %v7071_v41  ;;  %v5345_v19 = vcombine.low %v5337_v28, %v5344_v53  ;;  %v5881_v6 = vrot.slane %v12342_v11, %v8713_v50 }
 0x1d5   :  { %v7080_v10 = vrot.slane %v6621_v1, %v10949_v25  ;;  %v7013_v44 = vadd.s32 4294967208, %v10764_v5  ;;  %v10972_v1 = vsub.s32 %v6992_v63, %v12332_v34  ;;  %v7006_v12 = vadd.s32 4294967216, %v10764_v5 }
 0x1d6   :  { %6821 = vperm.xlu0 %8342, %v5906_v49   ;;  %v12343_v49 = vld [vmem:[#allocation18_spill] sm:$0xff]  ;;  %v7027_v9 = vadd.s32 4294967192, %v10764_v5  ;;  %v7085_v28 = vrot.slane %v10821_v13, %v10954_v48  ;;  %v5651_v63 = vcombine.low %v5643_v24, %v5650_v60  ;;  %v6187_v46 = vrot.slane %v10784_v22, %v8713_v50 }
 0x1d7   :  { %6863 = vperm.xlu1 %8343, %v6144_v58   ;;  %v5888_v58 = vrot.slane %v12343_v49, %v8713_v50  ;;  %v7081_v56 = vsel %vm6983_vm6, %v7080_v10, %v7076_v55  ;;  %v6194_v10 = vrot.slane %v10786_v59, %v8713_v50  ;;  %v6425_v13 = vrot.slane %v10869_v35, %v8713_v50 }
 0x1d8   :  { %v6627_v53 = vpop.permute.xlu1 %6626  ;;  %v10979_v41 = vpop.permute.xlu0 %6659  ;;  %v7086_v55 = vsel %vm6990_vm7, %v7085_v28, %v7081_v56  ;;  %v10995_v24 = vsub.s32 %v7006_v12, %v12332_v34  ;;  %v7020_v22 = vadd.s32 4294967200, %v10764_v5  ;;  %v11000_v59 = vsub.s32 %v7027_v9, %v12332_v34  ;;  %v12345_v56 = vld [vmem:[#allocation72_spill] sm:$0xff] }
 0x1d9   :  { %v7090_v42 = vrot.slane %v6627_v53, %v10972_v1  ;;  %v5889_v11 = vcombine.low %v5881_v6, %v5888_v58  ;;  %v7095_v35 = vrot.slane %v10853_v18, %v10946_v26  ;;  %v6195_v58 = vcombine.low %v6187_v46, %v6194_v10 }
 0x1da   :  { %6917 = vperm.xlu0 %8342, %v6450_v14   ;;  %v6432_v14 = vrot.slane %v10894_v3, %v8713_v50  ;;  %v5395_v9 = vrot.slane %v12345_v56, %v8713_v50  ;;  %v7034_v46 = vadd.s32 4294967184, %v10764_v5 }
 0x1db   :  { %6722 = vperm.xlu1 %8343, %v5345_v19   ;;  %v10992_v19 = vsub.s32 %v7013_v44, %v12332_v34  ;;  %v7091_v60 = vsel %vm6997_vm8, %v7090_v42, %v7086_v55  ;;  %v12344_v44 = vld [vmem:[#allocation71_spill] sm:$0xff]  ;;  %v12346_v42 = vld [vmem:[#allocation9_spill] sm:$0xff] }
 0x1dc   :  { %v6633_v3 = vpop.permute.xlu1 %6632  ;;  %v11004_v6 = vpop.permute.xlu0 %6665  ;;  %v5388_v12 = vrot.slane %v12344_v44, %v8713_v50  ;;  %v7096_v28 = vsel %vm7004_vm9, %v7095_v35, %v7091_v60  ;;  %v6433_v53 = vcombine.low %v6425_v13, %v6432_v14  ;;  %v5626_v18 = vrot.slane %v12346_v42, %v8713_v50 }
 0x1dd   :  { %v7100_v49 = vrot.slane %v6633_v3, %v10995_v24  ;;  %v11018_v3 = vsub.s32 %v7020_v22, %v12332_v34  ;;  %v7105_v44 = vrot.slane %v10881_v61, %v10992_v19  ;;  %v5932_v60 = vrot.slane %v10547_v33, %v8713_v50 }
 0x1de   :  { %6776 = vperm.xlu0 %8342, %v5651_v63   ;;  %v12347_v63 = vld [vmem:[#allocation55_spill] sm:$0xff]  ;;  %v5939_v35 = vrot.slane %v10549_v17, %v8713_v50  ;;  %v5396_v22 = vcombine.low %v5388_v12, %v5395_v9  ;;  %v6170_v61 = vrot.slane %v10719_v4, %v8713_v50  ;;  %v4236_v33 = vrot.slane %v10507_v62, %v8698_v40  ;;  %v12355_v62 = vld [vmem:[#allocation48_spill] sm:$0xff] }
 0x1df   :  { %6818 = vperm.xlu1 %8343, %v5889_v11   ;;  %v5633_v55 = vrot.slane %v12347_v63, %v8713_v50  ;;  %v7041_v11 = vadd.s32 4294967176, %v10764_v5  ;;  %v7101_v10 = vsel %vm7011_vm10, %v7100_v49, %v7096_v28  ;;  %v11042_v17 = vsub.s32 %v7034_v46, %v12332_v34  ;;  %v12348_v63 = vld [vmem:[#allocation73_spill] sm:$0xff] }
 0x1e0   :  { %v6639_v13 = vpop.permute.xlu1 %6638  ;;  %v11024_v14 = vpop.permute.xlu0 %6671  ;;  %v7106_v49 = vsel %vm7018_vm11, %v7105_v44, %v7101_v10  ;;  %v7115_v9 = vrot.slane %v10908_v52, %v11000_v59  ;;  %v12349_v10 = vld [vmem:[#allocation16_spill] sm:$0xff] }
 0x1e1   :  { %v7110_v5 = vrot.slane %v6639_v13, %v11018_v3  ;;  %v5634_v56 = vcombine.low %v5626_v18, %v5633_v55  ;;  %v11039_v28 = vsub.s32 %v7041_v11, %v12332_v34  ;;  %v6476_v18 = vrot.slane %v10901_v30, %v8713_v50 }
 0x1e2   :  { %6872 = vperm.xlu0 %8342, %v6195_v58   ;;  %v6177_v58 = vrot.slane %v10727_v54, %v8713_v50  ;;  %v6483_v34 = vrot.slane %v10920_v31, %v8713_v50  ;;  %v5371_v55 = vrot.slane %v12348_v63, %v8713_v50  ;;  %v5378_v44 = vrot.slane %v12349_v10, %v8713_v50 }
 0x1e3   :  { %6914 = vperm.xlu1 %8343, %v6433_v53   ;;  %v7111_v12 = vsel %vm7025_vm12, %v7110_v5, %v7106_v49  ;;  %v5940_v53 = vcombine.low %v5932_v60, %v5939_v35  ;;  %v7125_v52 = vrot.slane %v10933_v32, %v11039_v28  ;;  %v12350_v13 = vrot.slane %v12327_v20, %v8692_v37 }
 0x1e4   :  { %v6645_v4 = vpop.permute.xlu1 %6644  ;;  %v11047_v54 = vpop.permute.xlu0 %6677  ;;  %v7116_v11 = vsel %vm7032_vm13, %v7115_v9, %v7111_v12  ;;  %v6178_v46 = vcombine.low %v6170_v61, %v6177_v58  ;;  %v12351_v30 = vrot.slane %v12327_v20, %v8689_v36  ;;  %v12352_v31 = vrot.slane %v12327_v20, %v8698_v40 }
 0x1e5   :  { %v7120_v42 = vrot.slane %v6645_v4, %v11042_v17  ;;  %v12353_v35 = vrot.slane %v12327_v20, %v8695_v39  ;;  %v6452_v49 = vcombine.low %v4229_v16, %v4236_v33  ;;  %v7134_v58 = vrot.slane %v10958_v23, %v10842_v57 }
 0x1e6   :  { %6731 = vperm.xlu0 %8342, %v5396_v22   ;;  %v6213_v60 = vcombine.low %v12351_v30, %v12350_v13  ;;  %v6451_v22 = vcombine.low %v4215_v2, %v4222_v43  ;;  %v6484_v9 = vcombine.low %v6476_v18, %v6483_v34  ;;  %v12354_v2 = vld [vmem:[#allocation80_spill] sm:$0xff]  ;;  %v5379_v4 = vcombine.low %v5371_v55, %v5378_v44  ;;  %v12356_v18 = vld [vmem:[#allocation51_spill] sm:$0xff] }
 0x1e7   :  { %6773 = vperm.xlu1 %8343, %v5634_v56   ;;  %v6214_v32 = vcombine.low %v12353_v35, %v12352_v31  ;;  %v7121_v5 = vsel %vm7039_vm14, %v7120_v42, %v7116_v11  ;;  %v5677_v43 = vrot.slane %v12354_v2, %v8713_v50  ;;  %v5684_v16 = vrot.slane %v12355_v62, %v8713_v50 }
 0x1e8   :  { %v11084_v56 = vsel %vm7046_vm15, %v7125_v52, %v7121_v5  ;;  %v6651_v20 = vpop.permute.xlu1 %6650  ;;  %v11086_v61 = vpop.permute.xlu0 %6683  ;;  %v5915_v33 = vrot.slane %v10551_v51, %v8713_v50  ;;  %v3473_v42 = vrot.slane %v12298_v15, %v8695_v39  ;;  %v3480_v23 = vrot.slane %v12298_v15, %v8698_v40 }
 0x1e9   :  { %v7130_v12 = vrot.slane %v6651_v20, %v10849_v27  ;;  %v3438_v55 = vrot.slane %v12356_v18, %v8692_v37  ;;  %v12357_v51 = vrot.slane %v10287_v21, %v8692_v37  ;;  %v6221_v10 = vrot.slane %v6213_v60, %v8713_v50 }
 0x1ea   :  { %6827 = vperm.xlu0 %8342, %v5940_v53   ;;  %v5922_v53 = vrot.slane %v10553_v45, %v8713_v50  ;;  %v12358_v45 = vrot.slane %v10287_v21, %v8689_v36  ;;  %v6228_v13 = vrot.slane %v6214_v32, %v8713_v50  ;;  %v6459_v30 = vrot.slane %v6451_v22, %v8713_v50  ;;  %v12362_v32 = vld [vmem:[#allocation66_spill] sm:$0xff] }
 0x1eb   :  { %6869 = vperm.xlu1 %8343, %v6178_v46   ;;  %v7135_v63 = vsel %vm6948_vm1, %v7134_v58, %v7130_v12  ;;  %v6466_v31 = vrot.slane %v6452_v49, %v8713_v50  ;;  %v12359_v35 = vrot.slane %v10287_v21, %v8698_v40  ;;  %v12360_v5 = vrot.slane %v10287_v21, %v8695_v39 }
 0x1ec   :  { %v11114_v52 = vcombine.low %v12358_v45, %v12357_v51  ;;  %v6657_v11 = vpop.permute.xlu1 %6656  ;;  %v7144_v58 = vrot.slane %v10979_v41, %v10872_v38  ;;  %v5685_v12 = vcombine.low %v5677_v43, %v5684_v16  ;;  %v5923_v60 = vcombine.low %v5915_v33, %v5922_v53  ;;  %v12363_v45 = vld [vmem:[#allocation13_spill] sm:$0xff] }
 0x1ed   :  { %v11116_v46 = vpop.permute.xlu0 %6689  ;;  %v7139_v44 = vrot.slane %v6657_v11, %v10845_v0  ;;  %v6197_v20 = vcombine.low %v12360_v5, %v12359_v35  ;;  %v4299_v22 = vrot.slane %v12362_v32, %v8689_v36  ;;  %v4306_v49 = vrot.slane %v12362_v32, %v8692_v37  ;;  %v12365_v5 = vld [vmem:[#allocation56_spill] sm:$0xff] }
 0x1ee   :  { %6923 = vperm.xlu0 %8342, %v6484_v9   ;;  %v12361_v9 = vld [vmem:[#allocation68_spill] sm:$0xff]  ;;  %v4313_v21 = vrot.slane %v12362_v32, %v8695_v39  ;;  %v4320_v62 = vrot.slane %v12362_v32, %v8698_v40  ;;  %v6229_v53 = vcombine.low %v6221_v10, %v6228_v13  ;;  %v6467_v51 = vcombine.low %v6459_v30, %v6466_v31 }
 0x1ef   :  { %6728 = vperm.xlu1 %8343, %v5379_v4   ;;  %v3851_v2 = vrot.slane %v12361_v9, %v8689_v36  ;;  %v7140_v4 = vsel %vm6955_vm2, %v7139_v44, %v7135_v63  ;;  %v5422_v63 = vrot.slane %v12363_v45, %v8713_v50  ;;  %v7154_v11 = vrot.slane %v11004_v6, %v10928_v29  ;;  %v12364_v44 = vld [vmem:[#allocation57_spill] sm:$0xff]  ;;  %v12367_v32 = vld [vmem:[#allocation8_spill] sm:$0xff] }
 0x1f0   :  { %v7145_v43 = vsel %vm6962_vm3, %v7144_v58, %v7140_v4  ;;  %v5429_v35 = vrot.slane %v12364_v44, %v8713_v50  ;;  %v12366_v58 = vld [vmem:[#allocation43_spill] sm:$0xff]  ;;  %v3879_v4 = vrot.slane %v12367_v32, %v8689_v36  ;;  %v3886_v10 = vrot.slane %v12367_v32, %v8692_v37 }
 0x1f1   :  { %v6663_v41 = vpop.permute.xlu1 %6662  ;;  %v3893_v13 = vrot.slane %v12367_v32, %v8695_v39  ;;  %v6502_v30 = vcombine.low %v4299_v22, %v4306_v49  ;;  %v5966_v44 = vrot.slane %v10593_v8, %v8713_v50  ;;  %v6204_v34 = vrot.slane %v11114_v52, %v8713_v50  ;;  %v12368_v8 = vld [vmem:[#allocation69_spill] sm:$0xff] }
 0x1f2   :  { %6782 = vperm.xlu0 %8342, %v5685_v12   ;;  %v11143_v16 = vpop.permute.xlu0 %6695  ;;  %v7149_v33 = vrot.slane %v6663_v41, %v10923_v47  ;;  %v5660_v12 = vrot.slane %v12365_v5, %v8713_v50  ;;  %v6211_v22 = vrot.slane %v6197_v20, %v8713_v50  ;;  %v6503_v49 = vcombine.low %v4313_v21, %v4320_v62 }
 0x1f3   :  { %6824 = vperm.xlu1 %8343, %v5923_v60   ;;  %v5667_v60 = vrot.slane %v12366_v58, %v8713_v50  ;;  %v5973_v58 = vrot.slane %v10619_v7, %v8713_v50  ;;  %v4278_v7 = vrot.slane %v12368_v8, %v8692_v37  ;;  %v4285_v52 = vrot.slane %v12368_v8, %v8695_v39 }
 0x1f4   :  { %v7150_v6 = vsel %vm6969_vm4, %v7149_v33, %v7145_v43  ;;  %v7164_v43 = vrot.slane %v11024_v14, %v10954_v48  ;;  %v5430_v33 = vcombine.low %v5422_v63, %v5429_v35  ;;  %v4292_v20 = vrot.slane %v12368_v8, %v8698_v40 }
 0x1f5   :  { %v6669_v31 = vpop.permute.xlu1 %6668  ;;  %v7155_v41 = vsel %vm6976_vm5, %v7154_v11, %v7150_v6  ;;  %v4271_v11 = vrot.slane %v12368_v8, %v8689_v36  ;;  %v5974_v35 = vcombine.low %v5966_v44, %v5973_v58  ;;  %v6247_v8 = vcombine.low %v3879_v4, %v3886_v10  ;;  %v12373_v4 = vld [vmem:[#allocation19_spill] sm:$0xff] }
 0x1f6   :  { %6878 = vperm.xlu0 %8342, %v6229_v53   ;;  %v11164_v45 = vpop.permute.xlu0 %6701  ;;  %v7159_v5 = vrot.slane %v6669_v31, %v10949_v25  ;;  %v5668_v53 = vcombine.low %v5660_v12, %v5667_v60  ;;  %v6212_v12 = vcombine.low %v6204_v34, %v6211_v22  ;;  %v6510_v60 = vrot.slane %v6502_v30, %v8713_v50  ;;  %v12371_v22 = vld [vmem:[#allocation65_spill] sm:$0xff] }
 0x1f7   :  { %6920 = vperm.xlu1 %8343, %v6467_v51   ;;  %v3900_v51 = vrot.slane %v12367_v32, %v8698_v40  ;;  %v7174_v32 = vrot.slane %v11047_v54, %v10946_v26  ;;  %v6517_v31 = vrot.slane %v6503_v49, %v8713_v50  ;;  %v6485_v44 = vcombine.low %v4271_v11, %v4278_v7 }
 0x1f8   :  { %v7160_v6 = vsel %vm6983_vm6, %v7159_v5, %v7155_v41  ;;  %v12369_v41 = vld [vmem:[#allocation58_spill] sm:$0xff]  ;;  %v5711_v49 = vrot.slane %v12371_v22, %v8713_v50  ;;  %v5949_v10 = vrot.slane %v12373_v4, %v8713_v50  ;;  %v6486_v11 = vcombine.low %v4285_v52, %v4292_v20 }
 0x1f9   :  { %v6675_v14 = vpop.permute.xlu1 %6674  ;;  %v7165_v21 = vsel %vm6990_vm7, %v7164_v43, %v7160_v6  ;;  %v5405_v5 = vrot.slane %v12369_v41, %v8713_v50  ;;  %v6248_v6 = vcombine.low %v3893_v13, %v3900_v51  ;;  %v12372_v41 = vld [vmem:[#allocation67_spill] sm:$0xff]  ;;  %v12374_v13 = vld [vmem:[#allocation29_spill] sm:$0xff]  ;;  %v7184_v7 = vrot.slane %v11086_v61, %v10992_v19 }
 0x1fa   :  { %6737 = vperm.xlu0 %8342, %v5430_v33   ;;  %v11188_v62 = vpop.permute.xlu0 %6749  ;;  %v7169_v63 = vrot.slane %v6675_v14, %v10972_v1  ;;  %v12370_v33 = vld [vmem:[#allocation37_spill] sm:$0xff]  ;;  %v5956_v51 = vrot.slane %v12374_v13, %v8713_v50  ;;  %v11235_v61 = vcombine.low %v3473_v42, %v3480_v23  ;;  %v7194_v42 = vrot.slane %v11116_v46, %v11000_v59 }
 0x1fb   :  { %6779 = vperm.xlu1 %8343, %v5668_v53   ;;  %v5412_v43 = vrot.slane %v12370_v33, %v8713_v50  ;;  %v3858_v53 = vrot.slane %v12361_v9, %v8692_v37  ;;  %v5718_v33 = vrot.slane %v12372_v41, %v8713_v50  ;;  %v6262_v23 = vrot.slane %v6248_v6, %v8713_v50 }
 0x1fc   :  { %v7170_v34 = vsel %vm6997_vm8, %v7169_v63, %v7165_v21  ;;  %v6518_v21 = vcombine.low %v6510_v60, %v6517_v31  ;;  %v5957_v22 = vcombine.low %v5949_v10, %v5956_v51  ;;  %v12378_v10 = vld [vmem:[#allocation59_spill] sm:$0xff]  ;;  %v12379_v51 = vld [vmem:[#allocation34_spill] sm:$0xff] }
 0x1fd   :  { %v6681_v30 = vpop.permute.xlu1 %6680  ;;  %v7175_v54 = vsel %vm7004_vm9, %v7174_v32, %v7170_v34  ;;  %v5413_v63 = vcombine.low %v5405_v5, %v5412_v43  ;;  %v3865_v34 = vrot.slane %v12361_v9, %v8695_v39  ;;  %v11240_v20 = vcombine.low %v3851_v2, %v3858_v53 }
 0x1fe   :  { %6833 = vperm.xlu0 %8342, %v5974_v35   ;;  %v11203_v58 = vpop.permute.xlu0 %6797  ;;  %v7179_v14 = vrot.slane %v6681_v30, %v10995_v24  ;;  %v12375_v35 = vrot.slane %v12298_v15, %v8692_v37  ;;  %v3872_v30 = vrot.slane %v12361_v9, %v8698_v40  ;;  %v6493_v9 = vrot.slane %v6485_v44, %v8713_v50 }
 0x1ff   :  { %6875 = vperm.xlu1 %8343, %v6212_v12   ;;  %v12376_v12 = vrot.slane %v12298_v15, %v8689_v36  ;;  %v6255_v15 = vrot.slane %v6247_v8, %v8713_v50  ;;  %v6500_v2 = vrot.slane %v6486_v11, %v8713_v50  ;;  %v5456_v13 = vrot.slane %v12378_v10, %v8713_v50 }
 0x200   :  { %v7180_v52 = vsel %vm7011_vm10, %v7179_v14, %v7175_v54  ;;  %v5719_v54 = vcombine.low %v5711_v49, %v5718_v33  ;;  %v6231_v53 = vcombine.low %v3865_v34, %v3872_v30  ;;  %v12377_v14 = vld [vmem:[#allocation70_spill] sm:$0xff]  ;;  %v5463_v11 = vrot.slane %v12379_v51, %v8713_v50 }
 0x201   :  { %v11222_v32 = vcombine.low %v12376_v12, %v12375_v35  ;;  %v6687_v60 = vpop.permute.xlu1 %6686  ;;  %v7185_v31 = vsel %vm7018_vm11, %v7184_v7, %v7180_v52  ;;  %v4355_v41 = vrot.slane %v12377_v14, %v8689_v36  ;;  %v4362_v4 = vrot.slane %v12377_v14, %v8692_v37  ;;  %v12380_v7 = vld [vmem:[#allocation38_spill] sm:$0xff] }
 0x202   :  { %6929 = vperm.xlu0 %8342, %v6518_v21   ;;  %v7189_v5 = vrot.slane %v6687_v60, %v11018_v3  ;;  %v11244_v43 = vpop.permute.xlu0 %6845  ;;  %v4369_v8 = vrot.slane %v12377_v14, %v8695_v39  ;;  %v4376_v46 = vrot.slane %v12377_v14, %v8698_v40  ;;  %v5694_v21 = vrot.slane %v12380_v7, %v8713_v50  ;;  %v12381_v34 = vld [vmem:[#allocation46_spill] sm:$0xff] }
 0x203   :  { %6734 = vperm.xlu1 %8343, %v5413_v63   ;;  %v7204_v63 = vrot.slane %v11143_v16, %v11039_v28  ;;  %v6263_v35 = vcombine.low %v6255_v15, %v6262_v23  ;;  %v6501_v12 = vcombine.low %v6493_v9, %v6500_v2  ;;  %v5701_v30 = vrot.slane %v12381_v34, %v8713_v50 }
 0x204   :  { %v7190_v49 = vsel %vm7025_vm12, %v7189_v5, %v7185_v31  ;;  %v3445_v52 = vrot.slane %v12356_v18, %v8695_v39  ;;  %v3452_v60 = vrot.slane %v12356_v18, %v8698_v40  ;;  %v12382_v31 = vrot.slane %v12356_v18, %v8689_v36 }
 0x205   :  { %v6693_v6 = vpop.permute.xlu1 %6692  ;;  %v7195_v44 = vsel %vm7032_vm13, %v7194_v42, %v7190_v49  ;;  %v6537_v15 = vcombine.low %v4369_v8, %v4376_v46  ;;  %v7213_v9 = vrot.slane %v11164_v45, %v10842_v57  ;;  %v6000_v18 = vrot.slane %v11222_v32, %v8713_v50  ;;  %v12383_v46 = vld [vmem:[#allocation77_spill] sm:$0xff] }
 0x206   :  { %6788 = vperm.xlu0 %8342, %v5719_v54   ;;  %v7199_v33 = vrot.slane %v6693_v6, %v11042_v17  ;;  %v11283_v5 = vcombine.low %v12382_v31, %v3438_v55  ;;  %v6007_v55 = vrot.slane %v11235_v61, %v8713_v50  ;;  %v5464_v14 = vcombine.low %v5456_v13, %v5463_v11 }
 0x207   :  { %6830 = vperm.xlu1 %8343, %v5957_v22   ;;  %v6536_v22 = vcombine.low %v4355_v41, %v4362_v4  ;;  %v5702_v41 = vcombine.low %v5694_v21, %v5701_v30  ;;  %v6238_v4 = vrot.slane %v11240_v20, %v8713_v50  ;;  %v6245_v49 = vrot.slane %v6231_v53, %v8713_v50  ;;  %v12386_v30 = vld [vmem:[#allocation47_spill] sm:$0xff] }
 0x208   :  { %v7200_v16 = vsel %vm7039_vm14, %v7199_v33, %v7195_v44  ;;  %v11286_v54 = vpop.permute.xlu0 %6893  ;;  %v5976_v8 = vcombine.low %v3445_v52, %v3452_v60  ;;  %v4327_v6 = vrot.slane %v12383_v46, %v8689_v36  ;;  %v4334_v45 = vrot.slane %v12383_v46, %v8692_v37 }
 0x209   :  { %v11289_v42 = vsel %vm7046_vm15, %v7204_v63, %v7200_v16  ;;  %v6699_v23 = vpop.permute.xlu1 %6698  ;;  %v4341_v61 = vrot.slane %v12383_v46, %v8695_v39  ;;  %v4348_v33 = vrot.slane %v12383_v46, %v8698_v40  ;;  %v6544_v53 = vrot.slane %v6536_v22, %v8713_v50  ;;  %v12384_v63 = vld [vmem:[#allocation17_spill] sm:$0xff] }
 0x20a   :  { %6884 = vperm.xlu0 %8342, %v6263_v35   ;;  %v7209_v2 = vrot.slane %v6699_v23, %v10849_v27  ;;  %v7292_v10 = vrot.slane %v11188_v62, %v10842_v57  ;;  %v6008_v51 = vcombine.low %v6000_v18, %v6007_v55  ;;  %v6551_v11 = vrot.slane %v6537_v15, %v8713_v50 }
 0x20b   :  { %6926 = vperm.xlu1 %8343, %v6501_v12   ;;  %v6246_v21 = vcombine.low %v6238_v4, %v6245_v49  ;;  %v5439_v35 = vrot.slane %v12384_v63, %v8713_v50  ;;  %v12385_v12 = vld [vmem:[#allocation20_spill] sm:$0xff]  ;;  %v3011_v52 = vrot.slane %v12386_v30, %v8689_v36  ;;  %v3018_v62 = vrot.slane %v12386_v30, %v8692_v37  ;;  %v7649_v63 = vld [vmem:[%s11913_s2 + $0x80] sm:$0xff] }
 0x20c   :  { %v11306_v44 = vsel %vm6948_vm1, %v7213_v9, %v7209_v2  ;;  %v5446_v34 = vrot.slane %v12385_v12, %v8713_v50  ;;  %v3025_v16 = vrot.slane %v12386_v30, %v8695_v39  ;;  %v3032_v22 = vrot.slane %v12386_v30, %v8698_v40 }
 0x20d   :  { %v6753_v32 = vpop.permute.xlu0 %6752  ;;  %v6747_v20 = vpop.permute.xlu1 %6746  ;;  %v6519_v9 = vcombine.low %v4327_v6, %v4334_v45  ;;  %v6520_v2 = vcombine.low %v4341_v61, %v4348_v33  ;;  %v7371_v18 = vrot.slane %v11203_v58, %v10842_v57  ;;  %v5983_v4 = vrot.slane %v11283_v5, %v8713_v50  ;;  %v12387_v6 = vld [vmem:[#allocation41_spill] sm:$0xff] }
 0x20e   :  { %6743 = vperm.xlu0 %8342, %v5464_v14   ;;  %v7288_v13 = vrot.slane %v6747_v20, %v10849_v27  ;;  %v7297_v7 = vrot.slane %v6753_v32, %v10845_v0  ;;  %v6552_v14 = vcombine.low %v6544_v53, %v6551_v11  ;;  %v5990_v49 = vrot.slane %v5976_v8, %v8713_v50 }
 0x20f   :  { %6785 = vperm.xlu1 %8343, %v5702_v41   ;;  %v5447_v41 = vcombine.low %v5439_v35, %v5446_v34  ;;  %v5720_v46 = vcombine.low %v3011_v52, %v3018_v62  ;;  %v3907_v45 = vrot.slane %v12387_v6, %v8689_v36  ;;  %v3914_v58 = vrot.slane %v12387_v6, %v8692_v37  ;;  %v7650_v35 = vld [vmem:[%s11913_s2 + $0x88] sm:$0xff] }
 0x210   :  { %v7293_v60 = vsel %vm6948_vm1, %v7292_v10, %v7288_v13  ;;  %v5721_v10 = vcombine.low %v3025_v16, %v3032_v22  ;;  %v3921_v5 = vrot.slane %v12387_v6, %v8695_v39  ;;  %v3928_v8 = vrot.slane %v12387_v6, %v8698_v40 }
 0x211   :  { %v6849_v31 = vpop.permute.xlu0 %6848  ;;  %v6795_v15 = vpop.permute.xlu1 %6794  ;;  %v11332_v23 = vsel %vm6955_vm2, %v7297_v7, %v7293_v60  ;;  %v7450_v33 = vrot.slane %v11244_v43, %v10842_v57  ;;  %v5991_v36 = vcombine.low %v5983_v4, %v5990_v49  ;;  %v6534_v37 = vrot.slane %v6520_v2, %v8713_v50  ;;  %v7665_v4 = vld [vmem:[%s11913_s2 + $0x100] sm:$0xff]  ;;  %v7666_v49 = vld [vmem:[%s11913_s2 + $0x108] sm:$0xff] }
 0x212   :  { %6839 = vperm.xlu0 %8342, %v6008_v51   ;;  %v7367_v55 = vrot.slane %v6795_v15, %v10849_v27  ;;  %v7455_v13 = vrot.slane %v6849_v31, %v10845_v0  ;;  %v6527_v51 = vrot.slane %v6519_v9, %v8713_v50  ;;  %v6264_v39 = vcombine.low %v3907_v45, %v3914_v58  ;;  %v7633_v15 = vld [vmem:[%s11913_s2] sm:$0xff]  ;;  %v7651_v58 = vld [vmem:[%s11913_s2 + $0x90] sm:$0xff] }
 0x213   :  { %6881 = vperm.xlu1 %8343, %v6246_v21   ;;  %v5728_v40 = vrot.slane %v5720_v46, %v8713_v50  ;;  %v7529_v12 = vrot.slane %v11286_v54, %v10842_v57  ;;  %v5735_v30 = vrot.slane %v5721_v10, %v8713_v50  ;;  %v8271_v52 = vpack.c.bf16 %v7650_v35, %v7649_v63  ;;  %v7634_v54 = vld [vmem:[%s11913_s2 + $0x8] sm:$0xff]  ;;  %v7681_v9 = vld [vmem:[%s11913_s2 + $0x180] sm:$0xff] }
 0x214   :  { %v11341_v32 = vsel %vm6948_vm1, %v7371_v18, %v7367_v55  ;;  %v6265_v62 = vcombine.low %v3921_v5, %v3928_v8  ;;  %v6535_v60 = vcombine.low %v6527_v51, %v6534_v37  ;;  %v6272_v55 = vrot.slane %v6264_v39, %v8713_v50  ;;  %v7667_v39 = vld [vmem:[%s11913_s2 + $0x110] sm:$0xff] }
 0x215   :  { %v6708_v20 = vpop.permute.xlu0 %6707  ;;  %v6843_v61 = vpop.permute.xlu1 %6842  ;;  %8272 = vmatprep.subr.bf16.mxu0 %v8271_v52  ;;  %v5736_v18 = vcombine.low %v5728_v40, %v5735_v30  ;;  %v8305_v45 = vpack.c.bf16 %v7666_v49, %v7665_v4  ;;  %v7654_v30 = vld [vmem:[%s11913_s2 + $0xa8] sm:$0xff] }
 0x216   :  { %6935 = vperm.xlu0 %8342, %v6552_v14   ;;  %v7446_v53 = vrot.slane %v6843_v61, %v10849_v27  ;;  %v8273_v14 = vpack.c.bf16 %v7634_v54, %v7633_v15  ;;  %v7223_v46 = vrot.slane %v6708_v20, %v10872_v38  ;;  %v6279_v10 = vrot.slane %v6265_v62, %v8713_v50  ;;  %v7652_v61 = vld [vmem:[%s11913_s2 + $0x98] sm:$0xff]  ;;  %v7637_v54 = vld [vmem:[%s11913_s2 + $0x20] sm:$0xff] }
 0x217   :  { %6740 = vperm.xlu1 %8343, %v5447_v41   ;;  %v7682_v41 = vld [vmem:[%s11913_s2 + $0x188] sm:$0xff] }
 0x218   :  { %v7451_v11 = vsel %vm6948_vm1, %v7450_v33, %v7446_v53  ;;  %v8303_v6 = vpack.c.bf16 %v7682_v41, %v7681_v9  ;;  %8274 = vmatpush3.bf16.msra.mxu0 %v8273_v14  ;;  %v8275_v33 = vpack.c.bf16 %v7652_v61, %v7651_v58  ;;  %v6280_v63 = vcombine.low %v6272_v55, %v6279_v10  ;;  %v7685_v9 = vld [vmem:[%s11913_s2 + $0x1a0] sm:$0xff]  ;;  %v7686_v55 = vld [vmem:[%s11913_s2 + $0x1a8] sm:$0xff]  ;;  %v7655_v10 = vld [vmem:[%s11913_s2 + $0xb0] sm:$0xff] }
 0x219   :  { %v11358_v7 = vpop.permute.xlu0 %6803  ;;  %v11362_v43 = vsel %vm6955_vm2, %v7455_v13, %v7451_v11  ;;  %v7635_v13 = vld [vmem:[%s11913_s2 + $0x10] sm:$0xff]  ;;  %v7684_v11 = vld [vmem:[%s11913_s2 + $0x198] sm:$0xff]  ;;  %v7669_v14 = vld [vmem:[%s11913_s2 + $0x120] sm:$0xff] }
 0x21a   :  { %v6891_v21 = vpop.permute.xlu1 %6890  ;;  %8304 = vmatprep.subr.bf16.mxu1 %v8303_v6  ;;  %8276 = vmatprep.subr.bf16.mxu0 %v8275_v33  ;;  %v7381_v40 = vrot.slane %v11358_v7, %v10872_v38  ;;  %v7670_v41 = vld [vmem:[%s11913_s2 + $0x128] sm:$0xff]  ;;  %v7656_v6 = vld [vmem:[%s11913_s2 + $0xb8] sm:$0xff] }
 0x21b   :  { %6836 = vperm.xlu1 %8343, %v5991_v36   ;;  %v7525_v34 = vrot.slane %v6891_v21, %v10849_v27  ;;  %v7636_v36 = vld [vmem:[%s11913_s2 + $0x18] sm:$0xff]  ;;  %8306 = vmatpush3.bf16.msra.mxu1 %v8305_v45  ;;  %v8283_v61 = vpack.c.bf16 %v7656_v6, %v7655_v10  ;;  %v7691_v10 = vld [vmem:[%s11913_s2 + $0x1d0] sm:$0xff] }
 0x21c   :  { %v8277_v37 = vpack.c.bf16 %v7636_v36, %v7635_v13  ;;  %v7668_v21 = vld [vmem:[%s11913_s2 + $0x118] sm:$0xff] }
 0x21d   :  { %v11375_v31 = vsel %vm6948_vm1, %v7529_v12, %v7525_v34  ;;  %v11377_v16 = vpop.permute.xlu0 %6899  ;;  %v8309_v12 = vpack.c.bf16 %v7668_v21, %v7667_v39  ;;  %v7653_v34 = vld [vmem:[%s11913_s2 + $0xa0] sm:$0xff]  ;;  %v7640_v33 = vld [vmem:[%s11913_s2 + $0x38] sm:$0xff] }
 0x21e   :  { %v6705_v22 = vpop.permute.xlu1 %6704  ;;  %8278 = vmatpush3.bf16.msra.mxu0 %v8277_v37  ;;  %v7672_v37 = vld [vmem:[%s11913_s2 + $0x138] sm:$0xff] }
 0x21f   :  { %6932 = vperm.xlu1 %8343, %v6535_v60   ;;  %v7218_v2 = vrot.slane %v6705_v22, %v10845_v0  ;;  %v8279_v60 = vpack.c.bf16 %v7654_v30, %v7653_v34  ;;  %v7642_v30 = vld [vmem:[%s11913_s2 + $0x48] sm:$0xff]  ;;  %v7692_v6 = vld [vmem:[%s11913_s2 + $0x1d8] sm:$0xff] }
 0x221   :  { %v7219_v5 = vsel %vm6955_vm2, %v7218_v2, %v11306_v44  ;;  %v11409_v8 = vpop.permute.xlu0 %6758  ;;  %v7683_v44 = vld [vmem:[%s11913_s2 + $0x190] sm:$0xff]  ;;  %8280 = vmatprep.subr.bf16.mxu0 %v8279_v60  ;;  %v7539_v2 = vrot.slane %v11377_v16, %v10872_v38  ;;  %v8313_v16 = vpack.c.bf16 %v7670_v41, %v7669_v14  ;;  %v7690_v60 = vld [vmem:[%s11913_s2 + $0x1c8] sm:$0xff]  ;;  %v7660_v14 = vld [vmem:[%s11913_s2 + $0xd8] sm:$0xff] }
 0x222   :  { %v6801_v20 = vpop.permute.xlu1 %6800  ;;  %v11412_v53 = vsel %vm6962_vm3, %v7223_v46, %v7219_v5  ;;  %v8307_v35 = vpack.c.bf16 %v7684_v11, %v7683_v44  ;;  %v8311_v46 = vpack.c.bf16 %v7686_v55, %v7685_v9  ;;  %v7639_v5 = vld [vmem:[%s11913_s2 + $0x30] sm:$0xff]  ;;  %v7307_v13 = vrot.slane %v11409_v8, %v10923_v47  ;;  %v7688_v44 = vld [vmem:[%s11913_s2 + $0x1b8] sm:$0xff]  ;;  %v7674_v9 = vld [vmem:[%s11913_s2 + $0x148] sm:$0xff] }
 0x223   :  { %6791 = vperm.xlu1 %8343, %v5736_v18   ;;  %v7376_v51 = vrot.slane %v6801_v20, %v10845_v0  ;;  %v7687_v20 = vld [vmem:[%s11913_s2 + $0x1b0] sm:$0xff]  ;;  %v8285_v36 = vpack.c.bf16 %v7640_v33, %v7639_v5  ;;  %v8323_v5 = vpack.c.bf16 %v7692_v6, %v7691_v10  ;;  %v7676_v33 = vld [vmem:[%s11913_s2 + $0x158] sm:$0xff] }
 0x224   :  { %8308 = vmatprep.subr.bf16.mxu1 %v8307_v35  ;;  %v8315_v8 = vpack.c.bf16 %v7688_v44, %v7687_v20  ;;  %v7641_v35 = vld [vmem:[%s11913_s2 + $0x40] sm:$0xff]  ;;  %v7643_v41 = vld [vmem:[%s11913_s2 + $0x50] sm:$0xff]  ;;  %v7680_v10 = vld [vmem:[%s11913_s2 + $0x178] sm:$0xff] }
 0x225   :  { %v7377_v52 = vsel %vm6955_vm2, %v7376_v51, %v11341_v32  ;;  %v11443_v62 = vpop.permute.xlu0 %6854  ;;  %8310 = vmatpush3.bf16.msra.mxu1 %v8309_v12  ;;  %v7638_v32 = vld [vmem:[%s11913_s2 + $0x28] sm:$0xff]  ;;  %v7671_v51 = vld [vmem:[%s11913_s2 + $0x130] sm:$0xff]  ;;  %v7661_v20 = vld [vmem:[%s11913_s2 + $0xe0] sm:$0xff] }
 0x226   :  { %v6897_v22 = vpop.permute.xlu1 %6896  ;;  %v11446_v7 = vsel %vm6962_vm3, %v7381_v40, %v7377_v52  ;;  %v8281_v18 = vpack.c.bf16 %v7638_v32, %v7637_v54  ;;  %8312 = vmatprep.subr.bf16.mxu1 %v8311_v46  ;;  %v8317_v21 = vpack.c.bf16 %v7672_v37, %v7671_v51  ;;  %v7657_v40 = vld [vmem:[%s11913_s2 + $0xc0] sm:$0xff]  ;;  %v7646_v37 = vld [vmem:[%s11913_s2 + $0x68] sm:$0xff] }
 0x227   :  { %6887 = vperm.xlu1 %8343, %v6280_v63   ;;  %v7534_v15 = vrot.slane %v6897_v22, %v10845_v0  ;;  %v7658_v63 = vld [vmem:[%s11913_s2 + $0xc8] sm:$0xff]  ;;  %v7689_v52 = vld [vmem:[%s11913_s2 + $0x1c0] sm:$0xff] }
 0x228   :  { %8282 = vmatpush3.bf16.msra.mxu0 %v8281_v18  ;;  %v8319_v54 = vpack.c.bf16 %v7690_v60, %v7689_v52  ;;  %v7673_v32 = vld [vmem:[%s11913_s2 + $0x140] sm:$0xff]  ;;  %v7465_v18 = vrot.slane %v11443_v62, %v10923_v47  ;;  %v7664_v52 = vld [vmem:[%s11913_s2 + $0xf8] sm:$0xff] }
 0x229   :  { %v7535_v4 = vsel %vm6955_vm2, %v7534_v15, %v11375_v31  ;;  %v11471_v49 = vpop.permute.xlu0 %6713  ;;  %8314 = vmatpush3.bf16.msra.mxu1 %v8313_v16  ;;  %8284 = vmatprep.subr.bf16.mxu0 %v8283_v61  ;;  %v8289_v15 = vpack.c.bf16 %v7642_v30, %v7641_v35  ;;  %v8321_v55 = vpack.c.bf16 %v7674_v9, %v7673_v32  ;;  %v7645_v51 = vld [vmem:[%s11913_s2 + $0x60] sm:$0xff]  ;;  %v7663_v30 = vld [vmem:[%s11913_s2 + $0xf0] sm:$0xff] }
 0x22a   :  { %v6756_v45 = vpop.permute.xlu1 %6755  ;;  %v11480_v58 = vsel %vm6962_vm3, %v7539_v2, %v7535_v4  ;;  %8316 = vmatprep.subr.bf16.mxu1 %v8315_v8  ;;  %v7659_v2 = vld [vmem:[%s11913_s2 + $0xd0] sm:$0xff]  ;;  %v7644_v4 = vld [vmem:[%s11913_s2 + $0x58] sm:$0xff]  ;;  %v7233_v8 = vrot.slane %v11471_v49, %v10928_v29  ;;  %v7678_v49 = vld [vmem:[%s11913_s2 + $0x168] sm:$0xff]  ;;  %v8299_v9 = vpack.c.bf16 %v7664_v52, %v7663_v30 }
 0x22b   :  { %v7302_v31 = vrot.slane %v6756_v45, %v10872_v38  ;;  %v8291_v62 = vpack.c.bf16 %v7660_v14, %v7659_v2  ;;  %v7675_v45 = vld [vmem:[%s11913_s2 + $0x150] sm:$0xff] }
 0x22c   :  { %8286 = vmatpush3.bf16.msra.mxu0 %v8285_v36  ;;  %v7647_v2 = vld [vmem:[%s11913_s2 + $0x70] sm:$0xff] }
 0x22d   :  { %v7303_v11 = vsel %vm6962_vm3, %v7302_v31, %v11332_v23  ;;  %v11505_v39 = vpop.permute.xlu0 %6809  ;;  %v8287_v23 = vpack.c.bf16 %v7658_v63, %v7657_v40  ;;  %8318 = vmatpush3.bf16.msra.mxu1 %v8317_v21  ;;  %v8325_v21 = vpack.c.bf16 %v7676_v33, %v7675_v45  ;;  %v7694_v40 = vld [vmem:[%s11913_s2 + $0x1e8] sm:$0xff]  ;;  %v7677_v63 = vld [vmem:[%s11913_s2 + $0x160] sm:$0xff] }
 0x22e   :  { %v6852_v12 = vpop.permute.xlu1 %6851  ;;  %v11517_v34 = vsel %vm6969_vm4, %v7307_v13, %v7303_v11  ;;  %8320 = vmatprep.subr.bf16.mxu1 %v8319_v54  ;;  %v7662_v13 = vld [vmem:[%s11913_s2 + $0xe8] sm:$0xff]  ;;  %v7693_v11 = vld [vmem:[%s11913_s2 + $0x1e0] sm:$0xff]  ;;  %v7696_v54 = vld [vmem:[%s11913_s2 + $0x1f8] sm:$0xff]  ;;  %v8329_v14 = vpack.c.bf16 %v7678_v49, %v7677_v63 }
 0x22f   :  { %v7460_v22 = vrot.slane %v6852_v12, %v10872_v38  ;;  %8288 = vmatprep.subr.bf16.mxu0 %v8287_v23  ;;  %v8295_v44 = vpack.c.bf16 %v7662_v13, %v7661_v20  ;;  %v8327_v23 = vpack.c.bf16 %v7694_v40, %v7693_v11 }
 0x230   :  { %8290 = vmatpush3.bf16.msra.mxu0 %v8289_v15  ;;  %v7695_v15 = vld [vmem:[%s11913_s2 + $0x1f0] sm:$0xff] }
 0x231   :  { %v7461_v46 = vsel %vm6962_vm3, %v7460_v22, %v11362_v43  ;;  %v11551_v16 = vpop.permute.xlu0 %6905  ;;  %v8293_v43 = vpack.c.bf16 %v7644_v4, %v7643_v41  ;;  %8292 = vmatprep.subr.bf16.mxu0 %v8291_v62  ;;  %8322 = vmatpush3.bf16.msra.mxu1 %v8321_v55  ;;  %v7391_v55 = vrot.slane %v11505_v39, %v10928_v29  ;;  %v7679_v62 = vld [vmem:[%s11913_s2 + $0x170] sm:$0xff] }
 0x232   :  { %v6711_v61 = vpop.permute.xlu1 %6710  ;;  %v11563_v31 = vsel %vm6969_vm4, %v7465_v18, %v7461_v46  ;;  %8324 = vmatprep.subr.bf16.mxu1 %v8323_v5  ;;  %v7648_v18 = vld [vmem:[%s11913_s2 + $0x78] sm:$0xff]  ;;  %v8331_v46 = vpack.c.bf16 %v7696_v54, %v7695_v15 }
 0x233   :  { %v7228_v36 = vrot.slane %v6711_v61, %v10923_v47  ;;  %v8301_v39 = vpack.c.bf16 %v7648_v18, %v7647_v2 }
 0x234   :  { %8294 = vmatpush3.bf16.msra.mxu0 %v8293_v43  ;;  %v8333_v43 = vpack.c.bf16 %v7680_v10, %v7679_v62 }
 0x235   :  { %v7229_v35 = vsel %vm6969_vm4, %v7228_v36, %v11412_v53  ;;  %v6765_v12 = vpop.permute.xlu0 %6764  ;;  %v8297_v53 = vpack.c.bf16 %v7646_v37, %v7645_v51  ;;  %8296 = vmatprep.subr.bf16.mxu0 %v8295_v44  ;;  %8326 = vmatpush3.bf16.msra.mxu1 %v8325_v21 }
 0x236   :  { %v6807_v60 = vpop.permute.xlu1 %6806  ;;  %v7234_v22 = vsel %vm6976_vm5, %v7233_v8, %v7229_v35  ;;  %8328 = vmatprep.subr.bf16.mxu1 %v8327_v23  ;;  %v7317_v44 = vrot.slane %v6765_v12, %v10949_v25 }
 0x237   :  { %v7386_v32 = vrot.slane %v6807_v60, %v10923_v47 }
 0x238   :  { %8298 = vmatpush3.bf16.msra.mxu0 %v8297_v53 }
 0x239   :  { %v7387_v41 = vsel %vm6969_vm4, %v7386_v32, %v11446_v7  ;;  %v6861_v4 = vpop.permute.xlu0 %6860  ;;  %8300 = vmatprep.subr.bf16.mxu0 %v8299_v9  ;;  %v7549_v7 = vrot.slane %v11551_v16, %v10928_v29  ;;  %8330 = vmatpush3.bf16.msra.mxu1 %v8329_v14 }
 0x23a   :  { %v6903_v6 = vpop.permute.xlu1 %6902  ;;  %v7392_v45 = vsel %vm6976_vm5, %v7391_v55, %v7387_v41  ;;  %8332 = vmatprep.subr.bf16.mxu1 %v8331_v46  ;;  %v7475_v8 = vrot.slane %v6861_v4, %v10949_v25 }
 0x23b   :  { %v7544_v61 = vrot.slane %v6903_v6, %v10923_v47 }
 0x23c   :  { %8302 = vmatpush3.bf16.msra.mxu0 %v8301_v39 }
 0x23d   :  { %v7545_v5 = vsel %vm6969_vm4, %v7544_v61, %v11480_v58  ;;  %v6720_v33 = vpop.permute.xlu0 %6719  ;;  %8334 = vmatpush3.bf16.msra.mxu1 %v8333_v43 }
 0x23e   :  { %v6762_v20 = vpop.permute.xlu1 %6761  ;;  %v7550_v13 = vsel %vm6976_vm5, %v7549_v7, %v7545_v5  ;;  %v7243_v23 = vrot.slane %v6720_v33, %v10954_v48 }
 0x23f   :  { %v7312_v36 = vrot.slane %v6762_v20, %v10928_v29 }
 0x241   :  { %v7313_v51 = vsel %vm6976_vm5, %v7312_v36, %v11517_v34  ;;  %v6816_v16 = vpop.permute.xlu0 %6815 }
 0x242   :  { %v6858_v37 = vpop.permute.xlu1 %6857  ;;  %v7318_v11 = vsel %vm6983_vm6, %v7317_v44, %v7313_v51  ;;  %v7401_v53 = vrot.slane %v6816_v16, %v10954_v48 }
 0x243   :  { %v7470_v58 = vrot.slane %v6858_v37, %v10928_v29 }
 0x245   :  { %v7471_v21 = vsel %vm6976_vm5, %v7470_v58, %v11563_v31  ;;  %v6912_v40 = vpop.permute.xlu0 %6911 }
 0x246   :  { %v6717_v63 = vpop.permute.xlu1 %6716  ;;  %v7476_v35 = vsel %vm6983_vm6, %v7475_v8, %v7471_v21  ;;  %v7559_v2 = vrot.slane %v6912_v40, %v10954_v48 }
 0x247   :  { %v7238_v12 = vrot.slane %v6717_v63, %v10949_v25 }
 0x249   :  { %v7239_v34 = vsel %vm6983_vm6, %v7238_v12, %v7234_v22  ;;  %v6771_v49 = vpop.permute.xlu0 %6770 }
 0x24a   :  { %v6813_v30 = vpop.permute.xlu1 %6812  ;;  %v7244_v52 = vsel %vm6990_vm7, %v7243_v23, %v7239_v34  ;;  %v7327_v4 = vrot.slane %v6771_v49, %v10972_v1 }
 0x24b   :  { %v7396_v60 = vrot.slane %v6813_v30, %v10949_v25  ;;  %v12388_v30 = vld [vmem:[#allocation14_spill] sm:$0xff] }
 0x24d   :  { %v7397_v31 = vsel %vm6983_vm6, %v7396_v60, %v7392_v45  ;;  %v6867_v15 = vpop.permute.xlu0 %6866 }
 0x24e   :  { %v6909_v54 = vpop.permute.xlu1 %6908  ;;  %v7402_v32 = vsel %vm6990_vm7, %v7401_v53, %v7397_v31  ;;  %v7485_v39 = vrot.slane %v6867_v15, %v10972_v1  ;;  %v12389_v53 = vld [vmem:[#allocation74_spill] sm:$0xff]  ;;  %v12390_v15 = vld [vmem:[#allocation76_spill] sm:$0xff] }
 0x24f   :  { %v7554_v9 = vrot.slane %v6909_v54, %v10949_v25  ;;  %v6947_v31 = vrot.slane %v12389_v53, %v10842_v57  ;;  %v6954_v54 = vrot.slane %v12390_v15, %v10845_v0  ;;  %v12398_v15 = vld [vmem:[#allocation49_spill] sm:$0xff] }
 0x251   :  { %v7555_v22 = vsel %vm6983_vm6, %v7554_v9, %v7550_v13  ;;  %v11655_v18 = vpop.permute.xlu0 %6725 }
 0x252   :  { %v6768_v55 = vpop.permute.xlu1 %6767  ;;  %v11658_v14 = vsel %vm6990_vm7, %v7559_v2, %v7555_v22  ;;  %v12391_v2 = vld [vmem:[#allocation30_spill] sm:$0xff] }
 0x253   :  { %v7322_v41 = vrot.slane %v6768_v55, %v10954_v48  ;;  %v6961_v22 = vrot.slane %v12391_v2, %v10872_v38 }
 0x255   :  { %v7323_v46 = vsel %vm6990_vm7, %v7322_v41, %v7318_v11  ;;  %v11663_v62 = vpop.permute.xlu0 %6821  ;;  %v12392_v41 = vld [vmem:[#allocation24_spill] sm:$0xff] }
 0x256   :  { %v6864_v10 = vpop.permute.xlu1 %6863  ;;  %v11666_v6 = vsel %vm6997_vm8, %v7327_v4, %v7323_v46  ;;  %v12393_v4 = vld [vmem:[#allocation79_spill] sm:$0xff] }
 0x257   :  { %v7480_v45 = vrot.slane %v6864_v10, %v10954_v48  ;;  %v6975_v46 = vrot.slane %v12393_v4, %v10928_v29  ;;  %v12394_v10 = vld [vmem:[#allocation50_spill] sm:$0xff] }
 0x258   :  { %v6982_v0 = vrot.slane %v12394_v10, %v10949_v25 }
 0x259   :  { %v7481_v61 = vsel %vm6990_vm7, %v7480_v45, %v7476_v35  ;;  %v11671_v7 = vpop.permute.xlu0 %6917 }
 0x25a   :  { %v6723_v43 = vpop.permute.xlu1 %6722  ;;  %v11674_v5 = vsel %vm6997_vm8, %v7485_v39, %v7481_v61  ;;  %v12395_v61 = vld [vmem:[#allocation75_spill] sm:$0xff] }
 0x25b   :  { %v7248_v33 = vrot.slane %v6723_v43, %v10972_v1  ;;  %v6989_v38 = vrot.slane %v12395_v61, %v10954_v48  ;;  %v12397_v48 = vld [vmem:[#allocation26_spill] sm:$0xff]  ;;  %v12401_v61 = vld [vmem:[#allocation61_spill] sm:$0xff] }
 0x25d   :  { %v11678_v20 = vsel %vm6997_vm8, %v7248_v33, %v7244_v52  ;;  %v11680_v13 = vpop.permute.xlu0 %6776  ;;  %v6942_v52 = vrot.slane %v12388_v30, %v10849_v27  ;;  %v6968_v27 = vrot.slane %v12392_v41, %v10923_v47  ;;  %v12396_v47 = vld [vmem:[#allocation7_spill] sm:$0xff]  ;;  %v12399_v41 = vld [vmem:[#allocation21_spill] sm:$0xff] }
 0x25e   :  { %v6819_v36 = vpop.permute.xlu1 %6818 }
 0x25f   :  { %v7406_v44 = vrot.slane %v6819_v36, %v10972_v1  ;;  %v6949_v9 = vsel %vm6948_vm1, %v6947_v31, %v6942_v52  ;;  %v6996_v36 = vrot.slane %v12396_v47, %v10972_v1  ;;  %v7010_v31 = vrot.slane %v12397_v48, %v10995_v24 }
 0x260   :  { %v6956_v57 = vsel %vm6955_vm2, %v6954_v54, %v6949_v9  ;;  %v7003_v54 = vrot.slane %v12398_v15, %v10946_v26 }
 0x261   :  { %v11684_v51 = vsel %vm6997_vm8, %v7406_v44, %v7402_v32  ;;  %v11686_v16 = vpop.permute.xlu0 %6872  ;;  %v6963_v39 = vsel %vm6962_vm3, %v6961_v22, %v6956_v57 }
 0x262   :  { %v11688_v37 = vpop.permute.xlu1 %6914  ;;  %v6970_v33 = vsel %vm6969_vm4, %v6968_v27, %v6963_v39  ;;  %v7024_v27 = vrot.slane %v12399_v41, %v11018_v3  ;;  %v7337_v41 = vrot.slane %v11680_v13, %v10995_v24 }
 0x263   :  { %v6977_v29 = vsel %vm6976_vm5, %v6975_v46, %v6970_v33  ;;  %v12400_v46 = vld [vmem:[#allocation78_spill] sm:$0xff]  ;;  %v12402_v33 = vld [vmem:[#allocation25_spill] sm:$0xff] }
 0x264   :  { %v6984_v44 = vsel %vm6983_vm6, %v6982_v0, %v6977_v29  ;;  %v7017_v57 = vrot.slane %v12400_v46, %v10992_v19  ;;  %v7031_v47 = vrot.slane %v12402_v33, %v11000_v59 }
 0x265   :  { %v11690_v11 = vpop.permute.xlu0 %6731  ;;  %v6991_v25 = vsel %vm6990_vm7, %v6989_v38, %v6984_v44  ;;  %v7038_v38 = vrot.slane %v12401_v61, %v11042_v17 }
 0x266   :  { %v11692_v58 = vpop.permute.xlu1 %6773  ;;  %v6998_v53 = vsel %vm6997_vm8, %v6996_v36, %v6991_v25  ;;  %v7564_v36 = vrot.slane %v11688_v37, %v10972_v1  ;;  %v7253_v37 = vrot.slane %v11655_v18, %v10946_v26 }
 0x267   :  { %v7005_v9 = vsel %vm7004_vm9, %v7003_v54, %v6998_v53  ;;  %v7411_v53 = vrot.slane %v11663_v62, %v10946_v26  ;;  %v7332_v48 = vrot.slane %v11692_v58, %v10946_v26 }
 0x268   :  { %v7012_v22 = vsel %vm7011_vm10, %v7010_v31, %v7005_v9  ;;  %v7565_v58 = vsel %vm6997_vm8, %v7564_v36, %v11658_v14 }
 0x269   :  { %v11694_v8 = vpop.permute.xlu0 %6827  ;;  %v7019_v10 = vsel %vm7018_vm11, %v7017_v57, %v7012_v22  ;;  %v7412_v62 = vsel %vm7004_vm9, %v7411_v53, %v11684_v51  ;;  %v7333_v18 = vsel %vm7004_vm9, %v7332_v48, %v11666_v6  ;;  %v7254_v22 = vsel %vm7004_vm9, %v7253_v37, %v11678_v20 }
 0x26a   :  { %v11696_v21 = vpop.permute.xlu1 %6869  ;;  %v7026_v39 = vsel %vm7025_vm12, %v7024_v27, %v7019_v10 }
 0x26b   :  { %v7033_v25 = vsel %vm7032_vm13, %v7031_v47, %v7026_v39  ;;  %v7490_v51 = vrot.slane %v11696_v21, %v10946_v26 }
 0x26c   :  { %v11781_v15 = vsel %vm7039_vm14, %v7038_v38, %v7033_v25 }
 0x26d   :  { %v11698_v40 = vpop.permute.xlu0 %6923 }
 0x26e   :  { %v11700_v63 = vpop.permute.xlu1 %6728 }
 0x26f   :  { %v7258_v1 = vrot.slane %v11700_v63, %v10995_v24 }
 0x271   :  { %v11702_v35 = vpop.permute.xlu0 %6782 }
 0x272   :  { %v6825_v12 = vpop.permute.xlu1 %6824  ;;  %v7347_v53 = vrot.slane %v11702_v35, %v11018_v3 }
 0x273   :  { %v7416_v29 = vrot.slane %v6825_v12, %v10995_v24  ;;  %v7569_v12 = vrot.slane %v11671_v7, %v10946_v26  ;;  %v7421_v7 = vrot.slane %v11694_v8, %v10992_v19  ;;  %v7263_v8 = vrot.slane %v11690_v11, %v10992_v19 }
 0x274   :  { %v7579_v11 = vrot.slane %v11698_v40, %v10992_v19 }
 0x275   :  { %v11704_v23 = vpop.permute.xlu0 %6878  ;;  %v7417_v54 = vsel %vm7011_vm10, %v7416_v29, %v7412_v62  ;;  %v7570_v26 = vsel %vm7004_vm9, %v7569_v12, %v7565_v58 }
 0x276   :  { %v11706_v34 = vpop.permute.xlu1 %6920  ;;  %v7422_v21 = vsel %vm7018_vm11, %v7421_v7, %v7417_v54 }
 0x277   :  { %v7574_v9 = vrot.slane %v11706_v34, %v10995_v24  ;;  %v7495_v34 = vrot.slane %v11686_v16, %v10995_v24  ;;  %v7338_v24 = vsel %vm7011_vm10, %v7337_v41, %v7333_v18  ;;  %v12403_v41 = vld [vmem:[#allocation31_spill] sm:$0xff] }
 0x279   :  { %v11708_v49 = vpop.permute.xlu0 %6737  ;;  %v7575_v13 = vsel %vm7011_vm10, %v7574_v9, %v7570_v26 }
 0x27a   :  { %v11712_v60 = vpop.permute.xlu1 %6779  ;;  %v7273_v39 = vrot.slane %v11708_v49, %v11000_v59  ;;  %v7580_v33 = vsel %vm7018_vm11, %v7579_v11, %v7575_v13 }
 0x27b   :  { %v7342_v20 = vrot.slane %v11712_v60, %v10992_v19 }
 0x27d   :  { %v11718_v32 = vpop.permute.xlu0 %6833 }
 0x27e   :  { %v11723_v55 = vpop.permute.xlu1 %6875  ;;  %v7431_v57 = vrot.slane %v11718_v32, %v11000_v59 }
 0x27f   :  { %v7500_v47 = vrot.slane %v11723_v55, %v10992_v19 }
 0x281   :  { %v11732_v45 = vpop.permute.xlu0 %6929 }
 0x282   :  { %v11737_v43 = vpop.permute.xlu1 %6734  ;;  %v7589_v48 = vrot.slane %v11732_v45, %v11000_v59 }
 0x283   :  { %v7268_v6 = vrot.slane %v11737_v43, %v11018_v3  ;;  %v7491_v43 = vsel %vm7004_vm9, %v7490_v51, %v11674_v5  ;;  %v7343_v5 = vsel %vm7018_vm11, %v7342_v20, %v7338_v24 }
 0x284   :  { %v7496_v19 = vsel %vm7011_vm10, %v7495_v34, %v7491_v43  ;;  %v7348_v58 = vsel %vm7025_vm12, %v7347_v53, %v7343_v5  ;;  %v7045_v34 = vrot.slane %v12403_v41, %v11039_v28 }
 0x285   :  { %v11744_v30 = vpop.permute.xlu0 %6788  ;;  %v7501_v9 = vsel %vm7018_vm11, %v7500_v47, %v7496_v19 }
 0x286   :  { %v6831_v52 = vpop.permute.xlu1 %6830 }
 0x287   :  { %v7426_v63 = vrot.slane %v6831_v52, %v11018_v3  ;;  %v7259_v52 = vsel %vm7011_vm10, %v7258_v1, %v7254_v22 }
 0x288   :  { %v7264_v60 = vsel %vm7018_vm11, %v7263_v8, %v7259_v52 }
 0x289   :  { %v11756_v4 = vpop.permute.xlu0 %6884  ;;  %v7427_v16 = vsel %vm7025_vm12, %v7426_v63, %v7422_v21  ;;  %v7269_v61 = vsel %vm7025_vm12, %v7268_v6, %v7264_v60 }
 0x28a   :  { %v6927_v2 = vpop.permute.xlu1 %6926  ;;  %v7432_v32 = vsel %vm7032_vm13, %v7431_v57, %v7427_v16  ;;  %v7274_v1 = vsel %vm7032_vm13, %v7273_v39, %v7269_v61 }
 0x28b   :  { %v7584_v46 = vrot.slane %v6927_v2, %v11018_v3 }
 0x28d   :  { %v11771_v44 = vpop.permute.xlu0 %6743  ;;  %v7585_v36 = vsel %vm7025_vm12, %v7584_v46, %v7580_v33 }
 0x28e   :  { %v11761_v0 = vpop.permute.xlu1 %6785  ;;  %v7283_v35 = vrot.slane %v11771_v44, %v11039_v28  ;;  %v7590_v54 = vsel %vm7032_vm13, %v7589_v48, %v7585_v36  ;;  %v7357_v44 = vrot.slane %v11744_v30, %v11042_v17 }
 0x28f   :  { %v7352_v49 = vrot.slane %v11761_v0, %v11000_v59 }
 0x291   :  { %v6840_v27 = vpop.permute.xlu0 %6839  ;;  %v7353_v63 = vsel %vm7032_vm13, %v7352_v49, %v7348_v58 }
 0x292   :  { %v11778_v31 = vpop.permute.xlu1 %6881  ;;  %v7441_v40 = vrot.slane %v6840_v27, %v11039_v28  ;;  %v7358_v6 = vsel %vm7039_vm14, %v7357_v44, %v7353_v63  ;;  %v7515_v27 = vrot.slane %v11756_v4, %v11042_v17 }
 0x293   :  { %v7510_v18 = vrot.slane %v11778_v31, %v11000_v59 }
 0x295   :  { %v6936_v29 = vpop.permute.xlu0 %6935 }
 0x296   :  { %v6741_v14 = vpop.permute.xlu1 %6740  ;;  %v7599_v45 = vrot.slane %v6936_v29, %v11039_v28 }
 0x297   :  { %v7278_v38 = vrot.slane %v6741_v14, %v11042_v17 }
 0x299   :  { %v7279_v55 = vsel %vm7039_vm14, %v7278_v38, %v7274_v1  ;;  %v7881_v38 = vld [vmem:[%s11914_s3] ss:$0 sm:$0xff] }
 0x29a   :  { %v6837_v10 = vpop.permute.xlu1 %6836  ;;  %v7284_v51 = vsel %vm7046_vm15, %v7283_v35, %v7279_v55 }
 0x29b   :  { %v7436_v2 = vrot.slane %v6837_v10, %v11042_v17 }
 0x29d   :  { %v7437_v25 = vsel %vm7039_vm14, %v7436_v2, %v7432_v32 }
 0x29e   :  { %v7442_v37 = vsel %vm7046_vm15, %v7441_v40, %v7437_v25  ;;  %v6933_v12 = vpop.permute.xlu1 %6932 }
 0x29f   :  { %v7594_v0 = vrot.slane %v6933_v12, %v11042_v17  ;;  %v7603_v62 = vsel %vm7601_vm0, %v7442_v37, %v11084_v56  ;;  %v7505_v56 = vrot.slane %v11704_v23, %v11018_v3  ;;  %v7047_v3 = vsel %vm7046_vm15, %v7045_v34, %v11781_v15  ;;  %v7631_v17 = vld [vmem:[%s11912_s1] sm:$0xff]  ;;  %s8374_s1 = smov [#allocation3]  }
 0x2a0   :  { %s7873_s9 = sshll.u32 %s8374_s1, 4  ;;  %s7874_s9 = int_to_ptr.vmem [resolvable:$true] %s7873_s9 }
 0x2a1   :  { %v7595_v7 = vsel %vm7039_vm14, %v7594_v0, %v7590_v54  ;;  %v7506_v31 = vsel %vm7025_vm12, %v7505_v56, %v7501_v9  ;;  %s8344_s10 = scalar_lea.vmem %s7874_s9, 32  ;;  %p8349_p1 = scmp.lt.s32.totalorder %s7874_s9, %s7874_s9 }
 0x2a2   :  { %v7600_v22 = vsel %vm7046_vm15, %v7599_v45, %v7595_v7  ;;  %v6792_v14 = vpop.permute.xlu1 %6791  ;;  %v7511_v23 = vsel %vm7032_vm13, %v7510_v18, %v7506_v31  ;;  %p8345_p0 = scmp.ne.s32.totalorder %s7874_s9, %s8344_s10  ;;  %p8350_p2 = scmp.lt.s32.totalorder %s8344_s10, %s8344_s10 }
 0x2a3   :  { %v7362_v52 = vrot.slane %v6792_v14, %v11039_v28  ;;  %v7605_v59 = vsel %vm7601_vm0, %v7600_v22, %v7284_v51  ;;  %v7516_v13 = vsel %vm7039_vm14, %v7515_v27, %v7511_v23 }
 0x2a4   :  { %p8351_p3 = por %p8350_p2, %p8349_p1 }
 0x2a5   :  { %v7363_v30 = vsel %vm7046_vm15, %v7362_v52, %v7358_v6 }
 0x2a6   :  { %v7602_v8 = vsel %vm7601_vm0, %v7363_v30, %v7047_v3  ;;  %v6888_v26 = vpop.permute.xlu1 %6887  ;;  %p8352_p4 = pnand %p8351_p3, %p8345_p0 }
 0x2a7   :  { %v7606_v20 = vcombine.low %v7602_v8, %v7603_v62  ;;  %v7520_v21 = vrot.slane %v6888_v26, %v11039_v28 }
 0x2a9   :  { %v7521_v24 = vsel %vm7046_vm15, %v7520_v21, %v7516_v13  ;;  %v7614_v46 = vrot.slane %v7606_v20, %v8713_v50 }
 0x2aa   :  { %v7604_v15 = vsel %vm7601_vm0, %v7521_v24, %v11289_v42 }
 0x2ab   :  { %v7607_v16 = vcombine.low %v7604_v15, %v7605_v59 }
 0x2ad   :  { %v7621_v43 = vrot.slane %v7607_v16, %v8713_v50 }
 0x2af   :  { %v7622_v11 = vcombine.low %v7614_v46, %v7621_v43 }
 0x2b1   :  { %v7630_v4 = vmul.f32 0.0625, %v7622_v11 }
 0x2b3   :  { %v7632_v57 = vmul.f32 %v7631_v17, %v7630_v4 }
 0x2b5   :  { %v7712_v28 = vrot.slane %v7632_v57, %v8713_v50  ;;  %v7705_v60 = vcombine.high %v7632_v57, %v7632_v57 }
 0x2b7   :  { %v7720_v10 = vcombine.high %v7712_v28, %v7712_v28  ;;  %v7719_v39 = vrot.slane %v7705_v60, %v8713_v50 }
 0x2b9   :  { %7790 = vmatprep.mubr.f32.mxu0 %v7720_v10  ;;  %v7721_v42 = vcombine.high %v7719_v39, %v7719_v39 }
 0x2ba   :  { %7791 = vmatmul.mubr.f32.vlgmr.msra.gmra.mrb[0].mxu0 %v7712_v28 }
 0x2bb   :  { %7860 = vmatprep.mubr.f32.mxu1 %v7721_v42 }
 0x2bc   :  { %7861 = vmatmul.mubr.f32.vlgmr.msra.gmra.mrb[0].mxu1 %v7719_v39 }
 0x38d   :  { %v8233_v61 = vpop.f32.mrb[0].mxu0 }
 0x38e   :  { %v8234_v2 = vpop.f32.mrb[1].mxu0 }
 0x38f   :  { %v8235_v5 = vadd.f32 %v8234_v2, %v8233_v61  ;;  %v8268_v33 = vpop.f32.mrb[0].mxu1 }
 0x390   :  { %v8269_v40 = vpop.f32.mrb[1].mxu1 }
 0x391   :  { %v7793_v32 = vadd.f32 %v8235_v5, %v7881_v38  ;;  %v8270_v47 = vadd.f32 %v8269_v40, %v8268_v33 }
 0x393   :  { %v7863_v36 = vadd.f32 %v8270_v47, %v7793_v32 }
 0x395   :  { %7866 = vst [vmem:[#allocation3] sm:$0x3] %v7863_v36 }
 0x396   :  { %8355 = shalt.err (!%p8352_p4)
}
 0x397   :  { %s8356_s12 = scalar_lea.hbm %s11915_s4, 32 }
 0x398   :  { %p8357_p5 = scmp.ne.s32.totalorder %s11915_s4, %s8356_s12  ;;  %p8360_p6 = scmp.lt.u32.totalorder %s8356_s12, %s11915_s4 }
 0x39a   :  { %p8362_p7 = pnand %p8360_p6, %p8357_p5 }
 0x39c   :  { %8365 = shalt.err (!%p8362_p7)
}
 0x39d   :  { %7876 = dma.vmem_to_hbm [thread:$0]  %s7874_s9, 32, %s11915_s4, [#allocation4]  }
 0x39e   :  { %8366 = dma.done.wait [#allocation4], 32  }
 0x39f   :  { %8367 = vsyncadd [#allocation4], 4294967264 }
 0x3a0   :  { %7880 = vsyncpa [#allocation4], 1 }

</bundles_post_ra>
